<compile_context>
chip_gen: v6e
topology: v6e:2x2x1
jax: 0.10.0
libtpu: 0.0.40
codegen_flags: <defaults>
</compile_context>

<pallas_src>
import jax
import jax.numpy as jnp
from jax.experimental import pallas as pl
from jax.experimental.pallas import tpu as pltpu

HIDDEN = 1024


def _round_up(x, m):
    return ((x + m - 1) // m) * m


def da_ins_head_kernel(x_ref, w1_ref, b1_ref, w2_ref, b2_ref, w3_ref, b3_ref,
                       o_ref):
    # fc1 + ReLU  (MXU matmul, f32 accumulate)
    h1 = jnp.dot(x_ref[...], w1_ref[...],
                 preferred_element_type=jnp.float32) + b1_ref[...]
    h1 = jnp.maximum(h1, 0.0)
    # dropout(p=0.5) -> identity (eval mode)

    # fc2 + ReLU  (MXU matmul, f32 accumulate)
    h2 = jnp.dot(h1, w2_ref[...],
                 preferred_element_type=jnp.float32) + b2_ref[...]
    h2 = jnp.maximum(h2, 0.0)
    # dropout(p=0.5) -> identity (eval mode)

    # fc3 (1024 -> 1): VPU multiply + lane reduction instead of a width-1 MXU matmul.
    # w3_ref is a [1, HIDDEN] row broadcast against [TILE_N, HIDDEN].
    o_ref[...] = (jnp.sum(h2 * w3_ref[...], axis=-1, keepdims=True)
                  + b3_ref[...]).astype(o_ref.dtype)


def da_ins_head(x, params, *, tile_n=256):
    """x: [N, C] float32 -> [N, 1] float32 (eval-mode DAInsHead forward)."""
    w1, b1, w2, b2, w3, b3 = params
    N, C = x.shape

    # Tile rows: multiple of 8 (sublane), default 256; shrink for tiny N so we
    # don't pad a handful of rows out to 256.
    tile_n = min(tile_n, _round_up(max(N, 1), 8))
    n_pad = _round_up(N, tile_n)
    if n_pad != N:
        x = jnp.pad(x, ((0, n_pad - N), (0, 0)))

    grid = (n_pad // tile_n,)

    # Weights/biases: constant index_map -> VMEM-resident across all grid steps.
    const = lambda shape: pl.BlockSpec(shape, lambda i: (0,) * len(shape))

    out = pl.pallas_call(
        da_ins_head_kernel,
        out_shape=jax.ShapeDtypeStruct((n_pad, 1), jnp.float32),
        grid=grid,
        in_specs=[
            pl.BlockSpec((tile_n, C), lambda i: (i, 0)),   # x: tiled over rows
            const((C, HIDDEN)), const((1, HIDDEN)),        # fc1
            const((HIDDEN, HIDDEN)), const((1, HIDDEN)),   # fc2
            const((1, HIDDEN)), const((1, 1)),             # fc3 (row weight)
        ],
        out_specs=pl.BlockSpec((tile_n, 1), lambda i: (i, 0)),
        compiler_params=pltpu.CompilerParams(
            dimension_semantics=("parallel",)),
    )(x, w1, b1, w2, b2, w3, b3)

    return out[:N]


def init_params(key, in_channels):
    """Deterministic init matching the PyTorch module's __init__."""
    k1, k2, k3 = jax.random.split(key, 3)
    # fc1/fc2 stored as [in, out] (= transpose of nn.Linear's [out, in])
    w1 = 0.01 * jax.random.normal(k1, (in_channels, HIDDEN), jnp.float32)
    b1 = jnp.zeros((1, HIDDEN), jnp.float32)
    w2 = 0.01 * jax.random.normal(k2, (HIDDEN, HIDDEN), jnp.float32)
    b2 = jnp.zeros((1, HIDDEN), jnp.float32)
    # fc3 stored as a [1, HIDDEN] row (matches nn.Linear's [out=1, in=1024])
    w3 = 0.05 * jax.random.normal(k3, (1, HIDDEN), jnp.float32)
    b3 = jnp.zeros((1, 1), jnp.float32)
    return w1, b1, w2, b2, w3, b3


def reference(x, params):
    w1, b1, w2, b2, w3, b3 = params
    h = jnp.maximum(x @ w1 + b1, 0.0)
    h = jnp.maximum(h @ w2 + b2, 0.0)
    return h @ w3.T + b3


if __name__ == "__main__":
    key = jax.random.PRNGKey(0)
    kx, kp = jax.random.split(key)

    N, C = 8, 32                      # small: 8 instances, 32 input channels
    x = jax.random.normal(kx, (N, C), jnp.float32)
    params = init_params(kp, C)

    out = da_ins_head(x, params)
    out = jax.block_until_ready(out)

    ref = reference(x, params)
    assert out.shape == (N, 1), out.shape
    assert jnp.allclose(out, ref, atol=1e-4, rtol=1e-4), (out, ref)
    print("KERNEL_OK")
</pallas_src>

<mosaic_0001>
module attributes {stable_mosaic.version = 11 : i64} {
  func.func @da_ins_head_kernel(%arg0: i32, %arg1: memref<8x32xf32, #tpu.memory_space<vmem>>, %arg2: memref<32x1024xf32, #tpu.memory_space<vmem>>, %arg3: memref<1x1024xf32, #tpu.memory_space<vmem>>, %arg4: memref<1024x1024xf32, #tpu.memory_space<vmem>>, %arg5: memref<1x1024xf32, #tpu.memory_space<vmem>>, %arg6: memref<1x1024xf32, #tpu.memory_space<vmem>>, %arg7: memref<1x1xf32, #tpu.memory_space<vmem>>, %arg8: memref<8x1xf32, #tpu.memory_space<vmem>>) attributes {dimension_semantics = [#tpu.dimension_semantics<parallel>], iteration_bounds = array<i64: 1>, scalar_prefetch = 0 : i64, scratch_operands = 0 : i64, tpu.core_type = #tpu.core_type<tc>, window_params = [{transform_indices = @transform_0, window_bounds = array<i64: 8, 32>}, {pipeline_mode = #tpu.pipeline_mode<synchronous>, transform_indices = @transform_1, window_bounds = array<i64: 32, 1024>}, {pipeline_mode = #tpu.pipeline_mode<synchronous>, transform_indices = @transform_2, window_bounds = array<i64: 1, 1024>}, {pipeline_mode = #tpu.pipeline_mode<synchronous>, transform_indices = @transform_3, window_bounds = array<i64: 1024, 1024>}, {pipeline_mode = #tpu.pipeline_mode<synchronous>, transform_indices = @transform_4, window_bounds = array<i64: 1, 1024>}, {pipeline_mode = #tpu.pipeline_mode<synchronous>, transform_indices = @transform_5, window_bounds = array<i64: 1, 1024>}, {pipeline_mode = #tpu.pipeline_mode<synchronous>, transform_indices = @transform_6, window_bounds = array<i64: 1, 1>}, {transform_indices = @transform_7, window_bounds = array<i64: 8, 1>}]} {
    %c0 = arith.constant 0 : index
    %c0_0 = arith.constant 0 : index
    %0 = vector.load %arg1[%c0, %c0_0] : memref<8x32xf32, #tpu.memory_space<vmem>>, vector<8x32xf32>
    %c0_1 = arith.constant 0 : index
    %c0_2 = arith.constant 0 : index
    %1 = vector.load %arg2[%c0_1, %c0_2] : memref<32x1024xf32, #tpu.memory_space<vmem>>, vector<32x1024xf32>
    %cst = arith.constant dense<0.000000e+00> : vector<8x1024xf32>
    %2 = tpu.matmul %0, %1, %cst {dimension_numbers = #tpu.dot_dimension_numbers<[1], [0], [0], [1], [0, 0, 1, 1], [], []>} : vector<8x32xf32>, vector<32x1024xf32>, vector<8x1024xf32> -> vector<8x1024xf32>
    %c0_3 = arith.constant 0 : index
    %c0_4 = arith.constant 0 : index
    %3 = vector.load %arg3[%c0_3, %c0_4] : memref<1x1024xf32, #tpu.memory_space<vmem>>, vector<1x1024xf32>
    %4 = vector.broadcast %3 : vector<1x1024xf32> to vector<8x1024xf32>
    %5 = arith.addf %2, %4 : vector<8x1024xf32>
    %cst_5 = arith.constant 0.000000e+00 : f32
    %6 = vector.broadcast %cst_5 : f32 to vector<8x1024xf32>
    %7 = arith.maximumf %5, %6 : vector<8x1024xf32>
    %c0_6 = arith.constant 0 : index
    %c0_7 = arith.constant 0 : index
    %8 = vector.load %arg4[%c0_6, %c0_7] : memref<1024x1024xf32, #tpu.memory_space<vmem>>, vector<1024x1024xf32>
    %cst_8 = arith.constant dense<0.000000e+00> : vector<8x1024xf32>
    %9 = tpu.matmul %7, %8, %cst_8 {dimension_numbers = #tpu.dot_dimension_numbers<[1], [0], [0], [1], [0, 0, 1, 1], [], []>} : vector<8x1024xf32>, vector<1024x1024xf32>, vector<8x1024xf32> -> vector<8x1024xf32>
    %c0_9 = arith.constant 0 : index
    %c0_10 = arith.constant 0 : index
    %10 = vector.load %arg5[%c0_9, %c0_10] : memref<1x1024xf32, #tpu.memory_space<vmem>>, vector<1x1024xf32>
    %11 = vector.broadcast %10 : vector<1x1024xf32> to vector<8x1024xf32>
    %12 = arith.addf %9, %11 : vector<8x1024xf32>
    %cst_11 = arith.constant 0.000000e+00 : f32
    %13 = vector.broadcast %cst_11 : f32 to vector<8x1024xf32>
    %14 = arith.maximumf %12, %13 : vector<8x1024xf32>
    %c0_12 = arith.constant 0 : index
    %c0_13 = arith.constant 0 : index
    %15 = vector.load %arg6[%c0_12, %c0_13] : memref<1x1024xf32, #tpu.memory_space<vmem>>, vector<1x1024xf32>
    %16 = vector.broadcast %15 : vector<1x1024xf32> to vector<8x1024xf32>
    %17 = arith.mulf %14, %16 : vector<8x1024xf32>
    %cst_14 = arith.constant dense<0.000000e+00> : vector<8xf32>
    %18 = vector.multi_reduction <add>, %17, %cst_14 [1] : vector<8x1024xf32> to vector<8xf32>
    %19 = vector.shape_cast %18 : vector<8xf32> to vector<8x1xf32>
    %c0_15 = arith.constant 0 : index
    %c0_16 = arith.constant 0 : index
    %20 = vector.load %arg7[%c0_15, %c0_16] : memref<1x1xf32, #tpu.memory_space<vmem>>, vector<1x1xf32>
    %21 = vector.broadcast %20 : vector<1x1xf32> to vector<8x1xf32>
    %22 = arith.addf %19, %21 : vector<8x1xf32>
    %c0_17 = arith.constant 0 : index
    %c0_18 = arith.constant 0 : index
    %23 = vector.load %arg8[%c0_17, %c0_18] : memref<8x1xf32, #tpu.memory_space<vmem>>, vector<8x1xf32>
    tpu.vector_store %arg8[%c0_17, %c0_18], %22 {strides = array<i32>} : memref<8x1xf32, #tpu.memory_space<vmem>>, vector<8x1xf32>,
    return
  }
  func.func @transform_0(%arg0: i32) -> (i32, i32) {
    %c0_i32 = arith.constant 0 : i32
    %c0_i32_0 = arith.constant 0 : i32
    return %arg0, %c0_i32 : i32, i32
  }
  func.func @transform_1(%arg0: i32) -> (i32, i32) {
    %c0_i32 = arith.constant 0 : i32
    %c0_i32_0 = arith.constant 0 : i32
    %c0_i32_1 = arith.constant 0 : i32
    return %c0_i32, %c0_i32_0 : i32, i32
  }
  func.func @transform_2(%arg0: i32) -> (i32, i32) {
    %c0_i32 = arith.constant 0 : i32
    %c0_i32_0 = arith.constant 0 : i32
    %c0_i32_1 = arith.constant 0 : i32
    return %c0_i32, %c0_i32_0 : i32, i32
  }
  func.func @transform_3(%arg0: i32) -> (i32, i32) {
    %c0_i32 = arith.constant 0 : i32
    %c0_i32_0 = arith.constant 0 : i32
    %c0_i32_1 = arith.constant 0 : i32
    return %c0_i32, %c0_i32_0 : i32, i32
  }
  func.func @transform_4(%arg0: i32) -> (i32, i32) {
    %c0_i32 = arith.constant 0 : i32
    %c0_i32_0 = arith.constant 0 : i32
    %c0_i32_1 = arith.constant 0 : i32
    return %c0_i32, %c0_i32_0 : i32, i32
  }
  func.func @transform_5(%arg0: i32) -> (i32, i32) {
    %c0_i32 = arith.constant 0 : i32
    %c0_i32_0 = arith.constant 0 : i32
    %c0_i32_1 = arith.constant 0 : i32
    return %c0_i32, %c0_i32_0 : i32, i32
  }
  func.func @transform_6(%arg0: i32) -> (i32, i32) {
    %c0_i32 = arith.constant 0 : i32
    %c0_i32_0 = arith.constant 0 : i32
    %c0_i32_1 = arith.constant 0 : i32
    return %c0_i32, %c0_i32_0 : i32, i32
  }
  func.func @transform_7(%arg0: i32) -> (i32, i32) {
    %c0_i32 = arith.constant 0 : i32
    %c0_i32_0 = arith.constant 0 : i32
    return %arg0, %c0_i32 : i32, i32
  }
}

</mosaic_0001>

<bundles_post_ra>
// kernel: tpu_custom_call.1
= control target key start
LH: loop header
LB: loop body
LE: loop exit
PB: predicated region body
PF: predicated region fallthrough
CT: control target
= control target key end

     0   :  { %s3101_s0 = inlined_call_operand.hbm [shape: f32[8,32], index: 0, kind: input, shape index: {}]   ;;  %s3102_s1 = inlined_call_operand.hbm [shape: f32[32,1024], index: 1, kind: input, shape index: {}]   ;;  %s3103_s2 = inlined_call_operand.hbm [shape: f32[1,1024], index: 2, kind: input, shape index: {}]   ;;  %s3104_s3 = inlined_call_operand.hbm [shape: f32[1024,1024], index: 3, kind: input, shape index: {}]   ;;  %s3105_s4 = inlined_call_operand.hbm [shape: f32[1,1024], index: 4, kind: input, shape index: {}]   ;;  %s3106_s5 = inlined_call_operand.hbm [shape: f32[1,1024], index: 5, kind: input, shape index: {}]   ;;  %s3107_s6 = inlined_call_operand.<no memory space> [shape: f32[1,1], index: 6, kind: input, shape index: {}]   ;;  %s3108_s7 = inlined_call_operand.vmem [shape: f32[8,1], index: 7, kind: output, shape index: {}]  }
   0x1   :  { %v12_v0 = vstv %s3107_s6 }
   0x2   :  { %13 = vst [vmem:[#allocation2] sm:$0x1] %v12_v0 }
   0x3   :  { %14 = vsyncpa [#allocation4], 0 }
   0x4   :  { %15 = vsyncpa [#allocation6], 0 }
   0x5   :  { %16 = vsyncpa [#allocation9], 0 }
   0x6   :  { %17 = vsyncpa [#allocation12], 0  ;;  %s2902_s26 = smov [#allocation5]  }
   0x7   :  { %s33_s27 = sshll.u32 %s2902_s26, 4  ;;  %s34_s27 = int_to_ptr.vmem [resolvable:$true] %s33_s27 }
   0x8   :  { %s2782_s28 = scalar_lea.vmem %s34_s27, 4096  ;;  %p2787_p1 = scmp.lt.s32.totalorder %s34_s27, %s34_s27 }
   0x9   :  { %p2783_p0 = scmp.ne.s32.totalorder %s34_s27, %s2782_s28  ;;  %p2788_p2 = scmp.lt.s32.totalorder %s2782_s28, %s2782_s28 }
   0xb   :  { %p2789_p3 = por %p2788_p2, %p2787_p1 }
   0xd   :  { %p2790_p4 = pnand %p2789_p3, %p2783_p0 }
   0xf   :  { %2793 = shalt.err (!%p2790_p4)
}
  0x10   :  { %s2903_s29 = smov 1024   ;;  %s2904_s30 = smov 64  }
  0x11   :  { %39 = dma.hbm_to_vmem [thread:$0]  %s3102_s1, 4096, %s34_s27, [#allocation6], %s2903_s29, %s2903_s29, %s2904_s30  }
  0x12   :  { %s2905_s6 = smov [#allocation8]   ;;  %s2906_s11 = smov [#allocation3]  }
  0x13   :  { %s55_s10 = sshll.u32 %s2905_s6, 4  ;;  %s24_s12 = sshll.u32 %s2906_s11, 4  ;;  %s56_s10 = int_to_ptr.vmem [resolvable:$true] %s55_s10  ;;  %s25_s12 = int_to_ptr.vmem [resolvable:$true] %s24_s12 }
  0x14   :  { %s2802_s13 = scalar_lea.vmem %s56_s10, 131072  ;;  %p2807_p6 = scmp.lt.s32.totalorder %s56_s10, %s56_s10 }
  0x15   :  { %p2803_p5 = scmp.ne.s32.totalorder %s56_s10, %s2802_s13  ;;  %p2808_p7 = scmp.lt.s32.totalorder %s2802_s13, %s2802_s13 }
  0x17   :  { %p2809_p8 = por %p2808_p7, %p2807_p6 }
  0x19   :  { %p2810_p9 = pnand %p2809_p8, %p2803_p5 }
  0x1b   :  { %2813 = shalt.err (!%p2810_p9)
}
  0x1c   :  { %61 = dma.hbm_to_vmem [thread:$0]  %s3104_s3, 131072, %s56_s10, [#allocation9], %s2903_s29, %s2903_s29, %s2904_s30  }
  0x1d   :  { %s2822_s16 = scalar_lea.vmem %s25_s12, 128  ;;  %p2827_p11 = scmp.lt.s32.totalorder %s25_s12, %s25_s12 }
  0x1e   :  { %p2823_p10 = scmp.ne.s32.totalorder %s25_s12, %s2822_s16  ;;  %p2828_p12 = scmp.lt.s32.totalorder %s2822_s16, %s2822_s16 }
  0x20   :  { %p2829_p13 = por %p2828_p12, %p2827_p11 }
  0x22   :  { %p2830_p0 = pnand %p2829_p13, %p2823_p10 }
  0x24   :  { %2833 = shalt.err (!%p2830_p0)
}
  0x25   :  { %27 = dma.hbm_to_vmem [thread:$0]  %s3101_s0, 128, %s25_s12, [#allocation4]  }
  0x26   :  { %s2907_s18 = smov [#allocation7]   ;;  %s2908_s20 = smov [#allocation10]  }
  0x27   :  { %s46_s19 = sshll.u32 %s2907_s18, 4  ;;  %s68_s21 = sshll.u32 %s2908_s20, 4  ;;  %s47_s19 = int_to_ptr.vmem [resolvable:$true] %s46_s19  ;;  %s69_s21 = int_to_ptr.vmem [resolvable:$true] %s68_s21 }
  0x28   :  { %s2842_s22 = scalar_lea.vmem %s47_s19, 128  ;;  %p2847_p2 = scmp.lt.s32.totalorder %s47_s19, %s47_s19 }
  0x29   :  { %p2843_p1 = scmp.ne.s32.totalorder %s47_s19, %s2842_s22  ;;  %p2848_p3 = scmp.lt.s32.totalorder %s2842_s22, %s2842_s22 }
  0x2b   :  { %p2849_p4 = por %p2848_p3, %p2847_p2 }
  0x2d   :  { %p2850_p5 = pnand %p2849_p4, %p2843_p1 }
  0x2f   :  { %2853 = shalt.err (!%p2850_p5)
}
  0x30   :  { %49 = dma.hbm_to_vmem [thread:$0]  %s3103_s2, 128, %s47_s19, [#allocation6]  }
  0x31   :  { %s2862_s24 = scalar_lea.vmem %s69_s21, 128  ;;  %p2867_p7 = scmp.lt.s32.totalorder %s69_s21, %s69_s21 }
  0x32   :  { %p2863_p6 = scmp.ne.s32.totalorder %s69_s21, %s2862_s24  ;;  %p2868_p8 = scmp.lt.s32.totalorder %s2862_s24, %s2862_s24 }
  0x34   :  { %p2869_p9 = por %p2868_p8, %p2867_p7 }
  0x36   :  { %p2870_p10 = pnand %p2869_p9, %p2863_p6 }
  0x38   :  { %2873 = shalt.err (!%p2870_p10)
}
  0x39   :  { %71 = dma.hbm_to_vmem [thread:$0]  %s3105_s4, 128, %s69_s21, [#allocation9]  }
  0x3a   :  { %s2909_s26 = smov [#allocation11]  }
  0x3b   :  { %s78_s27 = sshll.u32 %s2909_s26, 4  ;;  %s79_s27 = int_to_ptr.vmem [resolvable:$true] %s78_s27 }
  0x3c   :  { %s2882_s28 = scalar_lea.vmem %s79_s27, 128  ;;  %p2887_p12 = scmp.lt.s32.totalorder %s79_s27, %s79_s27 }
  0x3d   :  { %p2883_p11 = scmp.ne.s32.totalorder %s79_s27, %s2882_s28  ;;  %p2888_p13 = scmp.lt.s32.totalorder %s2882_s28, %s2882_s28 }
  0x3f   :  { %p2889_p0 = por %p2888_p13, %p2887_p12 }
  0x41   :  { %p2890_p1 = pnand %p2889_p0, %p2883_p11 }
  0x43   :  { %2893 = shalt.err (!%p2890_p1)
}
  0x44   :  { %81 = dma.hbm_to_vmem [thread:$0]  %s3106_s5, 128, %s79_s27, [#allocation12]  }
  0x45   :  { %2894 = dma.done.wait [#allocation4], 128  }
  0x46   :  { %2895 = vsyncadd [#allocation4], 4294967168 }
  0x47   :  { %2896 = dma.done.wait [#allocation6], 4224  }
  0x48   :  { %2897 = vsyncadd [#allocation6], 4294963072 }
  0x49   :  { %2898 = dma.done.wait [#allocation9], 131200  }
  0x4a   :  { %2899 = vsyncadd [#allocation9], 4294836096 }
  0x4b   :  { %2900 = dma.done.wait [#allocation12], 128  }
  0x4c   :  { %2901 = vsyncadd [#allocation12], 4294967168  ;;  %v2910_v1 = vmov 0.0   ;;  %v128_v2 = vld [vmem:[#allocation5 + $0xc8] sm:$0xff]  ;;  %v130_v3 = vld [vmem:[#allocation5 + $0xd8] sm:$0xff]  ;;  %vm177_vm0 = vcmask 261120  }
  0x4d   :  { %245 = vmatprep.mubr.f32.mxu0 %v2910_v1  ;;  %316 = vmatprep.mubr.f32.mxu1 %v2910_v1  ;;  %v127_v4 = vld [vmem:[#allocation5 + $0xc0] sm:$0xff]  ;;  %v129_v5 = vld [vmem:[#allocation5 + $0xd0] sm:$0xff]  ;;  %v120_v6 = vld [vmem:[#allocation5 + $0x88] sm:$0xff]  ;;  %vm2750_vm1 = vcmask 7168  }
  0x4e   :  { %205 = vmatprep.subr.mxu0 %v128_v2  ;;  %276 = vmatprep.subr.mxu1 %v130_v3  ;;  %v122_v7 = vld [vmem:[#allocation5 + $0x98] sm:$0xff]  ;;  %v119_v8 = vld [vmem:[#allocation5 + $0x80] sm:$0xff]  ;;  %v121_v9 = vld [vmem:[#allocation5 + $0x90] sm:$0xff] }
  0x4f   :  { %206 = vmatpush1.msra.mxu0 %v127_v4  ;;  %277 = vmatpush1.msra.mxu1 %v129_v5  ;;  %v112_v10 = vld [vmem:[#allocation5 + $0x48] sm:$0xff]  ;;  %v114_v11 = vld [vmem:[#allocation5 + $0x58] sm:$0xff]  ;;  %v111_v12 = vld [vmem:[#allocation5 + $0x40] sm:$0xff] }
  0x50   :  { %207 = vmatprep.subr.mxu0 %v120_v6  ;;  %278 = vmatprep.subr.mxu1 %v122_v7  ;;  %v113_v13 = vld [vmem:[#allocation5 + $0x50] sm:$0xff]  ;;  %v104_v14 = vld [vmem:[#allocation5 + $0x8] sm:$0xff]  ;;  %v106_v15 = vld [vmem:[#allocation5 + $0x18] sm:$0xff] }
  0x51   :  { %208 = vmatpush1.msra.mxu0 %v119_v8  ;;  %279 = vmatpush1.msra.mxu1 %v121_v9  ;;  %v103_v16 = vld [vmem:[#allocation5] sm:$0xff]  ;;  %v105_v17 = vld [vmem:[#allocation5 + $0x10] sm:$0xff]  ;;  %v102_v18 = vld [vmem:[#allocation3] sm:$0xff] }
  0x52   :  { %209 = vmatprep.subr.mxu0 %v112_v10  ;;  %280 = vmatprep.subr.mxu1 %v114_v11  ;;  %v132_v19 = vld [vmem:[#allocation5 + $0xe8] sm:$0xff]  ;;  %v134_v20 = vld [vmem:[#allocation5 + $0xf8] sm:$0xff]  ;;  %v131_v21 = vld [vmem:[#allocation5 + $0xe0] sm:$0xff] }
  0x53   :  { %210 = vmatpush1.msra.mxu0 %v111_v12  ;;  %281 = vmatpush1.msra.mxu1 %v113_v13  ;;  %v133_v22 = vld [vmem:[#allocation5 + $0xf0] sm:$0xff]  ;;  %v124_v23 = vld [vmem:[#allocation5 + $0xa8] sm:$0xff]  ;;  %v126_v24 = vld [vmem:[#allocation5 + $0xb8] sm:$0xff] }
  0x54   :  { %211 = vmatprep.subr.mxu0 %v104_v14  ;;  %282 = vmatprep.subr.mxu1 %v106_v15  ;;  %v123_v25 = vld [vmem:[#allocation5 + $0xa0] sm:$0xff]  ;;  %v125_v26 = vld [vmem:[#allocation5 + $0xb0] sm:$0xff]  ;;  %v116_v27 = vld [vmem:[#allocation5 + $0x68] sm:$0xff] }
  0x55   :  { %212 = vmatpush1.msra.mxu0 %v103_v16  ;;  %283 = vmatpush1.msra.mxu1 %v105_v17  ;;  %v118_v28 = vld [vmem:[#allocation5 + $0x78] sm:$0xff]  ;;  %v115_v29 = vld [vmem:[#allocation5 + $0x60] sm:$0xff]  ;;  %v117_v30 = vld [vmem:[#allocation5 + $0x70] sm:$0xff] }
  0x56   :  { %2760 = vmatmul.mubr.msk.f32.vlgmr.msra.gmra.mxu0 %vm177_vm0, %v102_v18  ;;  %2761 = vmatmul.mubr.msk.f32.vlgmr.msra.gmra.mxu1 %vm177_vm0, %v102_v18  ;;  %v108_v31 = vld [vmem:[#allocation5 + $0x28] sm:$0xff]  ;;  %v107_v32 = vld [vmem:[#allocation5 + $0x20] sm:$0xff]  ;;  %v110_v33 = vld [vmem:[#allocation5 + $0x38] sm:$0xff] }
  0x57   :  { %347 = vmatprep.subr.mxu0 %v132_v19  ;;  %418 = vmatprep.subr.mxu1 %v134_v20  ;;  %v109_v34 = vld [vmem:[#allocation5 + $0x30] sm:$0xff]  ;;  %v593_v37 = vld [vmem:[#allocation8 + $0x3c0] sm:$0xff] }
  0x58   :  { %348 = vmatpush1.msra.mxu0 %v131_v21  ;;  %419 = vmatpush1.msra.mxu1 %v133_v22  ;;  %v594_v35 = vld [vmem:[#allocation8 + $0x3c8] sm:$0xff]  ;;  %v849_v38 = vld [vmem:[#allocation8 + $0xbc0] sm:$0xff] }
  0x59   :  { %349 = vmatprep.subr.mxu0 %v124_v23  ;;  %420 = vmatprep.subr.mxu1 %v126_v24  ;;  %v850_v36 = vld [vmem:[#allocation8 + $0xbc8] sm:$0xff]  ;;  %v585_v41 = vld [vmem:[#allocation8 + $0x380] sm:$0xff] }
  0x5a   :  { %350 = vmatpush1.msra.mxu0 %v123_v25  ;;  %421 = vmatpush1.msra.mxu1 %v125_v26  ;;  %v586_v39 = vld [vmem:[#allocation8 + $0x388] sm:$0xff]  ;;  %v841_v42 = vld [vmem:[#allocation8 + $0xb80] sm:$0xff] }
  0x5b   :  { %351 = vmatprep.subr.mxu0 %v116_v27  ;;  %422 = vmatprep.subr.mxu1 %v118_v28  ;;  %v842_v40 = vld [vmem:[#allocation8 + $0xb88] sm:$0xff]  ;;  %v577_v45 = vld [vmem:[#allocation8 + $0x340] sm:$0xff] }
  0x5c   :  { %352 = vmatpush1.msra.mxu0 %v115_v29  ;;  %423 = vmatpush1.msra.mxu1 %v117_v30  ;;  %v578_v43 = vld [vmem:[#allocation8 + $0x348] sm:$0xff]  ;;  %v833_v46 = vld [vmem:[#allocation8 + $0xb40] sm:$0xff] }
  0x5d   :  { %353 = vmatprep.subr.mxu0 %v108_v31  ;;  %387 = vmatprep.mubr.f32.mxu0 %v2910_v1  ;;  %v834_v44 = vld [vmem:[#allocation8 + $0xb48] sm:$0xff]  ;;  %v569_v49 = vld [vmem:[#allocation8 + $0x300] sm:$0xff] }
  0x5e   :  { %354 = vmatpush1.msra.mxu0 %v107_v32  ;;  %424 = vmatprep.subr.mxu1 %v110_v33  ;;  %v570_v47 = vld [vmem:[#allocation8 + $0x308] sm:$0xff]  ;;  %v825_v50 = vld [vmem:[#allocation8 + $0xb00] sm:$0xff] }
  0x5f   :  { %2762 = vmatmul.mubr.msk.f32.vlgmr.msra.gmra.mxu0 %vm177_vm0, %v102_v18  ;;  %425 = vmatpush1.msra.mxu1 %v109_v34  ;;  %v826_v48 = vld [vmem:[#allocation8 + $0xb08] sm:$0xff]  ;;  %v561_v53 = vld [vmem:[#allocation8 + $0x2c0] sm:$0xff] }
  0x60   :  { %458 = vmatprep.mubr.f32.mxu1 %v2910_v1  ;;  %1539 = vmatprep.subr.mxu0 %v594_v35  ;;  %v562_v51 = vld [vmem:[#allocation8 + $0x2c8] sm:$0xff]  ;;  %v817_v54 = vld [vmem:[#allocation8 + $0xac0] sm:$0xff] }
  0x61   :  { %2763 = vmatmul.mubr.msk.f32.vlgmr.msra.gmra.mxu1 %vm177_vm0, %v102_v18  ;;  %1610 = vmatprep.subr.mxu1 %v850_v36  ;;  %v818_v52 = vld [vmem:[#allocation8 + $0xac8] sm:$0xff]  ;;  %v553_v57 = vld [vmem:[#allocation8 + $0x280] sm:$0xff] }
  0x62   :  { %1540 = vmatpush1.msra.mxu0 %v593_v37  ;;  %1611 = vmatpush1.msra.mxu1 %v849_v38  ;;  %v554_v55 = vld [vmem:[#allocation8 + $0x288] sm:$0xff]  ;;  %v809_v58 = vld [vmem:[#allocation8 + $0xa80] sm:$0xff] }
  0x63   :  { %1541 = vmatprep.subr.mxu0 %v586_v39  ;;  %1612 = vmatprep.subr.mxu1 %v842_v40  ;;  %v810_v56 = vld [vmem:[#allocation8 + $0xa88] sm:$0xff]  ;;  %v545_v61 = vld [vmem:[#allocation8 + $0x240] sm:$0xff] }
  0x64   :  { %1542 = vmatpush1.msra.mxu0 %v585_v41  ;;  %1613 = vmatpush1.msra.mxu1 %v841_v42  ;;  %v546_v59 = vld [vmem:[#allocation8 + $0x248] sm:$0xff]  ;;  %v801_v62 = vld [vmem:[#allocation8 + $0xa40] sm:$0xff] }
  0x65   :  { %1543 = vmatprep.subr.mxu0 %v578_v43  ;;  %1614 = vmatprep.subr.mxu1 %v834_v44  ;;  %v802_v60 = vld [vmem:[#allocation8 + $0xa48] sm:$0xff]  ;;  %v537_v1 = vld [vmem:[#allocation8 + $0x200] sm:$0xff] }
  0x66   :  { %1544 = vmatpush1.msra.mxu0 %v577_v45  ;;  %1615 = vmatpush1.msra.mxu1 %v833_v46  ;;  %v538_v63 = vld [vmem:[#allocation8 + $0x208] sm:$0xff]  ;;  %v793_v2 = vld [vmem:[#allocation8 + $0xa00] sm:$0xff] }
  0x67   :  { %1545 = vmatprep.subr.mxu0 %v570_v47  ;;  %1616 = vmatprep.subr.mxu1 %v826_v48  ;;  %v794_v0 = vld [vmem:[#allocation8 + $0xa08] sm:$0xff]  ;;  %v529_v5 = vld [vmem:[#allocation8 + $0x1c0] sm:$0xff] }
  0x68   :  { %1546 = vmatpush1.msra.mxu0 %v569_v49  ;;  %1617 = vmatpush1.msra.mxu1 %v825_v50  ;;  %v530_v3 = vld [vmem:[#allocation8 + $0x1c8] sm:$0xff]  ;;  %v785_v6 = vld [vmem:[#allocation8 + $0x9c0] sm:$0xff] }
  0x69   :  { %1547 = vmatprep.subr.mxu0 %v562_v51  ;;  %1618 = vmatprep.subr.mxu1 %v818_v52  ;;  %v786_v4 = vld [vmem:[#allocation8 + $0x9c8] sm:$0xff]  ;;  %v521_v9 = vld [vmem:[#allocation8 + $0x180] sm:$0xff] }
  0x6a   :  { %1548 = vmatpush1.msra.mxu0 %v561_v53  ;;  %1619 = vmatpush1.msra.mxu1 %v817_v54  ;;  %v522_v7 = vld [vmem:[#allocation8 + $0x188] sm:$0xff]  ;;  %v777_v10 = vld [vmem:[#allocation8 + $0x980] sm:$0xff] }
  0x6b   :  { %1549 = vmatprep.subr.mxu0 %v554_v55  ;;  %1620 = vmatprep.subr.mxu1 %v810_v56  ;;  %v778_v8 = vld [vmem:[#allocation8 + $0x988] sm:$0xff]  ;;  %v513_v13 = vld [vmem:[#allocation8 + $0x140] sm:$0xff] }
  0x6c   :  { %1550 = vmatpush1.msra.mxu0 %v553_v57  ;;  %1621 = vmatpush1.msra.mxu1 %v809_v58  ;;  %v514_v11 = vld [vmem:[#allocation8 + $0x148] sm:$0xff]  ;;  %v769_v14 = vld [vmem:[#allocation8 + $0x940] sm:$0xff] }
  0x6d   :  { %1551 = vmatprep.subr.mxu0 %v546_v59  ;;  %1622 = vmatprep.subr.mxu1 %v802_v60  ;;  %v770_v12 = vld [vmem:[#allocation8 + $0x948] sm:$0xff]  ;;  %v505_v17 = vld [vmem:[#allocation8 + $0x100] sm:$0xff] }
  0x6e   :  { %1552 = vmatpush1.msra.mxu0 %v545_v61  ;;  %1623 = vmatpush1.msra.mxu1 %v801_v62  ;;  %v506_v15 = vld [vmem:[#allocation8 + $0x108] sm:$0xff]  ;;  %v761_v18 = vld [vmem:[#allocation8 + $0x900] sm:$0xff] }
  0x6f   :  { %1553 = vmatprep.subr.mxu0 %v538_v63  ;;  %1624 = vmatprep.subr.mxu1 %v794_v0  ;;  %v762_v16 = vld [vmem:[#allocation8 + $0x908] sm:$0xff]  ;;  %v497_v21 = vld [vmem:[#allocation8 + $0xc0] sm:$0xff] }
  0x70   :  { %1554 = vmatpush1.msra.mxu0 %v537_v1  ;;  %1625 = vmatpush1.msra.mxu1 %v793_v2  ;;  %v498_v19 = vld [vmem:[#allocation8 + $0xc8] sm:$0xff]  ;;  %v753_v22 = vld [vmem:[#allocation8 + $0x8c0] sm:$0xff] }
  0x71   :  { %1555 = vmatprep.subr.mxu0 %v530_v3  ;;  %1626 = vmatprep.subr.mxu1 %v786_v4  ;;  %v754_v20 = vld [vmem:[#allocation8 + $0x8c8] sm:$0xff]  ;;  %v489_v25 = vld [vmem:[#allocation8 + $0x80] sm:$0xff] }
  0x72   :  { %1556 = vmatpush1.msra.mxu0 %v529_v5  ;;  %1627 = vmatpush1.msra.mxu1 %v785_v6  ;;  %v490_v23 = vld [vmem:[#allocation8 + $0x88] sm:$0xff]  ;;  %v745_v26 = vld [vmem:[#allocation8 + $0x880] sm:$0xff] }
  0x73   :  { %1557 = vmatprep.subr.mxu0 %v522_v7  ;;  %1628 = vmatprep.subr.mxu1 %v778_v8  ;;  %v746_v24 = vld [vmem:[#allocation8 + $0x888] sm:$0xff]  ;;  %v481_v29 = vld [vmem:[#allocation8 + $0x40] sm:$0xff] }
  0x74   :  { %1558 = vmatpush1.msra.mxu0 %v521_v9  ;;  %1629 = vmatpush1.msra.mxu1 %v777_v10  ;;  %v482_v27 = vld [vmem:[#allocation8 + $0x48] sm:$0xff]  ;;  %v737_v30 = vld [vmem:[#allocation8 + $0x840] sm:$0xff] }
  0x75   :  { %1559 = vmatprep.subr.mxu0 %v514_v11  ;;  %1630 = vmatprep.subr.mxu1 %v770_v12  ;;  %v738_v28 = vld [vmem:[#allocation8 + $0x848] sm:$0xff]  ;;  %v473_v33 = vld [vmem:[#allocation8] sm:$0xff] }
  0x76   :  { %1560 = vmatpush1.msra.mxu0 %v513_v13  ;;  %1631 = vmatpush1.msra.mxu1 %v769_v14  ;;  %v474_v31 = vld [vmem:[#allocation8 + $0x8] sm:$0xff]  ;;  %v729_v34 = vld [vmem:[#allocation8 + $0x800] sm:$0xff] }
  0x77   :  { %1561 = vmatprep.subr.mxu0 %v506_v15  ;;  %1632 = vmatprep.subr.mxu1 %v762_v16  ;;  %v730_v32 = vld [vmem:[#allocation8 + $0x808] sm:$0xff]  ;;  %v721_v37 = vld [vmem:[#allocation8 + $0x7c0] sm:$0xff] }
  0x78   :  { %1562 = vmatpush1.msra.mxu0 %v505_v17  ;;  %1633 = vmatpush1.msra.mxu1 %v761_v18  ;;  %v722_v35 = vld [vmem:[#allocation8 + $0x7c8] sm:$0xff]  ;;  %v977_v38 = vld [vmem:[#allocation8 + $0xfc0] sm:$0xff] }
  0x79   :  { %1563 = vmatprep.subr.mxu0 %v498_v19  ;;  %1634 = vmatprep.subr.mxu1 %v754_v20  ;;  %v978_v36 = vld [vmem:[#allocation8 + $0xfc8] sm:$0xff]  ;;  %v713_v41 = vld [vmem:[#allocation8 + $0x780] sm:$0xff] }
  0x7a   :  { %1564 = vmatpush1.msra.mxu0 %v497_v21  ;;  %1635 = vmatpush1.msra.mxu1 %v753_v22  ;;  %v714_v39 = vld [vmem:[#allocation8 + $0x788] sm:$0xff]  ;;  %v969_v42 = vld [vmem:[#allocation8 + $0xf80] sm:$0xff] }
  0x7b   :  { %1565 = vmatprep.subr.mxu0 %v490_v23  ;;  %1636 = vmatprep.subr.mxu1 %v746_v24  ;;  %v970_v40 = vld [vmem:[#allocation8 + $0xf88] sm:$0xff]  ;;  %v705_v45 = vld [vmem:[#allocation8 + $0x740] sm:$0xff] }
  0x7c   :  { %1566 = vmatpush1.msra.mxu0 %v489_v25  ;;  %1637 = vmatpush1.msra.mxu1 %v745_v26  ;;  %v706_v43 = vld [vmem:[#allocation8 + $0x748] sm:$0xff]  ;;  %v961_v46 = vld [vmem:[#allocation8 + $0xf40] sm:$0xff] }
  0x7d   :  { %1567 = vmatprep.subr.mxu0 %v482_v27  ;;  %1638 = vmatprep.subr.mxu1 %v738_v28  ;;  %v962_v44 = vld [vmem:[#allocation8 + $0xf48] sm:$0xff]  ;;  %v697_v49 = vld [vmem:[#allocation8 + $0x700] sm:$0xff] }
  0x7e   :  { %1568 = vmatpush1.msra.mxu0 %v481_v29  ;;  %1639 = vmatpush1.msra.mxu1 %v737_v30  ;;  %v698_v47 = vld [vmem:[#allocation8 + $0x708] sm:$0xff]  ;;  %v953_v50 = vld [vmem:[#allocation8 + $0xf00] sm:$0xff] }
  0x7f   :  { %1569 = vmatprep.subr.mxu0 %v474_v31  ;;  %1640 = vmatprep.subr.mxu1 %v730_v32  ;;  %v954_v48 = vld [vmem:[#allocation8 + $0xf08] sm:$0xff]  ;;  %v689_v53 = vld [vmem:[#allocation8 + $0x6c0] sm:$0xff] }
  0x80   :  { %1570 = vmatpush1.msra.mxu0 %v473_v33  ;;  %1641 = vmatpush1.msra.mxu1 %v729_v34  ;;  %v690_v51 = vld [vmem:[#allocation8 + $0x6c8] sm:$0xff]  ;;  %v945_v54 = vld [vmem:[#allocation8 + $0xec0] sm:$0xff] }
  0x81   :  { %1571 = vmatprep.subr.mxu0 %v722_v35  ;;  %1642 = vmatprep.subr.mxu1 %v978_v36  ;;  %v946_v52 = vld [vmem:[#allocation8 + $0xec8] sm:$0xff]  ;;  %v681_v57 = vld [vmem:[#allocation8 + $0x680] sm:$0xff] }
  0x82   :  { %1572 = vmatpush2.msra.mxu0 %v721_v37  ;;  %1643 = vmatpush2.msra.mxu1 %v977_v38  ;;  %v682_v55 = vld [vmem:[#allocation8 + $0x688] sm:$0xff]  ;;  %v937_v58 = vld [vmem:[#allocation8 + $0xe80] sm:$0xff]  ;;  %v137_v37 = vlaneseq }
  0x83   :  { %1573 = vmatprep.subr.mxu0 %v714_v39  ;;  %1644 = vmatprep.subr.mxu1 %v970_v40  ;;  %v938_v56 = vld [vmem:[#allocation8 + $0xe88] sm:$0xff]  ;;  %v673_v61 = vld [vmem:[#allocation8 + $0x640] sm:$0xff] }
  0x84   :  { %1574 = vmatpush2.msra.mxu0 %v713_v41  ;;  %1645 = vmatpush2.msra.mxu1 %v969_v42  ;;  %v674_v59 = vld [vmem:[#allocation8 + $0x648] sm:$0xff]  ;;  %v929_v62 = vld [vmem:[#allocation8 + $0xe40] sm:$0xff]  ;;  %v2980_v38 = vshrl.u32 %v137_v37, 7  ;;  %v2988_v41 = vld [vmem:[#allocation7] sm:$0xff] }
  0x85   :  { %1575 = vmatprep.subr.mxu0 %v706_v43  ;;  %1646 = vmatprep.subr.mxu1 %v962_v44  ;;  %v930_v60 = vld [vmem:[#allocation8 + $0xe48] sm:$0xff]  ;;  %v665_v1 = vld [vmem:[#allocation8 + $0x600] sm:$0xff] }
  0x86   :  { %1576 = vmatpush2.msra.mxu0 %v705_v45  ;;  %1647 = vmatpush2.msra.mxu1 %v961_v46  ;;  %v666_v63 = vld [vmem:[#allocation8 + $0x608] sm:$0xff]  ;;  %v921_v2 = vld [vmem:[#allocation8 + $0xe00] sm:$0xff]  ;;  %v2983_v39 = vsub.s32 2, %v2980_v38  ;;  %v2986_v40 = vsub.s32 0, %v2980_v38  ;;  %v2991_v42 = vsub.s32 1, %v2980_v38  ;;  %v2994_v43 = vsub.s32 3, %v2980_v38 }
  0x87   :  { %1577 = vmatprep.subr.mxu0 %v698_v47  ;;  %1648 = vmatprep.subr.mxu1 %v954_v48  ;;  %v922_v0 = vld [vmem:[#allocation8 + $0xe08] sm:$0xff]  ;;  %v657_v5 = vld [vmem:[#allocation8 + $0x5c0] sm:$0xff] }
  0x88   :  { %1578 = vmatpush2.msra.mxu0 %v697_v49  ;;  %1649 = vmatpush2.msra.mxu1 %v953_v50  ;;  %v658_v3 = vld [vmem:[#allocation8 + $0x5c8] sm:$0xff]  ;;  %v913_v6 = vld [vmem:[#allocation8 + $0xdc0] sm:$0xff]  ;;  %v148_v44 = vrot.slane %v2988_v41, %v2983_v39  ;;  %v140_v45 = vrot.slane %v2988_v41, %v2986_v40  ;;  %v144_v46 = vrot.slane %v2988_v41, %v2991_v42 }
  0x89   :  { %1579 = vmatprep.subr.mxu0 %v690_v51  ;;  %1650 = vmatprep.subr.mxu1 %v946_v52  ;;  %v914_v4 = vld [vmem:[#allocation8 + $0xdc8] sm:$0xff]  ;;  %v649_v9 = vld [vmem:[#allocation8 + $0x580] sm:$0xff]  ;;  %v152_v47 = vrot.slane %v2988_v41, %v2994_v43 }
  0x8a   :  { %1580 = vmatpush2.msra.mxu0 %v689_v53  ;;  %1651 = vmatpush2.msra.mxu1 %v945_v54  ;;  %v650_v7 = vld [vmem:[#allocation8 + $0x588] sm:$0xff]  ;;  %v905_v10 = vld [vmem:[#allocation8 + $0xd80] sm:$0xff] }
  0x8b   :  { %1581 = vmatprep.subr.mxu0 %v682_v55  ;;  %1652 = vmatprep.subr.mxu1 %v938_v56  ;;  %v906_v8 = vld [vmem:[#allocation8 + $0xd88] sm:$0xff]  ;;  %v641_v13 = vld [vmem:[#allocation8 + $0x540] sm:$0xff] }
  0x8c   :  { %1582 = vmatpush2.msra.mxu0 %v681_v57  ;;  %1653 = vmatpush2.msra.mxu1 %v937_v58  ;;  %v642_v11 = vld [vmem:[#allocation8 + $0x548] sm:$0xff]  ;;  %v897_v14 = vld [vmem:[#allocation8 + $0xd40] sm:$0xff] }
  0x8d   :  { %1583 = vmatprep.subr.mxu0 %v674_v59  ;;  %1654 = vmatprep.subr.mxu1 %v930_v60  ;;  %v898_v12 = vld [vmem:[#allocation8 + $0xd48] sm:$0xff]  ;;  %v633_v17 = vld [vmem:[#allocation8 + $0x500] sm:$0xff] }
  0x8e   :  { %1584 = vmatpush2.msra.mxu0 %v673_v61  ;;  %1655 = vmatpush2.msra.mxu1 %v929_v62  ;;  %v634_v15 = vld [vmem:[#allocation8 + $0x508] sm:$0xff]  ;;  %v889_v18 = vld [vmem:[#allocation8 + $0xd00] sm:$0xff] }
  0x8f   :  { %1585 = vmatprep.subr.mxu0 %v666_v63  ;;  %1656 = vmatprep.subr.mxu1 %v922_v0  ;;  %v890_v16 = vld [vmem:[#allocation8 + $0xd08] sm:$0xff]  ;;  %v625_v21 = vld [vmem:[#allocation8 + $0x4c0] sm:$0xff] }
  0x90   :  { %1586 = vmatpush2.msra.mxu0 %v665_v1  ;;  %1657 = vmatpush2.msra.mxu1 %v921_v2  ;;  %v626_v19 = vld [vmem:[#allocation8 + $0x4c8] sm:$0xff]  ;;  %v881_v22 = vld [vmem:[#allocation8 + $0xcc0] sm:$0xff] }
  0x91   :  { %1587 = vmatprep.subr.mxu0 %v658_v3  ;;  %1658 = vmatprep.subr.mxu1 %v914_v4  ;;  %v882_v20 = vld [vmem:[#allocation8 + $0xcc8] sm:$0xff]  ;;  %v617_v25 = vld [vmem:[#allocation8 + $0x480] sm:$0xff] }
  0x92   :  { %1588 = vmatpush2.msra.mxu0 %v657_v5  ;;  %1659 = vmatpush2.msra.mxu1 %v913_v6  ;;  %v618_v23 = vld [vmem:[#allocation8 + $0x488] sm:$0xff]  ;;  %v873_v26 = vld [vmem:[#allocation8 + $0xc80] sm:$0xff] }
  0x93   :  { %1589 = vmatprep.subr.mxu0 %v650_v7  ;;  %1660 = vmatprep.subr.mxu1 %v906_v8  ;;  %v874_v24 = vld [vmem:[#allocation8 + $0xc88] sm:$0xff]  ;;  %v609_v29 = vld [vmem:[#allocation8 + $0x440] sm:$0xff] }
  0x94   :  { %1590 = vmatpush2.msra.mxu0 %v649_v9  ;;  %1661 = vmatpush2.msra.mxu1 %v905_v10  ;;  %v610_v27 = vld [vmem:[#allocation8 + $0x448] sm:$0xff]  ;;  %v865_v30 = vld [vmem:[#allocation8 + $0xc40] sm:$0xff] }
  0x95   :  { %1591 = vmatprep.subr.mxu0 %v642_v11  ;;  %1662 = vmatprep.subr.mxu1 %v898_v12  ;;  %v866_v28 = vld [vmem:[#allocation8 + $0xc48] sm:$0xff]  ;;  %v601_v33 = vld [vmem:[#allocation8 + $0x400] sm:$0xff] }
  0x96   :  { %1592 = vmatpush2.msra.mxu0 %v641_v13  ;;  %1663 = vmatpush2.msra.mxu1 %v897_v14  ;;  %v602_v31 = vld [vmem:[#allocation8 + $0x408] sm:$0xff]  ;;  %v857_v34 = vld [vmem:[#allocation8 + $0xc00] sm:$0xff] }
  0x97   :  { %1593 = vmatprep.subr.mxu0 %v634_v15  ;;  %1664 = vmatprep.subr.mxu1 %v890_v16  ;;  %v858_v32 = vld [vmem:[#allocation8 + $0xc08] sm:$0xff]  ;;  %v1105_v60 = vld [vmem:[#allocation8 + $0x13c0] sm:$0xff] }
  0x98   :  { %1594 = vmatpush2.msra.mxu0 %v633_v17  ;;  %1665 = vmatpush2.msra.mxu1 %v889_v18  ;;  %v1106_v35 = vld [vmem:[#allocation8 + $0x13c8] sm:$0xff]  ;;  %v1361_v61 = vld [vmem:[#allocation8 + $0x1bc0] sm:$0xff] }
  0x99   :  { %1595 = vmatprep.subr.mxu0 %v626_v19  ;;  %1666 = vmatprep.subr.mxu1 %v882_v20  ;;  %v1362_v36 = vld [vmem:[#allocation8 + $0x1bc8] sm:$0xff]  ;;  %v1097_v0 = vld [vmem:[#allocation8 + $0x1380] sm:$0xff] }
  0x9a   :  { %1596 = vmatpush2.msra.mxu0 %v625_v21  ;;  %1667 = vmatpush2.msra.mxu1 %v881_v22  ;;  %v1098_v62 = vld [vmem:[#allocation8 + $0x1388] sm:$0xff]  ;;  %v1353_v1 = vld [vmem:[#allocation8 + $0x1b80] sm:$0xff] }
  0x9b   :  { %1597 = vmatprep.subr.mxu0 %v618_v23  ;;  %1668 = vmatprep.subr.mxu1 %v874_v24  ;;  %v1354_v63 = vld [vmem:[#allocation8 + $0x1b88] sm:$0xff]  ;;  %v1089_v4 = vld [vmem:[#allocation8 + $0x1340] sm:$0xff] }
  0x9c   :  { %1598 = vmatpush2.msra.mxu0 %v617_v25  ;;  %1669 = vmatpush2.msra.mxu1 %v873_v26  ;;  %v1090_v2 = vld [vmem:[#allocation8 + $0x1348] sm:$0xff]  ;;  %v1345_v5 = vld [vmem:[#allocation8 + $0x1b40] sm:$0xff] }
  0x9d   :  { %1599 = vmatprep.subr.mxu0 %v610_v27  ;;  %1670 = vmatprep.subr.mxu1 %v866_v28  ;;  %v1346_v3 = vld [vmem:[#allocation8 + $0x1b48] sm:$0xff]  ;;  %v1081_v8 = vld [vmem:[#allocation8 + $0x1300] sm:$0xff] }
  0x9e   :  { %1600 = vmatpush2.msra.mxu0 %v609_v29  ;;  %1671 = vmatpush2.msra.mxu1 %v865_v30  ;;  %v1082_v6 = vld [vmem:[#allocation8 + $0x1308] sm:$0xff]  ;;  %v1337_v9 = vld [vmem:[#allocation8 + $0x1b00] sm:$0xff] }
  0x9f   :  { %1601 = vmatprep.subr.mxu0 %v602_v31  ;;  %1672 = vmatprep.subr.mxu1 %v858_v32  ;;  %v1338_v7 = vld [vmem:[#allocation8 + $0x1b08] sm:$0xff]  ;;  %v1073_v12 = vld [vmem:[#allocation8 + $0x12c0] sm:$0xff] }
  0xa0   :  { %1602 = vmatpush2.msra.mxu0 %v601_v33  ;;  %1673 = vmatpush2.msra.mxu1 %v857_v34  ;;  %v1074_v10 = vld [vmem:[#allocation8 + $0x12c8] sm:$0xff]  ;;  %v1329_v13 = vld [vmem:[#allocation8 + $0x1ac0] sm:$0xff] }
  0xa1   :  { %1681 = vmatprep.subr.mxu0 %v1106_v35  ;;  %1752 = vmatprep.subr.mxu1 %v1362_v36  ;;  %v1330_v11 = vld [vmem:[#allocation8 + $0x1ac8] sm:$0xff]  ;;  %v1065_v16 = vld [vmem:[#allocation8 + $0x1280] sm:$0xff] }
  0xa2   :  { %v1066_v14 = vld [vmem:[#allocation8 + $0x1288] sm:$0xff]  ;;  %v1321_v17 = vld [vmem:[#allocation8 + $0x1a80] sm:$0xff] }
  0xa3   :  { %v1322_v15 = vld [vmem:[#allocation8 + $0x1a88] sm:$0xff]  ;;  %v1057_v20 = vld [vmem:[#allocation8 + $0x1240] sm:$0xff] }
  0xa4   :  { %v1058_v18 = vld [vmem:[#allocation8 + $0x1248] sm:$0xff]  ;;  %v1313_v21 = vld [vmem:[#allocation8 + $0x1a40] sm:$0xff] }
  0xa5   :  { %v1314_v19 = vld [vmem:[#allocation8 + $0x1a48] sm:$0xff]  ;;  %v1049_v24 = vld [vmem:[#allocation8 + $0x1200] sm:$0xff] }
  0xa6   :  { %v1050_v22 = vld [vmem:[#allocation8 + $0x1208] sm:$0xff]  ;;  %v1305_v25 = vld [vmem:[#allocation8 + $0x1a00] sm:$0xff] }
  0xa7   :  { %v1306_v23 = vld [vmem:[#allocation8 + $0x1a08] sm:$0xff]  ;;  %v1041_v28 = vld [vmem:[#allocation8 + $0x11c0] sm:$0xff] }
  0xa8   :  { %v1042_v26 = vld [vmem:[#allocation8 + $0x11c8] sm:$0xff]  ;;  %v1297_v29 = vld [vmem:[#allocation8 + $0x19c0] sm:$0xff] }
  0xa9   :  { %v1298_v27 = vld [vmem:[#allocation8 + $0x19c8] sm:$0xff]  ;;  %v1033_v32 = vld [vmem:[#allocation8 + $0x1180] sm:$0xff] }
  0xaa   :  { %v1034_v30 = vld [vmem:[#allocation8 + $0x1188] sm:$0xff]  ;;  %v1289_v33 = vld [vmem:[#allocation8 + $0x1980] sm:$0xff] }
  0xab   :  { %v1290_v31 = vld [vmem:[#allocation8 + $0x1988] sm:$0xff]  ;;  %v1025_v36 = vld [vmem:[#allocation8 + $0x1140] sm:$0xff] }
  0xac   :  { %v1026_v34 = vld [vmem:[#allocation8 + $0x1148] sm:$0xff]  ;;  %v1281_v37 = vld [vmem:[#allocation8 + $0x1940] sm:$0xff] }
  0xad   :  { %v1282_v35 = vld [vmem:[#allocation8 + $0x1948] sm:$0xff] }
 0x116   :  { %v247_v48 = vpop.f32.mrf.mxu0  ;;  %v318_v49 = vpop.f32.mrf.mxu1 }
 0x117   :  { %v319_v50 = vadd.f32 %v318_v49, %v148_v44  ;;  %v248_v51 = vadd.f32 %v247_v48, %v140_v45  ;;  %v1018_v44 = vld [vmem:[#allocation8 + $0x1108] sm:$0xff] }
 0x118   :  { %v249_v52 = vpop.f32.mrf.mxu0  ;;  %v320_v53 = vpop.f32.mrf.mxu1  ;;  %v1274_v45 = vld [vmem:[#allocation8 + $0x1908] sm:$0xff] }
 0x119   :  { %v250_v54 = vadd.f32 %v249_v52, %v144_v46  ;;  %v321_v55 = vadd.f32 %v320_v53, %v152_v47  ;;  %v3004_v56 = vmax.f32 %v319_v50, 0.0  ;;  %v3010_v59 = vmax.f32 %v248_v51, 0.0  ;;  %v1017_v46 = vld [vmem:[#allocation8 + $0x1100] sm:$0xff]  ;;  %v1010_v48 = vld [vmem:[#allocation8 + $0x10c8] sm:$0xff] }
 0x11a   :  { %v1273_v47 = vld [vmem:[#allocation8 + $0x1900] sm:$0xff]  ;;  %v1266_v49 = vld [vmem:[#allocation8 + $0x18c8] sm:$0xff] }
 0x11b   :  { %v3006_v57 = vmax.f32 %v250_v54, 0.0  ;;  %v3008_v58 = vmax.f32 %v321_v55, 0.0  ;;  %v1009_v50 = vld [vmem:[#allocation8 + $0x10c0] sm:$0xff]  ;;  %v1002_v52 = vld [vmem:[#allocation8 + $0x1088] sm:$0xff] }
 0x11c   :  { %v1265_v51 = vld [vmem:[#allocation8 + $0x18c0] sm:$0xff]  ;;  %v1258_v53 = vld [vmem:[#allocation8 + $0x1888] sm:$0xff] }
 0x11d   :  { %1603 = vmatprep.mubr.f32.mxu0 %v3006_v57  ;;  %1674 = vmatprep.mubr.f32.mxu1 %v3008_v58  ;;  %v1001_v54 = vld [vmem:[#allocation8 + $0x1080] sm:$0xff] }
 0x11e   :  { %1604 = vmatmul.mubr.f32.vlgmr.msra.gmra.mxu0 %v3010_v59  ;;  %1675 = vmatmul.mubr.f32.vlgmr.msra.gmra.mxu1 %v3004_v56  ;;  %v1257_v55 = vld [vmem:[#allocation8 + $0x1880] sm:$0xff] }
 0x11f   :  { %1682 = vmatpush1.msra.mxu0 %v1105_v60  ;;  %1753 = vmatpush1.msra.mxu1 %v1361_v61  ;;  %v994_v60 = vld [vmem:[#allocation8 + $0x1048] sm:$0xff] }
 0x120   :  { %1683 = vmatprep.subr.mxu0 %v1098_v62  ;;  %1754 = vmatprep.subr.mxu1 %v1354_v63  ;;  %v1250_v61 = vld [vmem:[#allocation8 + $0x1848] sm:$0xff]  ;;  %v993_v62 = vld [vmem:[#allocation8 + $0x1040] sm:$0xff] }
 0x121   :  { %1684 = vmatpush1.msra.mxu0 %v1097_v0  ;;  %1755 = vmatpush1.msra.mxu1 %v1353_v1  ;;  %v1249_v63 = vld [vmem:[#allocation8 + $0x1840] sm:$0xff]  ;;  %v986_v0 = vld [vmem:[#allocation8 + $0x1008] sm:$0xff] }
 0x122   :  { %1685 = vmatprep.subr.mxu0 %v1090_v2  ;;  %1756 = vmatprep.subr.mxu1 %v1346_v3  ;;  %v1242_v1 = vld [vmem:[#allocation8 + $0x1808] sm:$0xff]  ;;  %v985_v2 = vld [vmem:[#allocation8 + $0x1000] sm:$0xff] }
 0x123   :  { %1686 = vmatpush1.msra.mxu0 %v1089_v4  ;;  %1757 = vmatpush1.msra.mxu1 %v1345_v5  ;;  %v1241_v3 = vld [vmem:[#allocation8 + $0x1800] sm:$0xff]  ;;  %v1234_v4 = vld [vmem:[#allocation8 + $0x17c8] sm:$0xff] }
 0x124   :  { %1687 = vmatprep.subr.mxu0 %v1082_v6  ;;  %1758 = vmatprep.subr.mxu1 %v1338_v7  ;;  %v1490_v5 = vld [vmem:[#allocation8 + $0x1fc8] sm:$0xff]  ;;  %v1233_v6 = vld [vmem:[#allocation8 + $0x17c0] sm:$0xff] }
 0x125   :  { %1688 = vmatpush1.msra.mxu0 %v1081_v8  ;;  %1759 = vmatpush1.msra.mxu1 %v1337_v9  ;;  %v1489_v7 = vld [vmem:[#allocation8 + $0x1fc0] sm:$0xff]  ;;  %v1226_v8 = vld [vmem:[#allocation8 + $0x1788] sm:$0xff] }
 0x126   :  { %1689 = vmatprep.subr.mxu0 %v1074_v10  ;;  %1760 = vmatprep.subr.mxu1 %v1330_v11  ;;  %v1482_v9 = vld [vmem:[#allocation8 + $0x1f88] sm:$0xff]  ;;  %v1225_v10 = vld [vmem:[#allocation8 + $0x1780] sm:$0xff] }
 0x127   :  { %1690 = vmatpush1.msra.mxu0 %v1073_v12  ;;  %1761 = vmatpush1.msra.mxu1 %v1329_v13  ;;  %v1481_v11 = vld [vmem:[#allocation8 + $0x1f80] sm:$0xff]  ;;  %v1218_v12 = vld [vmem:[#allocation8 + $0x1748] sm:$0xff] }
 0x128   :  { %1691 = vmatprep.subr.mxu0 %v1066_v14  ;;  %1762 = vmatprep.subr.mxu1 %v1322_v15  ;;  %v1474_v13 = vld [vmem:[#allocation8 + $0x1f48] sm:$0xff]  ;;  %v1217_v14 = vld [vmem:[#allocation8 + $0x1740] sm:$0xff] }
 0x129   :  { %1692 = vmatpush1.msra.mxu0 %v1065_v16  ;;  %1763 = vmatpush1.msra.mxu1 %v1321_v17  ;;  %v1473_v15 = vld [vmem:[#allocation8 + $0x1f40] sm:$0xff]  ;;  %v1210_v16 = vld [vmem:[#allocation8 + $0x1708] sm:$0xff] }
 0x12a   :  { %1693 = vmatprep.subr.mxu0 %v1058_v18  ;;  %1764 = vmatprep.subr.mxu1 %v1314_v19  ;;  %v1466_v17 = vld [vmem:[#allocation8 + $0x1f08] sm:$0xff]  ;;  %v1209_v18 = vld [vmem:[#allocation8 + $0x1700] sm:$0xff] }
 0x12b   :  { %1694 = vmatpush1.msra.mxu0 %v1057_v20  ;;  %1765 = vmatpush1.msra.mxu1 %v1313_v21  ;;  %v1465_v19 = vld [vmem:[#allocation8 + $0x1f00] sm:$0xff]  ;;  %v1202_v20 = vld [vmem:[#allocation8 + $0x16c8] sm:$0xff] }
 0x12c   :  { %1695 = vmatprep.subr.mxu0 %v1050_v22  ;;  %1766 = vmatprep.subr.mxu1 %v1306_v23  ;;  %v1458_v21 = vld [vmem:[#allocation8 + $0x1ec8] sm:$0xff]  ;;  %v1201_v22 = vld [vmem:[#allocation8 + $0x16c0] sm:$0xff] }
 0x12d   :  { %1696 = vmatpush1.msra.mxu0 %v1049_v24  ;;  %1767 = vmatpush1.msra.mxu1 %v1305_v25  ;;  %v1457_v23 = vld [vmem:[#allocation8 + $0x1ec0] sm:$0xff]  ;;  %v1194_v24 = vld [vmem:[#allocation8 + $0x1688] sm:$0xff] }
 0x12e   :  { %1697 = vmatprep.subr.mxu0 %v1042_v26  ;;  %1768 = vmatprep.subr.mxu1 %v1298_v27  ;;  %v1450_v25 = vld [vmem:[#allocation8 + $0x1e88] sm:$0xff]  ;;  %v1193_v26 = vld [vmem:[#allocation8 + $0x1680] sm:$0xff] }
 0x12f   :  { %1698 = vmatpush1.msra.mxu0 %v1041_v28  ;;  %1769 = vmatpush1.msra.mxu1 %v1297_v29  ;;  %v1449_v27 = vld [vmem:[#allocation8 + $0x1e80] sm:$0xff]  ;;  %v1186_v28 = vld [vmem:[#allocation8 + $0x1648] sm:$0xff] }
 0x130   :  { %1699 = vmatprep.subr.mxu0 %v1034_v30  ;;  %1770 = vmatprep.subr.mxu1 %v1290_v31  ;;  %v1442_v29 = vld [vmem:[#allocation8 + $0x1e48] sm:$0xff]  ;;  %v1185_v30 = vld [vmem:[#allocation8 + $0x1640] sm:$0xff] }
 0x131   :  { %1700 = vmatpush1.msra.mxu0 %v1033_v32  ;;  %1771 = vmatpush1.msra.mxu1 %v1289_v33  ;;  %v1441_v31 = vld [vmem:[#allocation8 + $0x1e40] sm:$0xff]  ;;  %v1178_v32 = vld [vmem:[#allocation8 + $0x1608] sm:$0xff] }
 0x132   :  { %1701 = vmatprep.subr.mxu0 %v1026_v34  ;;  %1772 = vmatprep.subr.mxu1 %v1282_v35  ;;  %v1434_v33 = vld [vmem:[#allocation8 + $0x1e08] sm:$0xff]  ;;  %v1177_v34 = vld [vmem:[#allocation8 + $0x1600] sm:$0xff] }
 0x133   :  { %1702 = vmatpush1.msra.mxu0 %v1025_v36  ;;  %1773 = vmatpush1.msra.mxu1 %v1281_v37  ;;  %v1433_v35 = vld [vmem:[#allocation8 + $0x1e00] sm:$0xff]  ;;  %v1170_v36 = vld [vmem:[#allocation8 + $0x15c8] sm:$0xff] }
 0x134   :  { %1703 = vmatprep.subr.mxu0 %v1018_v44  ;;  %1774 = vmatprep.subr.mxu1 %v1274_v45  ;;  %v1426_v37 = vld [vmem:[#allocation8 + $0x1dc8] sm:$0xff]  ;;  %v1169_v44 = vld [vmem:[#allocation8 + $0x15c0] sm:$0xff] }
 0x135   :  { %1704 = vmatpush1.msra.mxu0 %v1017_v46  ;;  %1775 = vmatpush1.msra.mxu1 %v1273_v47  ;;  %v1425_v45 = vld [vmem:[#allocation8 + $0x1dc0] sm:$0xff]  ;;  %v3017_v46 = vsub.s32 5, %v2980_v38  ;;  %v1162_v47 = vld [vmem:[#allocation8 + $0x1588] sm:$0xff] }
 0x136   :  { %1705 = vmatprep.subr.mxu0 %v1010_v48  ;;  %1776 = vmatprep.subr.mxu1 %v1266_v49  ;;  %v1418_v48 = vld [vmem:[#allocation8 + $0x1d88] sm:$0xff]  ;;  %v389_v49 = vpop.f32.mrf.mxu0 }
 0x137   :  { %1706 = vmatpush1.msra.mxu0 %v1009_v50  ;;  %1777 = vmatpush1.msra.mxu1 %v1265_v51  ;;  %v1161_v50 = vld [vmem:[#allocation8 + $0x1580] sm:$0xff] }
 0x138   :  { %1707 = vmatprep.subr.mxu0 %v1002_v52  ;;  %1778 = vmatprep.subr.mxu1 %v1258_v53  ;;  %v1417_v51 = vld [vmem:[#allocation8 + $0x1d80] sm:$0xff]  ;;  %v3020_v52 = vsub.s32 7, %v2980_v38  ;;  %v1154_v53 = vld [vmem:[#allocation8 + $0x1548] sm:$0xff] }
 0x139   :  { %1708 = vmatpush1.msra.mxu0 %v1001_v54  ;;  %1779 = vmatpush1.msra.mxu1 %v1257_v55  ;;  %v1410_v54 = vld [vmem:[#allocation8 + $0x1d48] sm:$0xff]  ;;  %v3023_v55 = vsub.s32 6, %v2980_v38 }
 0x13a   :  { %1709 = vmatprep.subr.mxu0 %v994_v60  ;;  %1780 = vmatprep.subr.mxu1 %v1250_v61  ;;  %v460_v60 = vpop.f32.mrf.mxu1  ;;  %v1153_v61 = vld [vmem:[#allocation8 + $0x1540] sm:$0xff] }
 0x13b   :  { %1710 = vmatpush1.msra.mxu0 %v993_v62  ;;  %1781 = vmatpush1.msra.mxu1 %v1249_v63  ;;  %v1409_v62 = vld [vmem:[#allocation8 + $0x1d40] sm:$0xff]  ;;  %v160_v63 = vrot.slane %v2988_v41, %v3017_v46 }
 0x13c   :  { %1711 = vmatprep.subr.mxu0 %v986_v0  ;;  %1782 = vmatprep.subr.mxu1 %v1242_v1  ;;  %v1146_v0 = vld [vmem:[#allocation8 + $0x1508] sm:$0xff] }
 0x13d   :  { %1712 = vmatpush1.msra.mxu0 %v985_v2  ;;  %1783 = vmatpush1.msra.mxu1 %v1241_v3  ;;  %v1402_v1 = vld [vmem:[#allocation8 + $0x1d08] sm:$0xff]  ;;  %v3028_v2 = vsub.s32 4, %v2980_v38  ;;  %v391_v3 = vpop.f32.mrf.mxu0 }
 0x13e   :  { %1713 = vmatprep.subr.mxu0 %v1234_v4  ;;  %1784 = vmatprep.subr.mxu1 %v1490_v5  ;;  %v1145_v4 = vld [vmem:[#allocation8 + $0x1500] sm:$0xff]  ;;  %v392_v38 = vadd.f32 %v391_v3, %v160_v63  ;;  %v563_v63 = vld [vmem:[#allocation8 + $0x2d0] sm:$0xff]  ;;  %v812_v3 = vld [vmem:[#allocation8 + $0xa98] sm:$0xff] }
 0x13f   :  { %1714 = vmatpush2.msra.mxu0 %v1233_v6  ;;  %1785 = vmatpush2.msra.mxu1 %v1489_v7  ;;  %v1401_v5 = vld [vmem:[#allocation8 + $0x1d00] sm:$0xff]  ;;  %v168_v6 = vrot.slane %v2988_v41, %v3020_v52  ;;  %v164_v7 = vrot.slane %v2988_v41, %v3023_v55 }
 0x140   :  { %1715 = vmatprep.subr.mxu0 %v1226_v8  ;;  %1786 = vmatprep.subr.mxu1 %v1482_v9  ;;  %v1138_v8 = vld [vmem:[#allocation8 + $0x14c8] sm:$0xff] }
 0x141   :  { %1716 = vmatpush2.msra.mxu0 %v1225_v10  ;;  %1787 = vmatpush2.msra.mxu1 %v1481_v11  ;;  %v1394_v9 = vld [vmem:[#allocation8 + $0x1cc8] sm:$0xff]  ;;  %v462_v10 = vpop.f32.mrf.mxu1  ;;  %v1137_v11 = vld [vmem:[#allocation8 + $0x14c0] sm:$0xff] }
 0x142   :  { %1717 = vmatprep.subr.mxu0 %v1218_v12  ;;  %1788 = vmatprep.subr.mxu1 %v1474_v13  ;;  %v1393_v12 = vld [vmem:[#allocation8 + $0x1cc0] sm:$0xff]  ;;  %v156_v13 = vrot.slane %v2988_v41, %v3028_v2 }
 0x143   :  { %1718 = vmatpush2.msra.mxu0 %v1217_v14  ;;  %1789 = vmatpush2.msra.mxu1 %v1473_v15  ;;  %v1130_v14 = vld [vmem:[#allocation8 + $0x1488] sm:$0xff]  ;;  %v1377_v41 = vld [vmem:[#allocation8 + $0x1c40] sm:$0xff] }
 0x144   :  { %1719 = vmatprep.subr.mxu0 %v1210_v16  ;;  %1790 = vmatprep.subr.mxu1 %v1466_v17  ;;  %v1386_v15 = vld [vmem:[#allocation8 + $0x1c88] sm:$0xff]  ;;  %v463_v16 = vadd.f32 %v462_v10, %v168_v6  ;;  %v1129_v17 = vld [vmem:[#allocation8 + $0x1480] sm:$0xff]  ;;  %v548_v6 = vld [vmem:[#allocation8 + $0x258] sm:$0xff] }
 0x145   :  { %1720 = vmatpush2.msra.mxu0 %v1209_v18  ;;  %1791 = vmatpush2.msra.mxu1 %v1465_v19  ;;  %v1385_v18 = vld [vmem:[#allocation8 + $0x1c80] sm:$0xff]  ;;  %v461_v19 = vadd.f32 %v460_v60, %v164_v7  ;;  %v827_v60 = vld [vmem:[#allocation8 + $0xb10] sm:$0xff]  ;;  %v804_v7 = vld [vmem:[#allocation8 + $0xa58] sm:$0xff] }
 0x146   :  { %1721 = vmatprep.subr.mxu0 %v1202_v20  ;;  %1792 = vmatprep.subr.mxu1 %v1458_v21  ;;  %v1122_v20 = vld [vmem:[#allocation8 + $0x1448] sm:$0xff]  ;;  %v540_v10 = vld [vmem:[#allocation8 + $0x218] sm:$0xff] }
 0x147   :  { %1722 = vmatpush2.msra.mxu0 %v1201_v22  ;;  %1793 = vmatpush2.msra.mxu1 %v1457_v23  ;;  %v1378_v21 = vld [vmem:[#allocation8 + $0x1c48] sm:$0xff]  ;;  %v3036_v22 = vmax.f32 %v392_v38, 0.0  ;;  %v1121_v23 = vld [vmem:[#allocation8 + $0x1440] sm:$0xff]  ;;  %v796_v38 = vld [vmem:[#allocation8 + $0xa18] sm:$0xff] }
 0x148   :  { %1723 = vmatprep.subr.mxu0 %v1194_v24  ;;  %1794 = vmatprep.subr.mxu1 %v1450_v25  ;;  %v390_v24 = vadd.f32 %v389_v49, %v156_v13  ;;  %v1114_v25 = vld [vmem:[#allocation8 + $0x1408] sm:$0xff]  ;;  %v579_v49 = vld [vmem:[#allocation8 + $0x350] sm:$0xff]  ;;  %v532_v13 = vld [vmem:[#allocation8 + $0x1d8] sm:$0xff] }
 0x149   :  { %1724 = vmatpush2.msra.mxu0 %v1193_v26  ;;  %1795 = vmatpush2.msra.mxu1 %v1449_v27  ;;  %v3038_v26 = vmax.f32 %v463_v16, 0.0  ;;  %v1370_v27 = vld [vmem:[#allocation8 + $0x1c08] sm:$0xff]  ;;  %v787_v16 = vld [vmem:[#allocation8 + $0x9d0] sm:$0xff] }
 0x14a   :  { %1725 = vmatprep.subr.mxu0 %v1186_v28  ;;  %1796 = vmatprep.subr.mxu1 %v1442_v29  ;;  %v1113_v28 = vld [vmem:[#allocation8 + $0x1400] sm:$0xff]  ;;  %v3040_v29 = vmax.f32 %v461_v19, 0.0  ;;  %v523_v19 = vld [vmem:[#allocation8 + $0x190] sm:$0xff] }
 0x14b   :  { %1726 = vmatpush2.msra.mxu0 %v1185_v30  ;;  %1797 = vmatpush2.msra.mxu1 %v1441_v31  ;;  %v1369_v30 = vld [vmem:[#allocation8 + $0x1c00] sm:$0xff]  ;;  %v3043_v31 = vmax.f32 %v390_v24, 0.0  ;;  %v771_v24 = vld [vmem:[#allocation8 + $0x950] sm:$0xff] }
 0x14c   :  { %1727 = vmatprep.subr.mxu0 %v1178_v32  ;;  %1798 = vmatprep.subr.mxu1 %v1434_v33  ;;  %v596_v32 = vld [vmem:[#allocation8 + $0x3d8] sm:$0xff] }
 0x14d   :  { %1728 = vmatpush2.msra.mxu0 %v1177_v34  ;;  %1799 = vmatpush2.msra.mxu1 %v1433_v35  ;;  %v852_v33 = vld [vmem:[#allocation8 + $0xbd8] sm:$0xff]  ;;  %v595_v34 = vld [vmem:[#allocation8 + $0x3d0] sm:$0xff] }
 0x14e   :  { %1729 = vmatprep.subr.mxu0 %v1170_v36  ;;  %1800 = vmatprep.subr.mxu1 %v1426_v37  ;;  %v851_v35 = vld [vmem:[#allocation8 + $0xbd0] sm:$0xff]  ;;  %v588_v36 = vld [vmem:[#allocation8 + $0x398] sm:$0xff] }
 0x14f   :  { %1730 = vmatpush2.msra.mxu0 %v1169_v44  ;;  %1801 = vmatpush2.msra.mxu1 %v1425_v45  ;;  %v844_v37 = vld [vmem:[#allocation8 + $0xb98] sm:$0xff]  ;;  %v587_v44 = vld [vmem:[#allocation8 + $0x390] sm:$0xff] }
 0x150   :  { %1731 = vmatprep.subr.mxu0 %v1162_v47  ;;  %1802 = vmatprep.subr.mxu1 %v1418_v48  ;;  %v843_v45 = vld [vmem:[#allocation8 + $0xb90] sm:$0xff]  ;;  %v580_v47 = vld [vmem:[#allocation8 + $0x358] sm:$0xff] }
 0x151   :  { %1732 = vmatpush2.msra.mxu0 %v1161_v50  ;;  %1803 = vmatpush2.msra.mxu1 %v1417_v51  ;;  %v836_v48 = vld [vmem:[#allocation8 + $0xb58] sm:$0xff]  ;;  %v835_v50 = vld [vmem:[#allocation8 + $0xb50] sm:$0xff] }
 0x152   :  { %1733 = vmatprep.subr.mxu0 %v1154_v53  ;;  %1804 = vmatprep.subr.mxu1 %v1410_v54  ;;  %v572_v51 = vld [vmem:[#allocation8 + $0x318] sm:$0xff]  ;;  %v571_v54 = vld [vmem:[#allocation8 + $0x310] sm:$0xff] }
 0x153   :  { %1734 = vmatpush2.msra.mxu0 %v1153_v61  ;;  %1805 = vmatpush2.msra.mxu1 %v1409_v62  ;;  %v828_v53 = vld [vmem:[#allocation8 + $0xb18] sm:$0xff] }
 0x154   :  { %1735 = vmatprep.subr.mxu0 %v1146_v0  ;;  %1806 = vmatprep.subr.mxu1 %v1402_v1  ;;  %v564_v61 = vld [vmem:[#allocation8 + $0x2d8] sm:$0xff]  ;;  %v819_v0 = vld [vmem:[#allocation8 + $0xad0] sm:$0xff] }
 0x155   :  { %1736 = vmatpush2.msra.mxu0 %v1145_v4  ;;  %1807 = vmatpush2.msra.mxu1 %v1401_v5  ;;  %v820_v62 = vld [vmem:[#allocation8 + $0xad8] sm:$0xff]  ;;  %v555_v4 = vld [vmem:[#allocation8 + $0x290] sm:$0xff] }
 0x156   :  { %1737 = vmatprep.subr.mxu0 %v1138_v8  ;;  %1808 = vmatprep.subr.mxu1 %v1394_v9  ;;  %v556_v1 = vld [vmem:[#allocation8 + $0x298] sm:$0xff]  ;;  %v811_v5 = vld [vmem:[#allocation8 + $0xa90] sm:$0xff] }
 0x157   :  { %1738 = vmatpush2.msra.mxu0 %v1137_v11  ;;  %1809 = vmatpush2.msra.mxu1 %v1393_v12  ;;  %v547_v8 = vld [vmem:[#allocation8 + $0x250] sm:$0xff] }
 0x158   :  { %1739 = vmatprep.subr.mxu0 %v1130_v14  ;;  %1810 = vmatprep.subr.mxu1 %v1386_v15  ;;  %v803_v9 = vld [vmem:[#allocation8 + $0xa50] sm:$0xff]  ;;  %v788_v14 = vld [vmem:[#allocation8 + $0x9d8] sm:$0xff] }
 0x159   :  { %1740 = vmatpush2.msra.mxu0 %v1129_v17  ;;  %1811 = vmatpush2.msra.mxu1 %v1385_v18  ;;  %v539_v11 = vld [vmem:[#allocation8 + $0x210] sm:$0xff]  ;;  %v524_v17 = vld [vmem:[#allocation8 + $0x198] sm:$0xff] }
 0x15a   :  { %1741 = vmatprep.subr.mxu0 %v1122_v20  ;;  %1812 = vmatprep.subr.mxu1 %v1378_v21  ;;  %v795_v12 = vld [vmem:[#allocation8 + $0xa10] sm:$0xff]  ;;  %v780_v18 = vld [vmem:[#allocation8 + $0x998] sm:$0xff] }
 0x15b   :  { %1742 = vmatpush2.msra.mxu0 %v1121_v23  ;;  %1813 = vmatpush2.msra.mxu1 %v1377_v41  ;;  %v531_v15 = vld [vmem:[#allocation8 + $0x1d0] sm:$0xff]  ;;  %v516_v21 = vld [vmem:[#allocation8 + $0x158] sm:$0xff] }
 0x15c   :  { %1743 = vmatprep.subr.mxu0 %v1114_v25  ;;  %1745 = vmatprep.mubr.f32.mxu0 %v3036_v22  ;;  %v779_v20 = vld [vmem:[#allocation8 + $0x990] sm:$0xff]  ;;  %v772_v23 = vld [vmem:[#allocation8 + $0x958] sm:$0xff] }
 0x15d   :  { %1814 = vmatprep.subr.mxu1 %v1370_v27  ;;  %1744 = vmatpush2.msra.mxu0 %v1113_v28  ;;  %v515_v41 = vld [vmem:[#allocation8 + $0x150] sm:$0xff]  ;;  %v508_v25 = vld [vmem:[#allocation8 + $0x118] sm:$0xff] }
 0x15e   :  { %1815 = vmatpush2.msra.mxu1 %v1369_v30  ;;  %1816 = vmatprep.mubr.f32.mxu1 %v3038_v26  ;;  %v764_v27 = vld [vmem:[#allocation8 + $0x918] sm:$0xff]  ;;  %v507_v28 = vld [vmem:[#allocation8 + $0x110] sm:$0xff] }
 0x15f   :  { %1746 = vmatmul.mubr.f32.vlgmr.msra.gmra.mxu0 %v3043_v31  ;;  %1817 = vmatmul.mubr.f32.vlgmr.msra.gmra.mxu1 %v3040_v29  ;;  %v763_v30 = vld [vmem:[#allocation8 + $0x910] sm:$0xff] }
 0x160   :  { %1823 = vmatprep.subr.mxu0 %v596_v32  ;;  %1894 = vmatprep.subr.mxu1 %v852_v33  ;;  %v500_v32 = vld [vmem:[#allocation8 + $0xd8] sm:$0xff] }
 0x161   :  { %1824 = vmatpush1.msra.mxu0 %v595_v34  ;;  %1887 = vmatprep.mubr.f32.mxu0 %v3006_v57  ;;  %v756_v33 = vld [vmem:[#allocation8 + $0x8d8] sm:$0xff]  ;;  %v499_v34 = vld [vmem:[#allocation8 + $0xd0] sm:$0xff] }
 0x162   :  { %1895 = vmatpush1.msra.mxu1 %v851_v35  ;;  %1958 = vmatprep.mubr.f32.mxu1 %v3008_v58  ;;  %v755_v35 = vld [vmem:[#allocation8 + $0x8d0] sm:$0xff] }
 0x163   :  { %1825 = vmatprep.subr.mxu0 %v588_v36  ;;  %1896 = vmatprep.subr.mxu1 %v844_v37  ;;  %v492_v36 = vld [vmem:[#allocation8 + $0x98] sm:$0xff] }
 0x164   :  { %1826 = vmatpush1.msra.mxu0 %v587_v44  ;;  %1897 = vmatpush1.msra.mxu1 %v843_v45  ;;  %v748_v37 = vld [vmem:[#allocation8 + $0x898] sm:$0xff]  ;;  %v491_v44 = vld [vmem:[#allocation8 + $0x90] sm:$0xff] }
 0x165   :  { %1827 = vmatprep.subr.mxu0 %v580_v47  ;;  %1898 = vmatprep.subr.mxu1 %v836_v48  ;;  %v747_v45 = vld [vmem:[#allocation8 + $0x890] sm:$0xff]  ;;  %v484_v47 = vld [vmem:[#allocation8 + $0x58] sm:$0xff] }
 0x166   :  { %1828 = vmatpush1.msra.mxu0 %v579_v49  ;;  %1899 = vmatpush1.msra.mxu1 %v835_v50  ;;  %v740_v48 = vld [vmem:[#allocation8 + $0x858] sm:$0xff]  ;;  %v483_v49 = vld [vmem:[#allocation8 + $0x50] sm:$0xff] }
 0x167   :  { %1829 = vmatprep.subr.mxu0 %v572_v51  ;;  %1900 = vmatprep.subr.mxu1 %v828_v53  ;;  %v739_v50 = vld [vmem:[#allocation8 + $0x850] sm:$0xff]  ;;  %v476_v51 = vld [vmem:[#allocation8 + $0x18] sm:$0xff] }
 0x168   :  { %1830 = vmatpush1.msra.mxu0 %v571_v54  ;;  %1901 = vmatpush1.msra.mxu1 %v827_v60  ;;  %v732_v53 = vld [vmem:[#allocation8 + $0x818] sm:$0xff]  ;;  %v475_v54 = vld [vmem:[#allocation8 + $0x10] sm:$0xff] }
 0x169   :  { %1831 = vmatprep.subr.mxu0 %v564_v61  ;;  %1902 = vmatprep.subr.mxu1 %v820_v62  ;;  %v731_v60 = vld [vmem:[#allocation8 + $0x810] sm:$0xff]  ;;  %v724_v61 = vld [vmem:[#allocation8 + $0x7d8] sm:$0xff] }
 0x16a   :  { %1832 = vmatpush1.msra.mxu0 %v563_v63  ;;  %1903 = vmatpush1.msra.mxu1 %v819_v0  ;;  %v980_v62 = vld [vmem:[#allocation8 + $0xfd8] sm:$0xff]  ;;  %v723_v63 = vld [vmem:[#allocation8 + $0x7d0] sm:$0xff] }
 0x16b   :  { %1833 = vmatprep.subr.mxu0 %v556_v1  ;;  %1904 = vmatprep.subr.mxu1 %v812_v3  ;;  %v979_v0 = vld [vmem:[#allocation8 + $0xfd0] sm:$0xff]  ;;  %v716_v1 = vld [vmem:[#allocation8 + $0x798] sm:$0xff] }
 0x16c   :  { %1834 = vmatpush1.msra.mxu0 %v555_v4  ;;  %1905 = vmatpush1.msra.mxu1 %v811_v5  ;;  %v972_v3 = vld [vmem:[#allocation8 + $0xf98] sm:$0xff]  ;;  %v715_v4 = vld [vmem:[#allocation8 + $0x790] sm:$0xff] }
 0x16d   :  { %1835 = vmatprep.subr.mxu0 %v548_v6  ;;  %1906 = vmatprep.subr.mxu1 %v804_v7  ;;  %v971_v5 = vld [vmem:[#allocation8 + $0xf90] sm:$0xff]  ;;  %v708_v6 = vld [vmem:[#allocation8 + $0x758] sm:$0xff] }
 0x16e   :  { %1836 = vmatpush1.msra.mxu0 %v547_v8  ;;  %1907 = vmatpush1.msra.mxu1 %v803_v9  ;;  %v964_v7 = vld [vmem:[#allocation8 + $0xf58] sm:$0xff]  ;;  %v707_v8 = vld [vmem:[#allocation8 + $0x750] sm:$0xff] }
 0x16f   :  { %1837 = vmatprep.subr.mxu0 %v540_v10  ;;  %1908 = vmatprep.subr.mxu1 %v796_v38  ;;  %v963_v9 = vld [vmem:[#allocation8 + $0xf50] sm:$0xff]  ;;  %v700_v10 = vld [vmem:[#allocation8 + $0x718] sm:$0xff] }
 0x170   :  { %1838 = vmatpush1.msra.mxu0 %v539_v11  ;;  %1909 = vmatpush1.msra.mxu1 %v795_v12  ;;  %v956_v38 = vld [vmem:[#allocation8 + $0xf18] sm:$0xff]  ;;  %v699_v11 = vld [vmem:[#allocation8 + $0x710] sm:$0xff] }
 0x171   :  { %1839 = vmatprep.subr.mxu0 %v532_v13  ;;  %1910 = vmatprep.subr.mxu1 %v788_v14  ;;  %v955_v12 = vld [vmem:[#allocation8 + $0xf10] sm:$0xff]  ;;  %v692_v13 = vld [vmem:[#allocation8 + $0x6d8] sm:$0xff] }
 0x172   :  { %1840 = vmatpush1.msra.mxu0 %v531_v15  ;;  %1911 = vmatpush1.msra.mxu1 %v787_v16  ;;  %v948_v14 = vld [vmem:[#allocation8 + $0xed8] sm:$0xff]  ;;  %v691_v15 = vld [vmem:[#allocation8 + $0x6d0] sm:$0xff] }
 0x173   :  { %1841 = vmatprep.subr.mxu0 %v524_v17  ;;  %1912 = vmatprep.subr.mxu1 %v780_v18  ;;  %v947_v16 = vld [vmem:[#allocation8 + $0xed0] sm:$0xff]  ;;  %v684_v17 = vld [vmem:[#allocation8 + $0x698] sm:$0xff] }
 0x174   :  { %1842 = vmatpush1.msra.mxu0 %v523_v19  ;;  %1913 = vmatpush1.msra.mxu1 %v779_v20  ;;  %v940_v18 = vld [vmem:[#allocation8 + $0xe98] sm:$0xff]  ;;  %v683_v19 = vld [vmem:[#allocation8 + $0x690] sm:$0xff] }
 0x175   :  { %1843 = vmatprep.subr.mxu0 %v516_v21  ;;  %1914 = vmatprep.subr.mxu1 %v772_v23  ;;  %v939_v20 = vld [vmem:[#allocation8 + $0xe90] sm:$0xff]  ;;  %v676_v21 = vld [vmem:[#allocation8 + $0x658] sm:$0xff] }
 0x176   :  { %1844 = vmatpush1.msra.mxu0 %v515_v41  ;;  %1915 = vmatpush1.msra.mxu1 %v771_v24  ;;  %v932_v23 = vld [vmem:[#allocation8 + $0xe58] sm:$0xff]  ;;  %v675_v41 = vld [vmem:[#allocation8 + $0x650] sm:$0xff] }
 0x177   :  { %1845 = vmatprep.subr.mxu0 %v508_v25  ;;  %1916 = vmatprep.subr.mxu1 %v764_v27  ;;  %v931_v24 = vld [vmem:[#allocation8 + $0xe50] sm:$0xff]  ;;  %v668_v25 = vld [vmem:[#allocation8 + $0x618] sm:$0xff] }
 0x178   :  { %1846 = vmatpush1.msra.mxu0 %v507_v28  ;;  %1917 = vmatpush1.msra.mxu1 %v763_v30  ;;  %v924_v27 = vld [vmem:[#allocation8 + $0xe18] sm:$0xff]  ;;  %v667_v28 = vld [vmem:[#allocation8 + $0x610] sm:$0xff] }
 0x179   :  { %1847 = vmatprep.subr.mxu0 %v500_v32  ;;  %1918 = vmatprep.subr.mxu1 %v756_v33  ;;  %v923_v30 = vld [vmem:[#allocation8 + $0xe10] sm:$0xff]  ;;  %v660_v32 = vld [vmem:[#allocation8 + $0x5d8] sm:$0xff] }
 0x17a   :  { %1848 = vmatpush1.msra.mxu0 %v499_v34  ;;  %1919 = vmatpush1.msra.mxu1 %v755_v35  ;;  %v916_v33 = vld [vmem:[#allocation8 + $0xdd8] sm:$0xff]  ;;  %v659_v34 = vld [vmem:[#allocation8 + $0x5d0] sm:$0xff] }
 0x17b   :  { %1849 = vmatprep.subr.mxu0 %v492_v36  ;;  %1920 = vmatprep.subr.mxu1 %v748_v37  ;;  %v915_v35 = vld [vmem:[#allocation8 + $0xdd0] sm:$0xff]  ;;  %v652_v36 = vld [vmem:[#allocation8 + $0x598] sm:$0xff] }
 0x17c   :  { %1850 = vmatpush1.msra.mxu0 %v491_v44  ;;  %1921 = vmatpush1.msra.mxu1 %v747_v45  ;;  %v908_v37 = vld [vmem:[#allocation8 + $0xd98] sm:$0xff]  ;;  %v651_v44 = vld [vmem:[#allocation8 + $0x590] sm:$0xff] }
 0x17d   :  { %1851 = vmatprep.subr.mxu0 %v484_v47  ;;  %1922 = vmatprep.subr.mxu1 %v740_v48  ;;  %v907_v45 = vld [vmem:[#allocation8 + $0xd90] sm:$0xff]  ;;  %v644_v47 = vld [vmem:[#allocation8 + $0x558] sm:$0xff] }
 0x17e   :  { %1852 = vmatpush1.msra.mxu0 %v483_v49  ;;  %1923 = vmatpush1.msra.mxu1 %v739_v50  ;;  %v900_v48 = vld [vmem:[#allocation8 + $0xd58] sm:$0xff]  ;;  %v643_v49 = vld [vmem:[#allocation8 + $0x550] sm:$0xff] }
 0x17f   :  { %1853 = vmatprep.subr.mxu0 %v476_v51  ;;  %1924 = vmatprep.subr.mxu1 %v732_v53  ;;  %v899_v50 = vld [vmem:[#allocation8 + $0xd50] sm:$0xff]  ;;  %v636_v51 = vld [vmem:[#allocation8 + $0x518] sm:$0xff] }
 0x180   :  { %1854 = vmatpush1.msra.mxu0 %v475_v54  ;;  %1925 = vmatpush1.msra.mxu1 %v731_v60  ;;  %v892_v53 = vld [vmem:[#allocation8 + $0xd18] sm:$0xff]  ;;  %v635_v54 = vld [vmem:[#allocation8 + $0x510] sm:$0xff] }
 0x181   :  { %1855 = vmatprep.subr.mxu0 %v724_v61  ;;  %1926 = vmatprep.subr.mxu1 %v980_v62  ;;  %v891_v60 = vld [vmem:[#allocation8 + $0xd10] sm:$0xff]  ;;  %v628_v61 = vld [vmem:[#allocation8 + $0x4d8] sm:$0xff] }
 0x182   :  { %1856 = vmatpush2.msra.mxu0 %v723_v63  ;;  %1927 = vmatpush2.msra.mxu1 %v979_v0  ;;  %v884_v62 = vld [vmem:[#allocation8 + $0xcd8] sm:$0xff]  ;;  %v627_v63 = vld [vmem:[#allocation8 + $0x4d0] sm:$0xff] }
 0x183   :  { %1857 = vmatprep.subr.mxu0 %v716_v1  ;;  %1928 = vmatprep.subr.mxu1 %v972_v3  ;;  %v883_v0 = vld [vmem:[#allocation8 + $0xcd0] sm:$0xff]  ;;  %v620_v1 = vld [vmem:[#allocation8 + $0x498] sm:$0xff] }
 0x184   :  { %1858 = vmatpush2.msra.mxu0 %v715_v4  ;;  %1929 = vmatpush2.msra.mxu1 %v971_v5  ;;  %v876_v3 = vld [vmem:[#allocation8 + $0xc98] sm:$0xff]  ;;  %v619_v4 = vld [vmem:[#allocation8 + $0x490] sm:$0xff] }
 0x185   :  { %1859 = vmatprep.subr.mxu0 %v708_v6  ;;  %1930 = vmatprep.subr.mxu1 %v964_v7  ;;  %v875_v5 = vld [vmem:[#allocation8 + $0xc90] sm:$0xff]  ;;  %v612_v6 = vld [vmem:[#allocation8 + $0x458] sm:$0xff] }
 0x186   :  { %1860 = vmatpush2.msra.mxu0 %v707_v8  ;;  %1931 = vmatpush2.msra.mxu1 %v963_v9  ;;  %v868_v7 = vld [vmem:[#allocation8 + $0xc58] sm:$0xff]  ;;  %v611_v8 = vld [vmem:[#allocation8 + $0x450] sm:$0xff] }
 0x187   :  { %1861 = vmatprep.subr.mxu0 %v700_v10  ;;  %1932 = vmatprep.subr.mxu1 %v956_v38  ;;  %v867_v9 = vld [vmem:[#allocation8 + $0xc50] sm:$0xff]  ;;  %v604_v10 = vld [vmem:[#allocation8 + $0x418] sm:$0xff] }
 0x188   :  { %1862 = vmatpush2.msra.mxu0 %v699_v11  ;;  %1933 = vmatpush2.msra.mxu1 %v955_v12  ;;  %v860_v38 = vld [vmem:[#allocation8 + $0xc18] sm:$0xff]  ;;  %v603_v11 = vld [vmem:[#allocation8 + $0x410] sm:$0xff] }
 0x189   :  { %1863 = vmatprep.subr.mxu0 %v692_v13  ;;  %1934 = vmatprep.subr.mxu1 %v948_v14  ;;  %v859_v12 = vld [vmem:[#allocation8 + $0xc10] sm:$0xff]  ;;  %v1108_v13 = vld [vmem:[#allocation8 + $0x13d8] sm:$0xff] }
 0x18a   :  { %1864 = vmatpush2.msra.mxu0 %v691_v15  ;;  %1935 = vmatpush2.msra.mxu1 %v947_v16  ;;  %v1364_v14 = vld [vmem:[#allocation8 + $0x1bd8] sm:$0xff]  ;;  %v1107_v15 = vld [vmem:[#allocation8 + $0x13d0] sm:$0xff] }
 0x18b   :  { %1865 = vmatprep.subr.mxu0 %v684_v17  ;;  %1936 = vmatprep.subr.mxu1 %v940_v18  ;;  %v1363_v16 = vld [vmem:[#allocation8 + $0x1bd0] sm:$0xff]  ;;  %v1100_v17 = vld [vmem:[#allocation8 + $0x1398] sm:$0xff] }
 0x18c   :  { %1866 = vmatpush2.msra.mxu0 %v683_v19  ;;  %1937 = vmatpush2.msra.mxu1 %v939_v20  ;;  %v1356_v18 = vld [vmem:[#allocation8 + $0x1b98] sm:$0xff]  ;;  %v1099_v19 = vld [vmem:[#allocation8 + $0x1390] sm:$0xff] }
 0x18d   :  { %1867 = vmatprep.subr.mxu0 %v676_v21  ;;  %1938 = vmatprep.subr.mxu1 %v932_v23  ;;  %v1355_v20 = vld [vmem:[#allocation8 + $0x1b90] sm:$0xff]  ;;  %v1092_v21 = vld [vmem:[#allocation8 + $0x1358] sm:$0xff] }
 0x18e   :  { %1868 = vmatpush2.msra.mxu0 %v675_v41  ;;  %1939 = vmatpush2.msra.mxu1 %v931_v24  ;;  %v1348_v23 = vld [vmem:[#allocation8 + $0x1b58] sm:$0xff]  ;;  %v1091_v41 = vld [vmem:[#allocation8 + $0x1350] sm:$0xff] }
 0x18f   :  { %1869 = vmatprep.subr.mxu0 %v668_v25  ;;  %1940 = vmatprep.subr.mxu1 %v924_v27  ;;  %v1347_v24 = vld [vmem:[#allocation8 + $0x1b50] sm:$0xff]  ;;  %v1084_v25 = vld [vmem:[#allocation8 + $0x1318] sm:$0xff] }
 0x190   :  { %1870 = vmatpush2.msra.mxu0 %v667_v28  ;;  %1941 = vmatpush2.msra.mxu1 %v923_v30  ;;  %v1340_v27 = vld [vmem:[#allocation8 + $0x1b18] sm:$0xff]  ;;  %v1083_v28 = vld [vmem:[#allocation8 + $0x1310] sm:$0xff] }
 0x191   :  { %1871 = vmatprep.subr.mxu0 %v660_v32  ;;  %1942 = vmatprep.subr.mxu1 %v916_v33  ;;  %v1339_v30 = vld [vmem:[#allocation8 + $0x1b10] sm:$0xff]  ;;  %v1076_v32 = vld [vmem:[#allocation8 + $0x12d8] sm:$0xff] }
 0x192   :  { %1872 = vmatpush2.msra.mxu0 %v659_v34  ;;  %1943 = vmatpush2.msra.mxu1 %v915_v35  ;;  %v1332_v33 = vld [vmem:[#allocation8 + $0x1ad8] sm:$0xff]  ;;  %v1075_v34 = vld [vmem:[#allocation8 + $0x12d0] sm:$0xff] }
 0x193   :  { %1873 = vmatprep.subr.mxu0 %v652_v36  ;;  %1944 = vmatprep.subr.mxu1 %v908_v37  ;;  %v1331_v35 = vld [vmem:[#allocation8 + $0x1ad0] sm:$0xff]  ;;  %v1068_v36 = vld [vmem:[#allocation8 + $0x1298] sm:$0xff] }
 0x194   :  { %1874 = vmatpush2.msra.mxu0 %v651_v44  ;;  %1945 = vmatpush2.msra.mxu1 %v907_v45  ;;  %v1324_v37 = vld [vmem:[#allocation8 + $0x1a98] sm:$0xff]  ;;  %v1067_v44 = vld [vmem:[#allocation8 + $0x1290] sm:$0xff] }
 0x195   :  { %1875 = vmatprep.subr.mxu0 %v644_v47  ;;  %1946 = vmatprep.subr.mxu1 %v900_v48  ;;  %v1323_v45 = vld [vmem:[#allocation8 + $0x1a90] sm:$0xff]  ;;  %v1060_v47 = vld [vmem:[#allocation8 + $0x1258] sm:$0xff] }
 0x196   :  { %1876 = vmatpush2.msra.mxu0 %v643_v49  ;;  %1947 = vmatpush2.msra.mxu1 %v899_v50  ;;  %v1316_v48 = vld [vmem:[#allocation8 + $0x1a58] sm:$0xff]  ;;  %v1059_v49 = vld [vmem:[#allocation8 + $0x1250] sm:$0xff] }
 0x197   :  { %1877 = vmatprep.subr.mxu0 %v636_v51  ;;  %1948 = vmatprep.subr.mxu1 %v892_v53  ;;  %v1315_v50 = vld [vmem:[#allocation8 + $0x1a50] sm:$0xff]  ;;  %v1052_v51 = vld [vmem:[#allocation8 + $0x1218] sm:$0xff] }
 0x198   :  { %1878 = vmatpush2.msra.mxu0 %v635_v54  ;;  %1949 = vmatpush2.msra.mxu1 %v891_v60  ;;  %v1308_v53 = vld [vmem:[#allocation8 + $0x1a18] sm:$0xff]  ;;  %v1051_v54 = vld [vmem:[#allocation8 + $0x1210] sm:$0xff] }
 0x199   :  { %1879 = vmatprep.subr.mxu0 %v628_v61  ;;  %1950 = vmatprep.subr.mxu1 %v884_v62  ;;  %v1307_v60 = vld [vmem:[#allocation8 + $0x1a10] sm:$0xff]  ;;  %v1044_v61 = vld [vmem:[#allocation8 + $0x11d8] sm:$0xff] }
 0x19a   :  { %1880 = vmatpush2.msra.mxu0 %v627_v63  ;;  %1951 = vmatpush2.msra.mxu1 %v883_v0  ;;  %v1300_v62 = vld [vmem:[#allocation8 + $0x19d8] sm:$0xff]  ;;  %v1043_v63 = vld [vmem:[#allocation8 + $0x11d0] sm:$0xff] }
 0x19b   :  { %1881 = vmatprep.subr.mxu0 %v620_v1  ;;  %1952 = vmatprep.subr.mxu1 %v876_v3  ;;  %v1299_v0 = vld [vmem:[#allocation8 + $0x19d0] sm:$0xff]  ;;  %v1036_v1 = vld [vmem:[#allocation8 + $0x1198] sm:$0xff] }
 0x19c   :  { %1882 = vmatpush2.msra.mxu0 %v619_v4  ;;  %1953 = vmatpush2.msra.mxu1 %v875_v5  ;;  %v1292_v3 = vld [vmem:[#allocation8 + $0x1998] sm:$0xff]  ;;  %v1035_v4 = vld [vmem:[#allocation8 + $0x1190] sm:$0xff] }
 0x19d   :  { %1883 = vmatprep.subr.mxu0 %v612_v6  ;;  %1954 = vmatprep.subr.mxu1 %v868_v7  ;;  %v1291_v5 = vld [vmem:[#allocation8 + $0x1990] sm:$0xff]  ;;  %v1028_v6 = vld [vmem:[#allocation8 + $0x1158] sm:$0xff] }
 0x19e   :  { %1884 = vmatpush2.msra.mxu0 %v611_v8  ;;  %1955 = vmatpush2.msra.mxu1 %v867_v9  ;;  %v1284_v7 = vld [vmem:[#allocation8 + $0x1958] sm:$0xff]  ;;  %v1027_v8 = vld [vmem:[#allocation8 + $0x1150] sm:$0xff] }
 0x19f   :  { %1885 = vmatprep.subr.mxu0 %v604_v10  ;;  %1956 = vmatprep.subr.mxu1 %v860_v38  ;;  %v1283_v9 = vld [vmem:[#allocation8 + $0x1950] sm:$0xff]  ;;  %v1020_v10 = vld [vmem:[#allocation8 + $0x1118] sm:$0xff] }
 0x1a0   :  { %1886 = vmatpush2.msra.mxu0 %v603_v11  ;;  %1957 = vmatpush2.msra.mxu1 %v859_v12  ;;  %v1276_v38 = vld [vmem:[#allocation8 + $0x1918] sm:$0xff]  ;;  %v1019_v11 = vld [vmem:[#allocation8 + $0x1110] sm:$0xff] }
 0x1a1   :  { %1888 = vmatmul.mubr.f32.vlgmr.msra.gmra.mxu0 %v3010_v59  ;;  %1959 = vmatmul.mubr.f32.vlgmr.msra.gmra.mxu1 %v3004_v56  ;;  %v1275_v12 = vld [vmem:[#allocation8 + $0x1910] sm:$0xff] }
 0x1a2   :  { %1965 = vmatprep.subr.mxu0 %v1108_v13  ;;  %2036 = vmatprep.subr.mxu1 %v1364_v14  ;;  %v1012_v13 = vld [vmem:[#allocation8 + $0x10d8] sm:$0xff] }
 0x1a3   :  { %1966 = vmatpush1.msra.mxu0 %v1107_v15  ;;  %2029 = vmatprep.mubr.f32.mxu0 %v3036_v22  ;;  %v1268_v14 = vld [vmem:[#allocation8 + $0x18d8] sm:$0xff]  ;;  %v1011_v15 = vld [vmem:[#allocation8 + $0x10d0] sm:$0xff] }
 0x1a4   :  { %2037 = vmatpush1.msra.mxu1 %v1363_v16  ;;  %2100 = vmatprep.mubr.f32.mxu1 %v3038_v26  ;;  %v1267_v16 = vld [vmem:[#allocation8 + $0x18d0] sm:$0xff] }
 0x1a5   :  { %1967 = vmatprep.subr.mxu0 %v1100_v17  ;;  %2038 = vmatprep.subr.mxu1 %v1356_v18  ;;  %v1004_v17 = vld [vmem:[#allocation8 + $0x1098] sm:$0xff] }
 0x1a6   :  { %1968 = vmatpush1.msra.mxu0 %v1099_v19  ;;  %2039 = vmatpush1.msra.mxu1 %v1355_v20  ;;  %v1260_v18 = vld [vmem:[#allocation8 + $0x1898] sm:$0xff]  ;;  %v1003_v19 = vld [vmem:[#allocation8 + $0x1090] sm:$0xff] }
 0x1a7   :  { %1969 = vmatprep.subr.mxu0 %v1092_v21  ;;  %2040 = vmatprep.subr.mxu1 %v1348_v23  ;;  %v1259_v20 = vld [vmem:[#allocation8 + $0x1890] sm:$0xff]  ;;  %v996_v21 = vld [vmem:[#allocation8 + $0x1058] sm:$0xff] }
 0x1a8   :  { %1970 = vmatpush1.msra.mxu0 %v1091_v41  ;;  %2041 = vmatpush1.msra.mxu1 %v1347_v24  ;;  %v1252_v23 = vld [vmem:[#allocation8 + $0x1858] sm:$0xff]  ;;  %v995_v41 = vld [vmem:[#allocation8 + $0x1050] sm:$0xff] }
 0x1a9   :  { %1971 = vmatprep.subr.mxu0 %v1084_v25  ;;  %2042 = vmatprep.subr.mxu1 %v1340_v27  ;;  %v1251_v24 = vld [vmem:[#allocation8 + $0x1850] sm:$0xff]  ;;  %v988_v25 = vld [vmem:[#allocation8 + $0x1018] sm:$0xff] }
 0x1aa   :  { %1972 = vmatpush1.msra.mxu0 %v1083_v28  ;;  %2043 = vmatpush1.msra.mxu1 %v1339_v30  ;;  %v1244_v27 = vld [vmem:[#allocation8 + $0x1818] sm:$0xff]  ;;  %v987_v28 = vld [vmem:[#allocation8 + $0x1010] sm:$0xff] }
 0x1ab   :  { %1973 = vmatprep.subr.mxu0 %v1076_v32  ;;  %2044 = vmatprep.subr.mxu1 %v1332_v33  ;;  %v1243_v30 = vld [vmem:[#allocation8 + $0x1810] sm:$0xff]  ;;  %v1236_v32 = vld [vmem:[#allocation8 + $0x17d8] sm:$0xff] }
 0x1ac   :  { %1974 = vmatpush1.msra.mxu0 %v1075_v34  ;;  %2045 = vmatpush1.msra.mxu1 %v1331_v35  ;;  %v1492_v33 = vld [vmem:[#allocation8 + $0x1fd8] sm:$0xff]  ;;  %v1235_v34 = vld [vmem:[#allocation8 + $0x17d0] sm:$0xff] }
 0x1ad   :  { %1975 = vmatprep.subr.mxu0 %v1068_v36  ;;  %2046 = vmatprep.subr.mxu1 %v1324_v37  ;;  %v1491_v35 = vld [vmem:[#allocation8 + $0x1fd0] sm:$0xff]  ;;  %v1228_v36 = vld [vmem:[#allocation8 + $0x1798] sm:$0xff] }
 0x1ae   :  { %1976 = vmatpush1.msra.mxu0 %v1067_v44  ;;  %2047 = vmatpush1.msra.mxu1 %v1323_v45  ;;  %v1484_v37 = vld [vmem:[#allocation8 + $0x1f98] sm:$0xff]  ;;  %v1227_v44 = vld [vmem:[#allocation8 + $0x1790] sm:$0xff] }
 0x1af   :  { %1977 = vmatprep.subr.mxu0 %v1060_v47  ;;  %2048 = vmatprep.subr.mxu1 %v1316_v48  ;;  %v1483_v45 = vld [vmem:[#allocation8 + $0x1f90] sm:$0xff]  ;;  %v1220_v47 = vld [vmem:[#allocation8 + $0x1758] sm:$0xff] }
 0x1b0   :  { %1978 = vmatpush1.msra.mxu0 %v1059_v49  ;;  %2049 = vmatpush1.msra.mxu1 %v1315_v50  ;;  %v1476_v48 = vld [vmem:[#allocation8 + $0x1f58] sm:$0xff]  ;;  %v1219_v49 = vld [vmem:[#allocation8 + $0x1750] sm:$0xff] }
 0x1b1   :  { %1979 = vmatprep.subr.mxu0 %v1052_v51  ;;  %2050 = vmatprep.subr.mxu1 %v1308_v53  ;;  %v1475_v50 = vld [vmem:[#allocation8 + $0x1f50] sm:$0xff]  ;;  %v1212_v51 = vld [vmem:[#allocation8 + $0x1718] sm:$0xff] }
 0x1b2   :  { %1980 = vmatpush1.msra.mxu0 %v1051_v54  ;;  %2051 = vmatpush1.msra.mxu1 %v1307_v60  ;;  %v1468_v53 = vld [vmem:[#allocation8 + $0x1f18] sm:$0xff]  ;;  %v1211_v54 = vld [vmem:[#allocation8 + $0x1710] sm:$0xff] }
 0x1b3   :  { %1981 = vmatprep.subr.mxu0 %v1044_v61  ;;  %2052 = vmatprep.subr.mxu1 %v1300_v62  ;;  %v1467_v60 = vld [vmem:[#allocation8 + $0x1f10] sm:$0xff]  ;;  %v1204_v61 = vld [vmem:[#allocation8 + $0x16d8] sm:$0xff] }
 0x1b4   :  { %1982 = vmatpush1.msra.mxu0 %v1043_v63  ;;  %2053 = vmatpush1.msra.mxu1 %v1299_v0  ;;  %v1460_v62 = vld [vmem:[#allocation8 + $0x1ed8] sm:$0xff]  ;;  %v1203_v63 = vld [vmem:[#allocation8 + $0x16d0] sm:$0xff] }
 0x1b5   :  { %1983 = vmatprep.subr.mxu0 %v1036_v1  ;;  %2054 = vmatprep.subr.mxu1 %v1292_v3  ;;  %v1459_v0 = vld [vmem:[#allocation8 + $0x1ed0] sm:$0xff]  ;;  %v1196_v1 = vld [vmem:[#allocation8 + $0x1698] sm:$0xff] }
 0x1b6   :  { %1984 = vmatpush1.msra.mxu0 %v1035_v4  ;;  %2055 = vmatpush1.msra.mxu1 %v1291_v5  ;;  %v1452_v3 = vld [vmem:[#allocation8 + $0x1e98] sm:$0xff]  ;;  %v1195_v4 = vld [vmem:[#allocation8 + $0x1690] sm:$0xff] }
 0x1b7   :  { %1985 = vmatprep.subr.mxu0 %v1028_v6  ;;  %2056 = vmatprep.subr.mxu1 %v1284_v7  ;;  %v1451_v5 = vld [vmem:[#allocation8 + $0x1e90] sm:$0xff]  ;;  %v1188_v6 = vld [vmem:[#allocation8 + $0x1658] sm:$0xff] }
 0x1b8   :  { %1986 = vmatpush1.msra.mxu0 %v1027_v8  ;;  %2057 = vmatpush1.msra.mxu1 %v1283_v9  ;;  %v1444_v7 = vld [vmem:[#allocation8 + $0x1e58] sm:$0xff]  ;;  %v1187_v8 = vld [vmem:[#allocation8 + $0x1650] sm:$0xff] }
 0x1b9   :  { %1987 = vmatprep.subr.mxu0 %v1020_v10  ;;  %2058 = vmatprep.subr.mxu1 %v1276_v38  ;;  %v1443_v9 = vld [vmem:[#allocation8 + $0x1e50] sm:$0xff]  ;;  %v1180_v10 = vld [vmem:[#allocation8 + $0x1618] sm:$0xff] }
 0x1ba   :  { %1988 = vmatpush1.msra.mxu0 %v1019_v11  ;;  %2059 = vmatpush1.msra.mxu1 %v1275_v12  ;;  %v1436_v38 = vld [vmem:[#allocation8 + $0x1e18] sm:$0xff]  ;;  %v1179_v11 = vld [vmem:[#allocation8 + $0x1610] sm:$0xff] }
 0x1bb   :  { %1989 = vmatprep.subr.mxu0 %v1012_v13  ;;  %2060 = vmatprep.subr.mxu1 %v1268_v14  ;;  %v1435_v12 = vld [vmem:[#allocation8 + $0x1e10] sm:$0xff]  ;;  %v1172_v13 = vld [vmem:[#allocation8 + $0x15d8] sm:$0xff] }
 0x1bc   :  { %1990 = vmatpush1.msra.mxu0 %v1011_v15  ;;  %2061 = vmatpush1.msra.mxu1 %v1267_v16  ;;  %v1428_v14 = vld [vmem:[#allocation8 + $0x1dd8] sm:$0xff]  ;;  %v1171_v15 = vld [vmem:[#allocation8 + $0x15d0] sm:$0xff] }
 0x1bd   :  { %1991 = vmatprep.subr.mxu0 %v1004_v17  ;;  %2062 = vmatprep.subr.mxu1 %v1260_v18  ;;  %v1427_v16 = vld [vmem:[#allocation8 + $0x1dd0] sm:$0xff]  ;;  %v1164_v17 = vld [vmem:[#allocation8 + $0x1598] sm:$0xff] }
 0x1be   :  { %1992 = vmatpush1.msra.mxu0 %v1003_v19  ;;  %2063 = vmatpush1.msra.mxu1 %v1259_v20  ;;  %v1420_v18 = vld [vmem:[#allocation8 + $0x1d98] sm:$0xff]  ;;  %v1163_v19 = vld [vmem:[#allocation8 + $0x1590] sm:$0xff] }
 0x1bf   :  { %1993 = vmatprep.subr.mxu0 %v996_v21  ;;  %2064 = vmatprep.subr.mxu1 %v1252_v23  ;;  %v1419_v20 = vld [vmem:[#allocation8 + $0x1d90] sm:$0xff]  ;;  %v1156_v21 = vld [vmem:[#allocation8 + $0x1558] sm:$0xff] }
 0x1c0   :  { %1994 = vmatpush1.msra.mxu0 %v995_v41  ;;  %2065 = vmatpush1.msra.mxu1 %v1251_v24  ;;  %v1412_v23 = vld [vmem:[#allocation8 + $0x1d58] sm:$0xff]  ;;  %v1155_v41 = vld [vmem:[#allocation8 + $0x1550] sm:$0xff] }
 0x1c1   :  { %1995 = vmatprep.subr.mxu0 %v988_v25  ;;  %2066 = vmatprep.subr.mxu1 %v1244_v27  ;;  %v1411_v24 = vld [vmem:[#allocation8 + $0x1d50] sm:$0xff]  ;;  %v1148_v25 = vld [vmem:[#allocation8 + $0x1518] sm:$0xff] }
 0x1c2   :  { %1996 = vmatpush1.msra.mxu0 %v987_v28  ;;  %2067 = vmatpush1.msra.mxu1 %v1243_v30  ;;  %v1404_v27 = vld [vmem:[#allocation8 + $0x1d18] sm:$0xff]  ;;  %v1147_v28 = vld [vmem:[#allocation8 + $0x1510] sm:$0xff] }
 0x1c3   :  { %1997 = vmatprep.subr.mxu0 %v1236_v32  ;;  %2068 = vmatprep.subr.mxu1 %v1492_v33  ;;  %v1403_v30 = vld [vmem:[#allocation8 + $0x1d10] sm:$0xff]  ;;  %v1140_v32 = vld [vmem:[#allocation8 + $0x14d8] sm:$0xff] }
 0x1c4   :  { %1998 = vmatpush2.msra.mxu0 %v1235_v34  ;;  %2069 = vmatpush2.msra.mxu1 %v1491_v35  ;;  %v1396_v33 = vld [vmem:[#allocation8 + $0x1cd8] sm:$0xff]  ;;  %v1139_v34 = vld [vmem:[#allocation8 + $0x14d0] sm:$0xff] }
 0x1c5   :  { %1999 = vmatprep.subr.mxu0 %v1228_v36  ;;  %2070 = vmatprep.subr.mxu1 %v1484_v37  ;;  %v1395_v35 = vld [vmem:[#allocation8 + $0x1cd0] sm:$0xff]  ;;  %v1132_v36 = vld [vmem:[#allocation8 + $0x1498] sm:$0xff] }
 0x1c6   :  { %2000 = vmatpush2.msra.mxu0 %v1227_v44  ;;  %2071 = vmatpush2.msra.mxu1 %v1483_v45  ;;  %v1388_v37 = vld [vmem:[#allocation8 + $0x1c98] sm:$0xff]  ;;  %v1131_v44 = vld [vmem:[#allocation8 + $0x1490] sm:$0xff] }
 0x1c7   :  { %2001 = vmatprep.subr.mxu0 %v1220_v47  ;;  %2072 = vmatprep.subr.mxu1 %v1476_v48  ;;  %v1387_v45 = vld [vmem:[#allocation8 + $0x1c90] sm:$0xff]  ;;  %v1124_v47 = vld [vmem:[#allocation8 + $0x1458] sm:$0xff] }
 0x1c8   :  { %2002 = vmatpush2.msra.mxu0 %v1219_v49  ;;  %2073 = vmatpush2.msra.mxu1 %v1475_v50  ;;  %v1380_v48 = vld [vmem:[#allocation8 + $0x1c58] sm:$0xff]  ;;  %v1123_v49 = vld [vmem:[#allocation8 + $0x1450] sm:$0xff] }
 0x1c9   :  { %2003 = vmatprep.subr.mxu0 %v1212_v51  ;;  %2074 = vmatprep.subr.mxu1 %v1468_v53  ;;  %v1379_v50 = vld [vmem:[#allocation8 + $0x1c50] sm:$0xff]  ;;  %v1116_v51 = vld [vmem:[#allocation8 + $0x1418] sm:$0xff] }
 0x1ca   :  { %2004 = vmatpush2.msra.mxu0 %v1211_v54  ;;  %2075 = vmatpush2.msra.mxu1 %v1467_v60  ;;  %v1372_v53 = vld [vmem:[#allocation8 + $0x1c18] sm:$0xff]  ;;  %v1115_v54 = vld [vmem:[#allocation8 + $0x1410] sm:$0xff] }
 0x1cb   :  { %2005 = vmatprep.subr.mxu0 %v1204_v61  ;;  %2076 = vmatprep.subr.mxu1 %v1460_v62  ;;  %v1371_v60 = vld [vmem:[#allocation8 + $0x1c10] sm:$0xff]  ;;  %v598_v61 = vld [vmem:[#allocation8 + $0x3e8] sm:$0xff] }
 0x1cc   :  { %2006 = vmatpush2.msra.mxu0 %v1203_v63  ;;  %2077 = vmatpush2.msra.mxu1 %v1459_v0  ;;  %v854_v62 = vld [vmem:[#allocation8 + $0xbe8] sm:$0xff]  ;;  %v597_v63 = vld [vmem:[#allocation8 + $0x3e0] sm:$0xff] }
 0x1cd   :  { %2007 = vmatprep.subr.mxu0 %v1196_v1  ;;  %2078 = vmatprep.subr.mxu1 %v1452_v3  ;;  %v853_v0 = vld [vmem:[#allocation8 + $0xbe0] sm:$0xff]  ;;  %v590_v1 = vld [vmem:[#allocation8 + $0x3a8] sm:$0xff] }
 0x1ce   :  { %2008 = vmatpush2.msra.mxu0 %v1195_v4  ;;  %2079 = vmatpush2.msra.mxu1 %v1451_v5  ;;  %v846_v3 = vld [vmem:[#allocation8 + $0xba8] sm:$0xff]  ;;  %v589_v4 = vld [vmem:[#allocation8 + $0x3a0] sm:$0xff] }
 0x1cf   :  { %2009 = vmatprep.subr.mxu0 %v1188_v6  ;;  %2080 = vmatprep.subr.mxu1 %v1444_v7  ;;  %v845_v5 = vld [vmem:[#allocation8 + $0xba0] sm:$0xff]  ;;  %v582_v6 = vld [vmem:[#allocation8 + $0x368] sm:$0xff] }
 0x1d0   :  { %2010 = vmatpush2.msra.mxu0 %v1187_v8  ;;  %2081 = vmatpush2.msra.mxu1 %v1443_v9  ;;  %v838_v7 = vld [vmem:[#allocation8 + $0xb68] sm:$0xff]  ;;  %v581_v8 = vld [vmem:[#allocation8 + $0x360] sm:$0xff] }
 0x1d1   :  { %2011 = vmatprep.subr.mxu0 %v1180_v10  ;;  %2082 = vmatprep.subr.mxu1 %v1436_v38  ;;  %v837_v9 = vld [vmem:[#allocation8 + $0xb60] sm:$0xff]  ;;  %v574_v10 = vld [vmem:[#allocation8 + $0x328] sm:$0xff] }
 0x1d2   :  { %2012 = vmatpush2.msra.mxu0 %v1179_v11  ;;  %2083 = vmatpush2.msra.mxu1 %v1435_v12  ;;  %v830_v38 = vld [vmem:[#allocation8 + $0xb28] sm:$0xff]  ;;  %v573_v11 = vld [vmem:[#allocation8 + $0x320] sm:$0xff] }
 0x1d3   :  { %2013 = vmatprep.subr.mxu0 %v1172_v13  ;;  %2084 = vmatprep.subr.mxu1 %v1428_v14  ;;  %v829_v12 = vld [vmem:[#allocation8 + $0xb20] sm:$0xff]  ;;  %v566_v13 = vld [vmem:[#allocation8 + $0x2e8] sm:$0xff] }
 0x1d4   :  { %2014 = vmatpush2.msra.mxu0 %v1171_v15  ;;  %2085 = vmatpush2.msra.mxu1 %v1427_v16  ;;  %v822_v14 = vld [vmem:[#allocation8 + $0xae8] sm:$0xff]  ;;  %v565_v15 = vld [vmem:[#allocation8 + $0x2e0] sm:$0xff] }
 0x1d5   :  { %2015 = vmatprep.subr.mxu0 %v1164_v17  ;;  %2086 = vmatprep.subr.mxu1 %v1420_v18  ;;  %v821_v16 = vld [vmem:[#allocation8 + $0xae0] sm:$0xff]  ;;  %v558_v17 = vld [vmem:[#allocation8 + $0x2a8] sm:$0xff] }
 0x1d6   :  { %2016 = vmatpush2.msra.mxu0 %v1163_v19  ;;  %2087 = vmatpush2.msra.mxu1 %v1419_v20  ;;  %v814_v18 = vld [vmem:[#allocation8 + $0xaa8] sm:$0xff]  ;;  %v557_v19 = vld [vmem:[#allocation8 + $0x2a0] sm:$0xff] }
 0x1d7   :  { %2017 = vmatprep.subr.mxu0 %v1156_v21  ;;  %2088 = vmatprep.subr.mxu1 %v1412_v23  ;;  %v813_v20 = vld [vmem:[#allocation8 + $0xaa0] sm:$0xff]  ;;  %v550_v21 = vld [vmem:[#allocation8 + $0x268] sm:$0xff] }
 0x1d8   :  { %2018 = vmatpush2.msra.mxu0 %v1155_v41  ;;  %2089 = vmatpush2.msra.mxu1 %v1411_v24  ;;  %v806_v23 = vld [vmem:[#allocation8 + $0xa68] sm:$0xff]  ;;  %v549_v41 = vld [vmem:[#allocation8 + $0x260] sm:$0xff] }
 0x1d9   :  { %2019 = vmatprep.subr.mxu0 %v1148_v25  ;;  %2090 = vmatprep.subr.mxu1 %v1404_v27  ;;  %v805_v24 = vld [vmem:[#allocation8 + $0xa60] sm:$0xff]  ;;  %v542_v25 = vld [vmem:[#allocation8 + $0x228] sm:$0xff] }
 0x1da   :  { %2020 = vmatpush2.msra.mxu0 %v1147_v28  ;;  %2091 = vmatpush2.msra.mxu1 %v1403_v30  ;;  %v798_v27 = vld [vmem:[#allocation8 + $0xa28] sm:$0xff]  ;;  %v541_v28 = vld [vmem:[#allocation8 + $0x220] sm:$0xff] }
 0x1db   :  { %2021 = vmatprep.subr.mxu0 %v1140_v32  ;;  %2092 = vmatprep.subr.mxu1 %v1396_v33  ;;  %v797_v30 = vld [vmem:[#allocation8 + $0xa20] sm:$0xff]  ;;  %v534_v32 = vld [vmem:[#allocation8 + $0x1e8] sm:$0xff] }
 0x1dc   :  { %2022 = vmatpush2.msra.mxu0 %v1139_v34  ;;  %2093 = vmatpush2.msra.mxu1 %v1395_v35  ;;  %v790_v33 = vld [vmem:[#allocation8 + $0x9e8] sm:$0xff]  ;;  %v533_v34 = vld [vmem:[#allocation8 + $0x1e0] sm:$0xff] }
 0x1dd   :  { %2023 = vmatprep.subr.mxu0 %v1132_v36  ;;  %2094 = vmatprep.subr.mxu1 %v1388_v37  ;;  %v789_v35 = vld [vmem:[#allocation8 + $0x9e0] sm:$0xff]  ;;  %v526_v36 = vld [vmem:[#allocation8 + $0x1a8] sm:$0xff] }
 0x1de   :  { %2024 = vmatpush2.msra.mxu0 %v1131_v44  ;;  %2095 = vmatpush2.msra.mxu1 %v1387_v45  ;;  %v782_v37 = vld [vmem:[#allocation8 + $0x9a8] sm:$0xff]  ;;  %v525_v44 = vld [vmem:[#allocation8 + $0x1a0] sm:$0xff] }
 0x1df   :  { %2025 = vmatprep.subr.mxu0 %v1124_v47  ;;  %2096 = vmatprep.subr.mxu1 %v1380_v48  ;;  %v781_v45 = vld [vmem:[#allocation8 + $0x9a0] sm:$0xff]  ;;  %v518_v47 = vld [vmem:[#allocation8 + $0x168] sm:$0xff] }
 0x1e0   :  { %2026 = vmatpush2.msra.mxu0 %v1123_v49  ;;  %2097 = vmatpush2.msra.mxu1 %v1379_v50  ;;  %v774_v48 = vld [vmem:[#allocation8 + $0x968] sm:$0xff]  ;;  %v517_v49 = vld [vmem:[#allocation8 + $0x160] sm:$0xff] }
 0x1e1   :  { %2027 = vmatprep.subr.mxu0 %v1116_v51  ;;  %2098 = vmatprep.subr.mxu1 %v1372_v53  ;;  %v773_v50 = vld [vmem:[#allocation8 + $0x960] sm:$0xff]  ;;  %v510_v51 = vld [vmem:[#allocation8 + $0x128] sm:$0xff] }
 0x1e2   :  { %2028 = vmatpush2.msra.mxu0 %v1115_v54  ;;  %2099 = vmatpush2.msra.mxu1 %v1371_v60  ;;  %v766_v53 = vld [vmem:[#allocation8 + $0x928] sm:$0xff]  ;;  %v509_v54 = vld [vmem:[#allocation8 + $0x120] sm:$0xff] }
 0x1e3   :  { %2030 = vmatmul.mubr.f32.vlgmr.msra.gmra.mxu0 %v3043_v31  ;;  %2101 = vmatmul.mubr.f32.vlgmr.msra.gmra.mxu1 %v3040_v29  ;;  %v765_v60 = vld [vmem:[#allocation8 + $0x920] sm:$0xff] }
 0x1e4   :  { %2107 = vmatprep.subr.mxu0 %v598_v61  ;;  %2178 = vmatprep.subr.mxu1 %v854_v62  ;;  %v502_v61 = vld [vmem:[#allocation8 + $0xe8] sm:$0xff] }
 0x1e5   :  { %2108 = vmatpush1.msra.mxu0 %v597_v63  ;;  %2171 = vmatprep.mubr.f32.mxu0 %v3006_v57  ;;  %v758_v62 = vld [vmem:[#allocation8 + $0x8e8] sm:$0xff]  ;;  %v501_v63 = vld [vmem:[#allocation8 + $0xe0] sm:$0xff] }
 0x1e6   :  { %2179 = vmatpush1.msra.mxu1 %v853_v0  ;;  %2242 = vmatprep.mubr.f32.mxu1 %v3008_v58  ;;  %v757_v0 = vld [vmem:[#allocation8 + $0x8e0] sm:$0xff] }
 0x1e7   :  { %2109 = vmatprep.subr.mxu0 %v590_v1  ;;  %2180 = vmatprep.subr.mxu1 %v846_v3  ;;  %v494_v1 = vld [vmem:[#allocation8 + $0xa8] sm:$0xff] }
 0x1e8   :  { %2110 = vmatpush1.msra.mxu0 %v589_v4  ;;  %2181 = vmatpush1.msra.mxu1 %v845_v5  ;;  %v750_v3 = vld [vmem:[#allocation8 + $0x8a8] sm:$0xff]  ;;  %v493_v4 = vld [vmem:[#allocation8 + $0xa0] sm:$0xff] }
 0x1e9   :  { %2111 = vmatprep.subr.mxu0 %v582_v6  ;;  %2182 = vmatprep.subr.mxu1 %v838_v7  ;;  %v749_v5 = vld [vmem:[#allocation8 + $0x8a0] sm:$0xff]  ;;  %v486_v6 = vld [vmem:[#allocation8 + $0x68] sm:$0xff] }
 0x1ea   :  { %2112 = vmatpush1.msra.mxu0 %v581_v8  ;;  %2183 = vmatpush1.msra.mxu1 %v837_v9  ;;  %v742_v7 = vld [vmem:[#allocation8 + $0x868] sm:$0xff]  ;;  %v485_v8 = vld [vmem:[#allocation8 + $0x60] sm:$0xff] }
 0x1eb   :  { %2113 = vmatprep.subr.mxu0 %v574_v10  ;;  %2184 = vmatprep.subr.mxu1 %v830_v38  ;;  %v741_v9 = vld [vmem:[#allocation8 + $0x860] sm:$0xff]  ;;  %v478_v10 = vld [vmem:[#allocation8 + $0x28] sm:$0xff] }
 0x1ec   :  { %2114 = vmatpush1.msra.mxu0 %v573_v11  ;;  %2185 = vmatpush1.msra.mxu1 %v829_v12  ;;  %v734_v38 = vld [vmem:[#allocation8 + $0x828] sm:$0xff]  ;;  %v477_v11 = vld [vmem:[#allocation8 + $0x20] sm:$0xff] }
 0x1ed   :  { %2115 = vmatprep.subr.mxu0 %v566_v13  ;;  %2186 = vmatprep.subr.mxu1 %v822_v14  ;;  %v733_v12 = vld [vmem:[#allocation8 + $0x820] sm:$0xff]  ;;  %v726_v13 = vld [vmem:[#allocation8 + $0x7e8] sm:$0xff] }
 0x1ee   :  { %2116 = vmatpush1.msra.mxu0 %v565_v15  ;;  %2187 = vmatpush1.msra.mxu1 %v821_v16  ;;  %v982_v14 = vld [vmem:[#allocation8 + $0xfe8] sm:$0xff]  ;;  %v725_v15 = vld [vmem:[#allocation8 + $0x7e0] sm:$0xff] }
 0x1ef   :  { %2117 = vmatprep.subr.mxu0 %v558_v17  ;;  %2188 = vmatprep.subr.mxu1 %v814_v18  ;;  %v981_v16 = vld [vmem:[#allocation8 + $0xfe0] sm:$0xff]  ;;  %v718_v17 = vld [vmem:[#allocation8 + $0x7a8] sm:$0xff] }
 0x1f0   :  { %2118 = vmatpush1.msra.mxu0 %v557_v19  ;;  %2189 = vmatpush1.msra.mxu1 %v813_v20  ;;  %v974_v18 = vld [vmem:[#allocation8 + $0xfa8] sm:$0xff]  ;;  %v717_v19 = vld [vmem:[#allocation8 + $0x7a0] sm:$0xff] }
 0x1f1   :  { %2119 = vmatprep.subr.mxu0 %v550_v21  ;;  %2190 = vmatprep.subr.mxu1 %v806_v23  ;;  %v973_v20 = vld [vmem:[#allocation8 + $0xfa0] sm:$0xff]  ;;  %v710_v21 = vld [vmem:[#allocation8 + $0x768] sm:$0xff] }
 0x1f2   :  { %2120 = vmatpush1.msra.mxu0 %v549_v41  ;;  %2191 = vmatpush1.msra.mxu1 %v805_v24  ;;  %v966_v23 = vld [vmem:[#allocation8 + $0xf68] sm:$0xff]  ;;  %v709_v41 = vld [vmem:[#allocation8 + $0x760] sm:$0xff] }
 0x1f3   :  { %2121 = vmatprep.subr.mxu0 %v542_v25  ;;  %2192 = vmatprep.subr.mxu1 %v798_v27  ;;  %v965_v24 = vld [vmem:[#allocation8 + $0xf60] sm:$0xff]  ;;  %v702_v25 = vld [vmem:[#allocation8 + $0x728] sm:$0xff] }
 0x1f4   :  { %2122 = vmatpush1.msra.mxu0 %v541_v28  ;;  %2193 = vmatpush1.msra.mxu1 %v797_v30  ;;  %v958_v27 = vld [vmem:[#allocation8 + $0xf28] sm:$0xff]  ;;  %v701_v28 = vld [vmem:[#allocation8 + $0x720] sm:$0xff] }
 0x1f5   :  { %2123 = vmatprep.subr.mxu0 %v534_v32  ;;  %2194 = vmatprep.subr.mxu1 %v790_v33  ;;  %v957_v30 = vld [vmem:[#allocation8 + $0xf20] sm:$0xff]  ;;  %v694_v32 = vld [vmem:[#allocation8 + $0x6e8] sm:$0xff] }
 0x1f6   :  { %2124 = vmatpush1.msra.mxu0 %v533_v34  ;;  %2195 = vmatpush1.msra.mxu1 %v789_v35  ;;  %v950_v33 = vld [vmem:[#allocation8 + $0xee8] sm:$0xff]  ;;  %v693_v34 = vld [vmem:[#allocation8 + $0x6e0] sm:$0xff] }
 0x1f7   :  { %2125 = vmatprep.subr.mxu0 %v526_v36  ;;  %2196 = vmatprep.subr.mxu1 %v782_v37  ;;  %v949_v35 = vld [vmem:[#allocation8 + $0xee0] sm:$0xff]  ;;  %v686_v36 = vld [vmem:[#allocation8 + $0x6a8] sm:$0xff] }
 0x1f8   :  { %2126 = vmatpush1.msra.mxu0 %v525_v44  ;;  %2197 = vmatpush1.msra.mxu1 %v781_v45  ;;  %v942_v37 = vld [vmem:[#allocation8 + $0xea8] sm:$0xff]  ;;  %v685_v44 = vld [vmem:[#allocation8 + $0x6a0] sm:$0xff] }
 0x1f9   :  { %2127 = vmatprep.subr.mxu0 %v518_v47  ;;  %2198 = vmatprep.subr.mxu1 %v774_v48  ;;  %v941_v45 = vld [vmem:[#allocation8 + $0xea0] sm:$0xff]  ;;  %v678_v47 = vld [vmem:[#allocation8 + $0x668] sm:$0xff] }
 0x1fa   :  { %2128 = vmatpush1.msra.mxu0 %v517_v49  ;;  %2199 = vmatpush1.msra.mxu1 %v773_v50  ;;  %v934_v48 = vld [vmem:[#allocation8 + $0xe68] sm:$0xff]  ;;  %v677_v49 = vld [vmem:[#allocation8 + $0x660] sm:$0xff] }
 0x1fb   :  { %2129 = vmatprep.subr.mxu0 %v510_v51  ;;  %2200 = vmatprep.subr.mxu1 %v766_v53  ;;  %v933_v50 = vld [vmem:[#allocation8 + $0xe60] sm:$0xff]  ;;  %v670_v51 = vld [vmem:[#allocation8 + $0x628] sm:$0xff] }
 0x1fc   :  { %2130 = vmatpush1.msra.mxu0 %v509_v54  ;;  %2201 = vmatpush1.msra.mxu1 %v765_v60  ;;  %v926_v53 = vld [vmem:[#allocation8 + $0xe28] sm:$0xff]  ;;  %v669_v54 = vld [vmem:[#allocation8 + $0x620] sm:$0xff] }
 0x1fd   :  { %2131 = vmatprep.subr.mxu0 %v502_v61  ;;  %2202 = vmatprep.subr.mxu1 %v758_v62  ;;  %v925_v60 = vld [vmem:[#allocation8 + $0xe20] sm:$0xff]  ;;  %v662_v61 = vld [vmem:[#allocation8 + $0x5e8] sm:$0xff] }
 0x1fe   :  { %2132 = vmatpush1.msra.mxu0 %v501_v63  ;;  %2203 = vmatpush1.msra.mxu1 %v757_v0  ;;  %v918_v62 = vld [vmem:[#allocation8 + $0xde8] sm:$0xff]  ;;  %v661_v63 = vld [vmem:[#allocation8 + $0x5e0] sm:$0xff] }
 0x1ff   :  { %2133 = vmatprep.subr.mxu0 %v494_v1  ;;  %2204 = vmatprep.subr.mxu1 %v750_v3  ;;  %v917_v0 = vld [vmem:[#allocation8 + $0xde0] sm:$0xff]  ;;  %v654_v1 = vld [vmem:[#allocation8 + $0x5a8] sm:$0xff] }
 0x200   :  { %2134 = vmatpush1.msra.mxu0 %v493_v4  ;;  %2205 = vmatpush1.msra.mxu1 %v749_v5  ;;  %v910_v3 = vld [vmem:[#allocation8 + $0xda8] sm:$0xff]  ;;  %v653_v4 = vld [vmem:[#allocation8 + $0x5a0] sm:$0xff] }
 0x201   :  { %2135 = vmatprep.subr.mxu0 %v486_v6  ;;  %2206 = vmatprep.subr.mxu1 %v742_v7  ;;  %v909_v5 = vld [vmem:[#allocation8 + $0xda0] sm:$0xff]  ;;  %v646_v6 = vld [vmem:[#allocation8 + $0x568] sm:$0xff] }
 0x202   :  { %2136 = vmatpush1.msra.mxu0 %v485_v8  ;;  %2207 = vmatpush1.msra.mxu1 %v741_v9  ;;  %v902_v7 = vld [vmem:[#allocation8 + $0xd68] sm:$0xff]  ;;  %v645_v8 = vld [vmem:[#allocation8 + $0x560] sm:$0xff] }
 0x203   :  { %2137 = vmatprep.subr.mxu0 %v478_v10  ;;  %2208 = vmatprep.subr.mxu1 %v734_v38  ;;  %v901_v9 = vld [vmem:[#allocation8 + $0xd60] sm:$0xff]  ;;  %v638_v10 = vld [vmem:[#allocation8 + $0x528] sm:$0xff] }
 0x204   :  { %2138 = vmatpush1.msra.mxu0 %v477_v11  ;;  %2209 = vmatpush1.msra.mxu1 %v733_v12  ;;  %v894_v38 = vld [vmem:[#allocation8 + $0xd28] sm:$0xff]  ;;  %v637_v11 = vld [vmem:[#allocation8 + $0x520] sm:$0xff] }
 0x205   :  { %2139 = vmatprep.subr.mxu0 %v726_v13  ;;  %2210 = vmatprep.subr.mxu1 %v982_v14  ;;  %v893_v12 = vld [vmem:[#allocation8 + $0xd20] sm:$0xff]  ;;  %v630_v13 = vld [vmem:[#allocation8 + $0x4e8] sm:$0xff] }
 0x206   :  { %2140 = vmatpush2.msra.mxu0 %v725_v15  ;;  %2211 = vmatpush2.msra.mxu1 %v981_v16  ;;  %v886_v14 = vld [vmem:[#allocation8 + $0xce8] sm:$0xff]  ;;  %v629_v15 = vld [vmem:[#allocation8 + $0x4e0] sm:$0xff] }
 0x207   :  { %2141 = vmatprep.subr.mxu0 %v718_v17  ;;  %2212 = vmatprep.subr.mxu1 %v974_v18  ;;  %v885_v16 = vld [vmem:[#allocation8 + $0xce0] sm:$0xff]  ;;  %v622_v17 = vld [vmem:[#allocation8 + $0x4a8] sm:$0xff] }
 0x208   :  { %2142 = vmatpush2.msra.mxu0 %v717_v19  ;;  %2213 = vmatpush2.msra.mxu1 %v973_v20  ;;  %v878_v18 = vld [vmem:[#allocation8 + $0xca8] sm:$0xff]  ;;  %v621_v19 = vld [vmem:[#allocation8 + $0x4a0] sm:$0xff] }
 0x209   :  { %2143 = vmatprep.subr.mxu0 %v710_v21  ;;  %2214 = vmatprep.subr.mxu1 %v966_v23  ;;  %v877_v20 = vld [vmem:[#allocation8 + $0xca0] sm:$0xff]  ;;  %v614_v21 = vld [vmem:[#allocation8 + $0x468] sm:$0xff] }
 0x20a   :  { %2144 = vmatpush2.msra.mxu0 %v709_v41  ;;  %2215 = vmatpush2.msra.mxu1 %v965_v24  ;;  %v870_v23 = vld [vmem:[#allocation8 + $0xc68] sm:$0xff]  ;;  %v613_v41 = vld [vmem:[#allocation8 + $0x460] sm:$0xff] }
 0x20b   :  { %2145 = vmatprep.subr.mxu0 %v702_v25  ;;  %2216 = vmatprep.subr.mxu1 %v958_v27  ;;  %v869_v24 = vld [vmem:[#allocation8 + $0xc60] sm:$0xff]  ;;  %v606_v25 = vld [vmem:[#allocation8 + $0x428] sm:$0xff] }
 0x20c   :  { %2146 = vmatpush2.msra.mxu0 %v701_v28  ;;  %2217 = vmatpush2.msra.mxu1 %v957_v30  ;;  %v862_v27 = vld [vmem:[#allocation8 + $0xc28] sm:$0xff]  ;;  %v605_v28 = vld [vmem:[#allocation8 + $0x420] sm:$0xff] }
 0x20d   :  { %2147 = vmatprep.subr.mxu0 %v694_v32  ;;  %2218 = vmatprep.subr.mxu1 %v950_v33  ;;  %v861_v30 = vld [vmem:[#allocation8 + $0xc20] sm:$0xff]  ;;  %v1110_v32 = vld [vmem:[#allocation8 + $0x13e8] sm:$0xff] }
 0x20e   :  { %2148 = vmatpush2.msra.mxu0 %v693_v34  ;;  %2219 = vmatpush2.msra.mxu1 %v949_v35  ;;  %v1366_v33 = vld [vmem:[#allocation8 + $0x1be8] sm:$0xff]  ;;  %v1109_v34 = vld [vmem:[#allocation8 + $0x13e0] sm:$0xff] }
 0x20f   :  { %2149 = vmatprep.subr.mxu0 %v686_v36  ;;  %2220 = vmatprep.subr.mxu1 %v942_v37  ;;  %v1365_v35 = vld [vmem:[#allocation8 + $0x1be0] sm:$0xff]  ;;  %v1102_v36 = vld [vmem:[#allocation8 + $0x13a8] sm:$0xff] }
 0x210   :  { %2150 = vmatpush2.msra.mxu0 %v685_v44  ;;  %2221 = vmatpush2.msra.mxu1 %v941_v45  ;;  %v1358_v37 = vld [vmem:[#allocation8 + $0x1ba8] sm:$0xff]  ;;  %v1101_v44 = vld [vmem:[#allocation8 + $0x13a0] sm:$0xff] }
 0x211   :  { %2151 = vmatprep.subr.mxu0 %v678_v47  ;;  %2222 = vmatprep.subr.mxu1 %v934_v48  ;;  %v1357_v45 = vld [vmem:[#allocation8 + $0x1ba0] sm:$0xff]  ;;  %v1094_v47 = vld [vmem:[#allocation8 + $0x1368] sm:$0xff] }
 0x212   :  { %2152 = vmatpush2.msra.mxu0 %v677_v49  ;;  %2223 = vmatpush2.msra.mxu1 %v933_v50  ;;  %v1350_v48 = vld [vmem:[#allocation8 + $0x1b68] sm:$0xff]  ;;  %v1093_v49 = vld [vmem:[#allocation8 + $0x1360] sm:$0xff] }
 0x213   :  { %2153 = vmatprep.subr.mxu0 %v670_v51  ;;  %2224 = vmatprep.subr.mxu1 %v926_v53  ;;  %v1349_v50 = vld [vmem:[#allocation8 + $0x1b60] sm:$0xff]  ;;  %v1086_v51 = vld [vmem:[#allocation8 + $0x1328] sm:$0xff] }
 0x214   :  { %2154 = vmatpush2.msra.mxu0 %v669_v54  ;;  %2225 = vmatpush2.msra.mxu1 %v925_v60  ;;  %v1342_v53 = vld [vmem:[#allocation8 + $0x1b28] sm:$0xff]  ;;  %v1085_v54 = vld [vmem:[#allocation8 + $0x1320] sm:$0xff] }
 0x215   :  { %2155 = vmatprep.subr.mxu0 %v662_v61  ;;  %2226 = vmatprep.subr.mxu1 %v918_v62  ;;  %v1341_v60 = vld [vmem:[#allocation8 + $0x1b20] sm:$0xff]  ;;  %v1078_v61 = vld [vmem:[#allocation8 + $0x12e8] sm:$0xff] }
 0x216   :  { %2156 = vmatpush2.msra.mxu0 %v661_v63  ;;  %2227 = vmatpush2.msra.mxu1 %v917_v0  ;;  %v1334_v62 = vld [vmem:[#allocation8 + $0x1ae8] sm:$0xff]  ;;  %v1077_v63 = vld [vmem:[#allocation8 + $0x12e0] sm:$0xff] }
 0x217   :  { %2157 = vmatprep.subr.mxu0 %v654_v1  ;;  %2228 = vmatprep.subr.mxu1 %v910_v3  ;;  %v1333_v0 = vld [vmem:[#allocation8 + $0x1ae0] sm:$0xff]  ;;  %v1070_v1 = vld [vmem:[#allocation8 + $0x12a8] sm:$0xff] }
 0x218   :  { %2158 = vmatpush2.msra.mxu0 %v653_v4  ;;  %2229 = vmatpush2.msra.mxu1 %v909_v5  ;;  %v1326_v3 = vld [vmem:[#allocation8 + $0x1aa8] sm:$0xff]  ;;  %v1069_v4 = vld [vmem:[#allocation8 + $0x12a0] sm:$0xff] }
 0x219   :  { %2159 = vmatprep.subr.mxu0 %v646_v6  ;;  %2230 = vmatprep.subr.mxu1 %v902_v7  ;;  %v1325_v5 = vld [vmem:[#allocation8 + $0x1aa0] sm:$0xff]  ;;  %v1062_v6 = vld [vmem:[#allocation8 + $0x1268] sm:$0xff] }
 0x21a   :  { %2160 = vmatpush2.msra.mxu0 %v645_v8  ;;  %2231 = vmatpush2.msra.mxu1 %v901_v9  ;;  %v1318_v7 = vld [vmem:[#allocation8 + $0x1a68] sm:$0xff]  ;;  %v1061_v8 = vld [vmem:[#allocation8 + $0x1260] sm:$0xff] }
 0x21b   :  { %2161 = vmatprep.subr.mxu0 %v638_v10  ;;  %2232 = vmatprep.subr.mxu1 %v894_v38  ;;  %v1317_v9 = vld [vmem:[#allocation8 + $0x1a60] sm:$0xff]  ;;  %v1054_v10 = vld [vmem:[#allocation8 + $0x1228] sm:$0xff] }
 0x21c   :  { %2162 = vmatpush2.msra.mxu0 %v637_v11  ;;  %2233 = vmatpush2.msra.mxu1 %v893_v12  ;;  %v1310_v38 = vld [vmem:[#allocation8 + $0x1a28] sm:$0xff]  ;;  %v1053_v11 = vld [vmem:[#allocation8 + $0x1220] sm:$0xff] }
 0x21d   :  { %2163 = vmatprep.subr.mxu0 %v630_v13  ;;  %2234 = vmatprep.subr.mxu1 %v886_v14  ;;  %v1309_v12 = vld [vmem:[#allocation8 + $0x1a20] sm:$0xff]  ;;  %v1046_v13 = vld [vmem:[#allocation8 + $0x11e8] sm:$0xff] }
 0x21e   :  { %2164 = vmatpush2.msra.mxu0 %v629_v15  ;;  %2235 = vmatpush2.msra.mxu1 %v885_v16  ;;  %v1302_v14 = vld [vmem:[#allocation8 + $0x19e8] sm:$0xff]  ;;  %v1045_v15 = vld [vmem:[#allocation8 + $0x11e0] sm:$0xff] }
 0x21f   :  { %2165 = vmatprep.subr.mxu0 %v622_v17  ;;  %2236 = vmatprep.subr.mxu1 %v878_v18  ;;  %v1301_v16 = vld [vmem:[#allocation8 + $0x19e0] sm:$0xff]  ;;  %v1038_v17 = vld [vmem:[#allocation8 + $0x11a8] sm:$0xff] }
 0x220   :  { %2166 = vmatpush2.msra.mxu0 %v621_v19  ;;  %2237 = vmatpush2.msra.mxu1 %v877_v20  ;;  %v1294_v18 = vld [vmem:[#allocation8 + $0x19a8] sm:$0xff]  ;;  %v1037_v19 = vld [vmem:[#allocation8 + $0x11a0] sm:$0xff] }
 0x221   :  { %2167 = vmatprep.subr.mxu0 %v614_v21  ;;  %2238 = vmatprep.subr.mxu1 %v870_v23  ;;  %v1293_v20 = vld [vmem:[#allocation8 + $0x19a0] sm:$0xff]  ;;  %v1030_v21 = vld [vmem:[#allocation8 + $0x1168] sm:$0xff] }
 0x222   :  { %2168 = vmatpush2.msra.mxu0 %v613_v41  ;;  %2239 = vmatpush2.msra.mxu1 %v869_v24  ;;  %v1286_v23 = vld [vmem:[#allocation8 + $0x1968] sm:$0xff]  ;;  %v1029_v41 = vld [vmem:[#allocation8 + $0x1160] sm:$0xff] }
 0x223   :  { %2169 = vmatprep.subr.mxu0 %v606_v25  ;;  %2240 = vmatprep.subr.mxu1 %v862_v27  ;;  %v1285_v24 = vld [vmem:[#allocation8 + $0x1960] sm:$0xff]  ;;  %v1022_v25 = vld [vmem:[#allocation8 + $0x1128] sm:$0xff] }
 0x224   :  { %2170 = vmatpush2.msra.mxu0 %v605_v28  ;;  %2241 = vmatpush2.msra.mxu1 %v861_v30  ;;  %v1278_v27 = vld [vmem:[#allocation8 + $0x1928] sm:$0xff]  ;;  %v1021_v28 = vld [vmem:[#allocation8 + $0x1120] sm:$0xff] }
 0x225   :  { %2172 = vmatmul.mubr.f32.vlgmr.msra.gmra.mxu0 %v3010_v59  ;;  %2243 = vmatmul.mubr.f32.vlgmr.msra.gmra.mxu1 %v3004_v56  ;;  %v1277_v30 = vld [vmem:[#allocation8 + $0x1920] sm:$0xff] }
 0x226   :  { %2249 = vmatprep.subr.mxu0 %v1110_v32  ;;  %2320 = vmatprep.subr.mxu1 %v1366_v33  ;;  %v1014_v32 = vld [vmem:[#allocation8 + $0x10e8] sm:$0xff] }
 0x227   :  { %2250 = vmatpush1.msra.mxu0 %v1109_v34  ;;  %2313 = vmatprep.mubr.f32.mxu0 %v3036_v22  ;;  %v1270_v33 = vld [vmem:[#allocation8 + $0x18e8] sm:$0xff]  ;;  %v1013_v34 = vld [vmem:[#allocation8 + $0x10e0] sm:$0xff] }
 0x228   :  { %2321 = vmatpush1.msra.mxu1 %v1365_v35  ;;  %2384 = vmatprep.mubr.f32.mxu1 %v3038_v26  ;;  %v1269_v35 = vld [vmem:[#allocation8 + $0x18e0] sm:$0xff] }
 0x229   :  { %2251 = vmatprep.subr.mxu0 %v1102_v36  ;;  %2322 = vmatprep.subr.mxu1 %v1358_v37  ;;  %v1006_v36 = vld [vmem:[#allocation8 + $0x10a8] sm:$0xff] }
 0x22a   :  { %2252 = vmatpush1.msra.mxu0 %v1101_v44  ;;  %2323 = vmatpush1.msra.mxu1 %v1357_v45  ;;  %v1262_v37 = vld [vmem:[#allocation8 + $0x18a8] sm:$0xff]  ;;  %v1005_v44 = vld [vmem:[#allocation8 + $0x10a0] sm:$0xff] }
 0x22b   :  { %2253 = vmatprep.subr.mxu0 %v1094_v47  ;;  %2324 = vmatprep.subr.mxu1 %v1350_v48  ;;  %v1261_v45 = vld [vmem:[#allocation8 + $0x18a0] sm:$0xff]  ;;  %v998_v47 = vld [vmem:[#allocation8 + $0x1068] sm:$0xff] }
 0x22c   :  { %2254 = vmatpush1.msra.mxu0 %v1093_v49  ;;  %2325 = vmatpush1.msra.mxu1 %v1349_v50  ;;  %v1254_v48 = vld [vmem:[#allocation8 + $0x1868] sm:$0xff]  ;;  %v997_v49 = vld [vmem:[#allocation8 + $0x1060] sm:$0xff] }
 0x22d   :  { %2255 = vmatprep.subr.mxu0 %v1086_v51  ;;  %2326 = vmatprep.subr.mxu1 %v1342_v53  ;;  %v1253_v50 = vld [vmem:[#allocation8 + $0x1860] sm:$0xff]  ;;  %v990_v51 = vld [vmem:[#allocation8 + $0x1028] sm:$0xff] }
 0x22e   :  { %2256 = vmatpush1.msra.mxu0 %v1085_v54  ;;  %2327 = vmatpush1.msra.mxu1 %v1341_v60  ;;  %v1246_v53 = vld [vmem:[#allocation8 + $0x1828] sm:$0xff]  ;;  %v989_v54 = vld [vmem:[#allocation8 + $0x1020] sm:$0xff] }
 0x22f   :  { %2257 = vmatprep.subr.mxu0 %v1078_v61  ;;  %2328 = vmatprep.subr.mxu1 %v1334_v62  ;;  %v1245_v60 = vld [vmem:[#allocation8 + $0x1820] sm:$0xff]  ;;  %v1238_v61 = vld [vmem:[#allocation8 + $0x17e8] sm:$0xff] }
 0x230   :  { %2258 = vmatpush1.msra.mxu0 %v1077_v63  ;;  %2329 = vmatpush1.msra.mxu1 %v1333_v0  ;;  %v1494_v62 = vld [vmem:[#allocation8 + $0x1fe8] sm:$0xff]  ;;  %v1237_v63 = vld [vmem:[#allocation8 + $0x17e0] sm:$0xff] }
 0x231   :  { %2259 = vmatprep.subr.mxu0 %v1070_v1  ;;  %2330 = vmatprep.subr.mxu1 %v1326_v3  ;;  %v1493_v0 = vld [vmem:[#allocation8 + $0x1fe0] sm:$0xff]  ;;  %v1230_v1 = vld [vmem:[#allocation8 + $0x17a8] sm:$0xff] }
 0x232   :  { %2260 = vmatpush1.msra.mxu0 %v1069_v4  ;;  %2331 = vmatpush1.msra.mxu1 %v1325_v5  ;;  %v1486_v3 = vld [vmem:[#allocation8 + $0x1fa8] sm:$0xff]  ;;  %v1229_v4 = vld [vmem:[#allocation8 + $0x17a0] sm:$0xff] }
 0x233   :  { %2261 = vmatprep.subr.mxu0 %v1062_v6  ;;  %2332 = vmatprep.subr.mxu1 %v1318_v7  ;;  %v1485_v5 = vld [vmem:[#allocation8 + $0x1fa0] sm:$0xff]  ;;  %v1222_v6 = vld [vmem:[#allocation8 + $0x1768] sm:$0xff] }
 0x234   :  { %2262 = vmatpush1.msra.mxu0 %v1061_v8  ;;  %2333 = vmatpush1.msra.mxu1 %v1317_v9  ;;  %v1478_v7 = vld [vmem:[#allocation8 + $0x1f68] sm:$0xff]  ;;  %v1221_v8 = vld [vmem:[#allocation8 + $0x1760] sm:$0xff] }
 0x235   :  { %2263 = vmatprep.subr.mxu0 %v1054_v10  ;;  %2334 = vmatprep.subr.mxu1 %v1310_v38  ;;  %v1477_v9 = vld [vmem:[#allocation8 + $0x1f60] sm:$0xff]  ;;  %v1214_v10 = vld [vmem:[#allocation8 + $0x1728] sm:$0xff] }
 0x236   :  { %2264 = vmatpush1.msra.mxu0 %v1053_v11  ;;  %2335 = vmatpush1.msra.mxu1 %v1309_v12  ;;  %v1470_v38 = vld [vmem:[#allocation8 + $0x1f28] sm:$0xff]  ;;  %v1213_v11 = vld [vmem:[#allocation8 + $0x1720] sm:$0xff] }
 0x237   :  { %2265 = vmatprep.subr.mxu0 %v1046_v13  ;;  %2336 = vmatprep.subr.mxu1 %v1302_v14  ;;  %v1469_v12 = vld [vmem:[#allocation8 + $0x1f20] sm:$0xff]  ;;  %v1206_v13 = vld [vmem:[#allocation8 + $0x16e8] sm:$0xff] }
 0x238   :  { %2266 = vmatpush1.msra.mxu0 %v1045_v15  ;;  %2337 = vmatpush1.msra.mxu1 %v1301_v16  ;;  %v1462_v14 = vld [vmem:[#allocation8 + $0x1ee8] sm:$0xff]  ;;  %v1205_v15 = vld [vmem:[#allocation8 + $0x16e0] sm:$0xff] }
 0x239   :  { %2267 = vmatprep.subr.mxu0 %v1038_v17  ;;  %2338 = vmatprep.subr.mxu1 %v1294_v18  ;;  %v1461_v16 = vld [vmem:[#allocation8 + $0x1ee0] sm:$0xff]  ;;  %v1198_v17 = vld [vmem:[#allocation8 + $0x16a8] sm:$0xff] }
 0x23a   :  { %2268 = vmatpush1.msra.mxu0 %v1037_v19  ;;  %2339 = vmatpush1.msra.mxu1 %v1293_v20  ;;  %v1454_v18 = vld [vmem:[#allocation8 + $0x1ea8] sm:$0xff]  ;;  %v1197_v19 = vld [vmem:[#allocation8 + $0x16a0] sm:$0xff] }
 0x23b   :  { %2269 = vmatprep.subr.mxu0 %v1030_v21  ;;  %2340 = vmatprep.subr.mxu1 %v1286_v23  ;;  %v1453_v20 = vld [vmem:[#allocation8 + $0x1ea0] sm:$0xff]  ;;  %v1190_v21 = vld [vmem:[#allocation8 + $0x1668] sm:$0xff] }
 0x23c   :  { %2270 = vmatpush1.msra.mxu0 %v1029_v41  ;;  %2341 = vmatpush1.msra.mxu1 %v1285_v24  ;;  %v1446_v23 = vld [vmem:[#allocation8 + $0x1e68] sm:$0xff]  ;;  %v1189_v41 = vld [vmem:[#allocation8 + $0x1660] sm:$0xff] }
 0x23d   :  { %2271 = vmatprep.subr.mxu0 %v1022_v25  ;;  %2342 = vmatprep.subr.mxu1 %v1278_v27  ;;  %v1445_v24 = vld [vmem:[#allocation8 + $0x1e60] sm:$0xff]  ;;  %v1182_v25 = vld [vmem:[#allocation8 + $0x1628] sm:$0xff] }
 0x23e   :  { %2272 = vmatpush1.msra.mxu0 %v1021_v28  ;;  %2343 = vmatpush1.msra.mxu1 %v1277_v30  ;;  %v1438_v27 = vld [vmem:[#allocation8 + $0x1e28] sm:$0xff]  ;;  %v1181_v28 = vld [vmem:[#allocation8 + $0x1620] sm:$0xff] }
 0x23f   :  { %2273 = vmatprep.subr.mxu0 %v1014_v32  ;;  %2344 = vmatprep.subr.mxu1 %v1270_v33  ;;  %v1437_v30 = vld [vmem:[#allocation8 + $0x1e20] sm:$0xff]  ;;  %v1174_v32 = vld [vmem:[#allocation8 + $0x15e8] sm:$0xff] }
 0x240   :  { %2274 = vmatpush1.msra.mxu0 %v1013_v34  ;;  %2345 = vmatpush1.msra.mxu1 %v1269_v35  ;;  %v1430_v33 = vld [vmem:[#allocation8 + $0x1de8] sm:$0xff]  ;;  %v1173_v34 = vld [vmem:[#allocation8 + $0x15e0] sm:$0xff] }
 0x241   :  { %2275 = vmatprep.subr.mxu0 %v1006_v36  ;;  %2346 = vmatprep.subr.mxu1 %v1262_v37  ;;  %v1429_v35 = vld [vmem:[#allocation8 + $0x1de0] sm:$0xff]  ;;  %v1166_v36 = vld [vmem:[#allocation8 + $0x15a8] sm:$0xff] }
 0x242   :  { %2276 = vmatpush1.msra.mxu0 %v1005_v44  ;;  %2347 = vmatpush1.msra.mxu1 %v1261_v45  ;;  %v1422_v37 = vld [vmem:[#allocation8 + $0x1da8] sm:$0xff]  ;;  %v1165_v44 = vld [vmem:[#allocation8 + $0x15a0] sm:$0xff] }
 0x243   :  { %2277 = vmatprep.subr.mxu0 %v998_v47  ;;  %2348 = vmatprep.subr.mxu1 %v1254_v48  ;;  %v1421_v45 = vld [vmem:[#allocation8 + $0x1da0] sm:$0xff]  ;;  %v1158_v47 = vld [vmem:[#allocation8 + $0x1568] sm:$0xff] }
 0x244   :  { %2278 = vmatpush1.msra.mxu0 %v997_v49  ;;  %2349 = vmatpush1.msra.mxu1 %v1253_v50  ;;  %v1414_v48 = vld [vmem:[#allocation8 + $0x1d68] sm:$0xff]  ;;  %v1157_v49 = vld [vmem:[#allocation8 + $0x1560] sm:$0xff] }
 0x245   :  { %2279 = vmatprep.subr.mxu0 %v990_v51  ;;  %2350 = vmatprep.subr.mxu1 %v1246_v53  ;;  %v1413_v50 = vld [vmem:[#allocation8 + $0x1d60] sm:$0xff]  ;;  %v1150_v51 = vld [vmem:[#allocation8 + $0x1528] sm:$0xff] }
 0x246   :  { %2280 = vmatpush1.msra.mxu0 %v989_v54  ;;  %2351 = vmatpush1.msra.mxu1 %v1245_v60  ;;  %v1406_v53 = vld [vmem:[#allocation8 + $0x1d28] sm:$0xff]  ;;  %v1149_v54 = vld [vmem:[#allocation8 + $0x1520] sm:$0xff] }
 0x247   :  { %2281 = vmatprep.subr.mxu0 %v1238_v61  ;;  %2352 = vmatprep.subr.mxu1 %v1494_v62  ;;  %v1405_v60 = vld [vmem:[#allocation8 + $0x1d20] sm:$0xff]  ;;  %v1142_v61 = vld [vmem:[#allocation8 + $0x14e8] sm:$0xff] }
 0x248   :  { %2282 = vmatpush2.msra.mxu0 %v1237_v63  ;;  %2353 = vmatpush2.msra.mxu1 %v1493_v0  ;;  %v1398_v62 = vld [vmem:[#allocation8 + $0x1ce8] sm:$0xff]  ;;  %v1141_v63 = vld [vmem:[#allocation8 + $0x14e0] sm:$0xff] }
 0x249   :  { %2283 = vmatprep.subr.mxu0 %v1230_v1  ;;  %2354 = vmatprep.subr.mxu1 %v1486_v3  ;;  %v1397_v0 = vld [vmem:[#allocation8 + $0x1ce0] sm:$0xff]  ;;  %v1134_v1 = vld [vmem:[#allocation8 + $0x14a8] sm:$0xff] }
 0x24a   :  { %2284 = vmatpush2.msra.mxu0 %v1229_v4  ;;  %2355 = vmatpush2.msra.mxu1 %v1485_v5  ;;  %v1390_v3 = vld [vmem:[#allocation8 + $0x1ca8] sm:$0xff]  ;;  %v1133_v4 = vld [vmem:[#allocation8 + $0x14a0] sm:$0xff] }
 0x24b   :  { %2285 = vmatprep.subr.mxu0 %v1222_v6  ;;  %2356 = vmatprep.subr.mxu1 %v1478_v7  ;;  %v1389_v5 = vld [vmem:[#allocation8 + $0x1ca0] sm:$0xff]  ;;  %v1126_v6 = vld [vmem:[#allocation8 + $0x1468] sm:$0xff] }
 0x24c   :  { %2286 = vmatpush2.msra.mxu0 %v1221_v8  ;;  %2357 = vmatpush2.msra.mxu1 %v1477_v9  ;;  %v1382_v7 = vld [vmem:[#allocation8 + $0x1c68] sm:$0xff]  ;;  %v1125_v8 = vld [vmem:[#allocation8 + $0x1460] sm:$0xff] }
 0x24d   :  { %2287 = vmatprep.subr.mxu0 %v1214_v10  ;;  %2358 = vmatprep.subr.mxu1 %v1470_v38  ;;  %v1381_v9 = vld [vmem:[#allocation8 + $0x1c60] sm:$0xff]  ;;  %v1118_v10 = vld [vmem:[#allocation8 + $0x1428] sm:$0xff] }
 0x24e   :  { %2288 = vmatpush2.msra.mxu0 %v1213_v11  ;;  %2359 = vmatpush2.msra.mxu1 %v1469_v12  ;;  %v1374_v38 = vld [vmem:[#allocation8 + $0x1c28] sm:$0xff]  ;;  %v1117_v11 = vld [vmem:[#allocation8 + $0x1420] sm:$0xff] }
 0x24f   :  { %2289 = vmatprep.subr.mxu0 %v1206_v13  ;;  %2360 = vmatprep.subr.mxu1 %v1462_v14  ;;  %v1373_v12 = vld [vmem:[#allocation8 + $0x1c20] sm:$0xff]  ;;  %v600_v13 = vld [vmem:[#allocation8 + $0x3f8] sm:$0xff] }
 0x250   :  { %2290 = vmatpush2.msra.mxu0 %v1205_v15  ;;  %2361 = vmatpush2.msra.mxu1 %v1461_v16  ;;  %v856_v14 = vld [vmem:[#allocation8 + $0xbf8] sm:$0xff]  ;;  %v599_v15 = vld [vmem:[#allocation8 + $0x3f0] sm:$0xff] }
 0x251   :  { %2291 = vmatprep.subr.mxu0 %v1198_v17  ;;  %2362 = vmatprep.subr.mxu1 %v1454_v18  ;;  %v855_v16 = vld [vmem:[#allocation8 + $0xbf0] sm:$0xff]  ;;  %v592_v17 = vld [vmem:[#allocation8 + $0x3b8] sm:$0xff] }
 0x252   :  { %2292 = vmatpush2.msra.mxu0 %v1197_v19  ;;  %2363 = vmatpush2.msra.mxu1 %v1453_v20  ;;  %v848_v18 = vld [vmem:[#allocation8 + $0xbb8] sm:$0xff]  ;;  %v591_v19 = vld [vmem:[#allocation8 + $0x3b0] sm:$0xff] }
 0x253   :  { %2293 = vmatprep.subr.mxu0 %v1190_v21  ;;  %2364 = vmatprep.subr.mxu1 %v1446_v23  ;;  %v847_v20 = vld [vmem:[#allocation8 + $0xbb0] sm:$0xff]  ;;  %v584_v21 = vld [vmem:[#allocation8 + $0x378] sm:$0xff] }
 0x254   :  { %2294 = vmatpush2.msra.mxu0 %v1189_v41  ;;  %2365 = vmatpush2.msra.mxu1 %v1445_v24  ;;  %v840_v23 = vld [vmem:[#allocation8 + $0xb78] sm:$0xff]  ;;  %v583_v41 = vld [vmem:[#allocation8 + $0x370] sm:$0xff] }
 0x255   :  { %2295 = vmatprep.subr.mxu0 %v1182_v25  ;;  %2366 = vmatprep.subr.mxu1 %v1438_v27  ;;  %v839_v24 = vld [vmem:[#allocation8 + $0xb70] sm:$0xff]  ;;  %v576_v25 = vld [vmem:[#allocation8 + $0x338] sm:$0xff] }
 0x256   :  { %2296 = vmatpush2.msra.mxu0 %v1181_v28  ;;  %2367 = vmatpush2.msra.mxu1 %v1437_v30  ;;  %v832_v27 = vld [vmem:[#allocation8 + $0xb38] sm:$0xff]  ;;  %v575_v28 = vld [vmem:[#allocation8 + $0x330] sm:$0xff] }
 0x257   :  { %2297 = vmatprep.subr.mxu0 %v1174_v32  ;;  %2368 = vmatprep.subr.mxu1 %v1430_v33  ;;  %v831_v30 = vld [vmem:[#allocation8 + $0xb30] sm:$0xff]  ;;  %v824_v32 = vld [vmem:[#allocation8 + $0xaf8] sm:$0xff] }
 0x258   :  { %2298 = vmatpush2.msra.mxu0 %v1173_v34  ;;  %2369 = vmatpush2.msra.mxu1 %v1429_v35  ;;  %v823_v33 = vld [vmem:[#allocation8 + $0xaf0] sm:$0xff]  ;;  %v560_v34 = vld [vmem:[#allocation8 + $0x2b8] sm:$0xff] }
 0x259   :  { %2299 = vmatprep.subr.mxu0 %v1166_v36  ;;  %2370 = vmatprep.subr.mxu1 %v1422_v37  ;;  %v816_v35 = vld [vmem:[#allocation8 + $0xab8] sm:$0xff]  ;;  %v559_v36 = vld [vmem:[#allocation8 + $0x2b0] sm:$0xff] }
 0x25a   :  { %2300 = vmatpush2.msra.mxu0 %v1165_v44  ;;  %2371 = vmatpush2.msra.mxu1 %v1421_v45  ;;  %v815_v37 = vld [vmem:[#allocation8 + $0xab0] sm:$0xff]  ;;  %v552_v44 = vld [vmem:[#allocation8 + $0x278] sm:$0xff] }
 0x25b   :  { %2301 = vmatprep.subr.mxu0 %v1158_v47  ;;  %2372 = vmatprep.subr.mxu1 %v1414_v48  ;;  %v808_v45 = vld [vmem:[#allocation8 + $0xa78] sm:$0xff]  ;;  %v551_v47 = vld [vmem:[#allocation8 + $0x270] sm:$0xff] }
 0x25c   :  { %2302 = vmatpush2.msra.mxu0 %v1157_v49  ;;  %2373 = vmatpush2.msra.mxu1 %v1413_v50  ;;  %v807_v48 = vld [vmem:[#allocation8 + $0xa70] sm:$0xff]  ;;  %v544_v49 = vld [vmem:[#allocation8 + $0x238] sm:$0xff] }
 0x25d   :  { %2303 = vmatprep.subr.mxu0 %v1150_v51  ;;  %2374 = vmatprep.subr.mxu1 %v1406_v53  ;;  %v800_v50 = vld [vmem:[#allocation8 + $0xa38] sm:$0xff]  ;;  %v543_v51 = vld [vmem:[#allocation8 + $0x230] sm:$0xff] }
 0x25e   :  { %2304 = vmatpush2.msra.mxu0 %v1149_v54  ;;  %2375 = vmatpush2.msra.mxu1 %v1405_v60  ;;  %v799_v53 = vld [vmem:[#allocation8 + $0xa30] sm:$0xff]  ;;  %v536_v54 = vld [vmem:[#allocation8 + $0x1f8] sm:$0xff] }
 0x25f   :  { %2305 = vmatprep.subr.mxu0 %v1142_v61  ;;  %2376 = vmatprep.subr.mxu1 %v1398_v62  ;;  %v792_v60 = vld [vmem:[#allocation8 + $0x9f8] sm:$0xff]  ;;  %v535_v61 = vld [vmem:[#allocation8 + $0x1f0] sm:$0xff] }
 0x260   :  { %2306 = vmatpush2.msra.mxu0 %v1141_v63  ;;  %2377 = vmatpush2.msra.mxu1 %v1397_v0  ;;  %v791_v62 = vld [vmem:[#allocation8 + $0x9f0] sm:$0xff]  ;;  %v528_v63 = vld [vmem:[#allocation8 + $0x1b8] sm:$0xff] }
 0x261   :  { %2307 = vmatprep.subr.mxu0 %v1134_v1  ;;  %2378 = vmatprep.subr.mxu1 %v1390_v3  ;;  %v784_v0 = vld [vmem:[#allocation8 + $0x9b8] sm:$0xff]  ;;  %v527_v1 = vld [vmem:[#allocation8 + $0x1b0] sm:$0xff] }
 0x262   :  { %2308 = vmatpush2.msra.mxu0 %v1133_v4  ;;  %2379 = vmatpush2.msra.mxu1 %v1389_v5  ;;  %v783_v3 = vld [vmem:[#allocation8 + $0x9b0] sm:$0xff]  ;;  %v520_v4 = vld [vmem:[#allocation8 + $0x178] sm:$0xff] }
 0x263   :  { %2309 = vmatprep.subr.mxu0 %v1126_v6  ;;  %2380 = vmatprep.subr.mxu1 %v1382_v7  ;;  %v776_v5 = vld [vmem:[#allocation8 + $0x978] sm:$0xff]  ;;  %v519_v6 = vld [vmem:[#allocation8 + $0x170] sm:$0xff] }
 0x264   :  { %2310 = vmatpush2.msra.mxu0 %v1125_v8  ;;  %2381 = vmatpush2.msra.mxu1 %v1381_v9  ;;  %v775_v7 = vld [vmem:[#allocation8 + $0x970] sm:$0xff]  ;;  %v512_v8 = vld [vmem:[#allocation8 + $0x138] sm:$0xff] }
 0x265   :  { %2311 = vmatprep.subr.mxu0 %v1118_v10  ;;  %2382 = vmatprep.subr.mxu1 %v1374_v38  ;;  %v768_v9 = vld [vmem:[#allocation8 + $0x938] sm:$0xff]  ;;  %v511_v10 = vld [vmem:[#allocation8 + $0x130] sm:$0xff] }
 0x266   :  { %2312 = vmatpush2.msra.mxu0 %v1117_v11  ;;  %2383 = vmatpush2.msra.mxu1 %v1373_v12  ;;  %v767_v38 = vld [vmem:[#allocation8 + $0x930] sm:$0xff]  ;;  %v504_v11 = vld [vmem:[#allocation8 + $0xf8] sm:$0xff] }
 0x267   :  { %2314 = vmatmul.mubr.f32.vlgmr.msra.gmra.mxu0 %v3043_v31  ;;  %2385 = vmatmul.mubr.f32.vlgmr.msra.gmra.mxu1 %v3040_v29  ;;  %v760_v12 = vld [vmem:[#allocation8 + $0x8f8] sm:$0xff] }
 0x268   :  { %2391 = vmatprep.subr.mxu0 %v600_v13  ;;  %2462 = vmatprep.subr.mxu1 %v856_v14  ;;  %v503_v13 = vld [vmem:[#allocation8 + $0xf0] sm:$0xff] }
 0x269   :  { %2392 = vmatpush1.msra.mxu0 %v599_v15  ;;  %2455 = vmatprep.mubr.f32.mxu0 %v3006_v57  ;;  %v568_v57 = vld [vmem:[#allocation8 + $0x2f8] sm:$0xff]  ;;  %v759_v14 = vld [vmem:[#allocation8 + $0x8f0] sm:$0xff] }
 0x26a   :  { %2463 = vmatpush1.msra.mxu1 %v855_v16  ;;  %2526 = vmatprep.mubr.f32.mxu1 %v3008_v58  ;;  %v567_v58 = vld [vmem:[#allocation8 + $0x2f0] sm:$0xff]  ;;  %v496_v15 = vld [vmem:[#allocation8 + $0xb8] sm:$0xff] }
 0x26b   :  { %2393 = vmatprep.subr.mxu0 %v592_v17  ;;  %2464 = vmatprep.subr.mxu1 %v848_v18  ;;  %v752_v16 = vld [vmem:[#allocation8 + $0x8b8] sm:$0xff]  ;;  %v495_v17 = vld [vmem:[#allocation8 + $0xb0] sm:$0xff] }
 0x26c   :  { %2394 = vmatpush1.msra.mxu0 %v591_v19  ;;  %2465 = vmatpush1.msra.mxu1 %v847_v20  ;;  %v751_v18 = vld [vmem:[#allocation8 + $0x8b0] sm:$0xff]  ;;  %v488_v19 = vld [vmem:[#allocation8 + $0x78] sm:$0xff] }
 0x26d   :  { %2395 = vmatprep.subr.mxu0 %v584_v21  ;;  %2466 = vmatprep.subr.mxu1 %v840_v23  ;;  %v744_v20 = vld [vmem:[#allocation8 + $0x878] sm:$0xff]  ;;  %v487_v21 = vld [vmem:[#allocation8 + $0x70] sm:$0xff] }
 0x26e   :  { %2396 = vmatpush1.msra.mxu0 %v583_v41  ;;  %2467 = vmatpush1.msra.mxu1 %v839_v24  ;;  %v743_v23 = vld [vmem:[#allocation8 + $0x870] sm:$0xff]  ;;  %v480_v41 = vld [vmem:[#allocation8 + $0x38] sm:$0xff] }
 0x26f   :  { %2397 = vmatprep.subr.mxu0 %v576_v25  ;;  %2468 = vmatprep.subr.mxu1 %v832_v27  ;;  %v736_v24 = vld [vmem:[#allocation8 + $0x838] sm:$0xff]  ;;  %v479_v25 = vld [vmem:[#allocation8 + $0x30] sm:$0xff] }
 0x270   :  { %2398 = vmatpush1.msra.mxu0 %v575_v28  ;;  %2469 = vmatpush1.msra.mxu1 %v831_v30  ;;  %v735_v27 = vld [vmem:[#allocation8 + $0x830] sm:$0xff]  ;;  %v728_v28 = vld [vmem:[#allocation8 + $0x7f8] sm:$0xff] }
 0x271   :  { %2399 = vmatprep.subr.mxu0 %v568_v57  ;;  %2470 = vmatprep.subr.mxu1 %v824_v32  ;;  %v984_v30 = vld [vmem:[#allocation8 + $0xff8] sm:$0xff]  ;;  %v727_v57 = vld [vmem:[#allocation8 + $0x7f0] sm:$0xff] }
 0x272   :  { %2400 = vmatpush1.msra.mxu0 %v567_v58  ;;  %2471 = vmatpush1.msra.mxu1 %v823_v33  ;;  %v983_v32 = vld [vmem:[#allocation8 + $0xff0] sm:$0xff]  ;;  %v720_v58 = vld [vmem:[#allocation8 + $0x7b8] sm:$0xff] }
 0x273   :  { %2401 = vmatprep.subr.mxu0 %v560_v34  ;;  %2472 = vmatprep.subr.mxu1 %v816_v35  ;;  %v976_v33 = vld [vmem:[#allocation8 + $0xfb8] sm:$0xff]  ;;  %v719_v34 = vld [vmem:[#allocation8 + $0x7b0] sm:$0xff] }
 0x274   :  { %2402 = vmatpush1.msra.mxu0 %v559_v36  ;;  %2473 = vmatpush1.msra.mxu1 %v815_v37  ;;  %v975_v35 = vld [vmem:[#allocation8 + $0xfb0] sm:$0xff]  ;;  %v712_v36 = vld [vmem:[#allocation8 + $0x778] sm:$0xff] }
 0x275   :  { %2403 = vmatprep.subr.mxu0 %v552_v44  ;;  %2474 = vmatprep.subr.mxu1 %v808_v45  ;;  %v968_v37 = vld [vmem:[#allocation8 + $0xf78] sm:$0xff]  ;;  %v711_v44 = vld [vmem:[#allocation8 + $0x770] sm:$0xff] }
 0x276   :  { %2404 = vmatpush1.msra.mxu0 %v551_v47  ;;  %2475 = vmatpush1.msra.mxu1 %v807_v48  ;;  %v967_v45 = vld [vmem:[#allocation8 + $0xf70] sm:$0xff]  ;;  %v704_v47 = vld [vmem:[#allocation8 + $0x738] sm:$0xff] }
 0x277   :  { %2405 = vmatprep.subr.mxu0 %v544_v49  ;;  %2476 = vmatprep.subr.mxu1 %v800_v50  ;;  %v960_v48 = vld [vmem:[#allocation8 + $0xf38] sm:$0xff]  ;;  %v703_v49 = vld [vmem:[#allocation8 + $0x730] sm:$0xff] }
 0x278   :  { %2406 = vmatpush1.msra.mxu0 %v543_v51  ;;  %2477 = vmatpush1.msra.mxu1 %v799_v53  ;;  %v959_v50 = vld [vmem:[#allocation8 + $0xf30] sm:$0xff]  ;;  %v696_v51 = vld [vmem:[#allocation8 + $0x6f8] sm:$0xff] }
 0x279   :  { %2407 = vmatprep.subr.mxu0 %v536_v54  ;;  %2478 = vmatprep.subr.mxu1 %v792_v60  ;;  %v952_v53 = vld [vmem:[#allocation8 + $0xef8] sm:$0xff]  ;;  %v695_v54 = vld [vmem:[#allocation8 + $0x6f0] sm:$0xff] }
 0x27a   :  { %2408 = vmatpush1.msra.mxu0 %v535_v61  ;;  %2479 = vmatpush1.msra.mxu1 %v791_v62  ;;  %v951_v60 = vld [vmem:[#allocation8 + $0xef0] sm:$0xff]  ;;  %v688_v61 = vld [vmem:[#allocation8 + $0x6b8] sm:$0xff] }
 0x27b   :  { %2409 = vmatprep.subr.mxu0 %v528_v63  ;;  %2480 = vmatprep.subr.mxu1 %v784_v0  ;;  %v944_v62 = vld [vmem:[#allocation8 + $0xeb8] sm:$0xff]  ;;  %v687_v63 = vld [vmem:[#allocation8 + $0x6b0] sm:$0xff] }
 0x27c   :  { %2410 = vmatpush1.msra.mxu0 %v527_v1  ;;  %2481 = vmatpush1.msra.mxu1 %v783_v3  ;;  %v943_v0 = vld [vmem:[#allocation8 + $0xeb0] sm:$0xff]  ;;  %v680_v1 = vld [vmem:[#allocation8 + $0x678] sm:$0xff] }
 0x27d   :  { %2411 = vmatprep.subr.mxu0 %v520_v4  ;;  %2482 = vmatprep.subr.mxu1 %v776_v5  ;;  %v936_v3 = vld [vmem:[#allocation8 + $0xe78] sm:$0xff]  ;;  %v679_v4 = vld [vmem:[#allocation8 + $0x670] sm:$0xff] }
 0x27e   :  { %2412 = vmatpush1.msra.mxu0 %v519_v6  ;;  %2483 = vmatpush1.msra.mxu1 %v775_v7  ;;  %v935_v5 = vld [vmem:[#allocation8 + $0xe70] sm:$0xff]  ;;  %v672_v6 = vld [vmem:[#allocation8 + $0x638] sm:$0xff] }
 0x27f   :  { %2413 = vmatprep.subr.mxu0 %v512_v8  ;;  %2484 = vmatprep.subr.mxu1 %v768_v9  ;;  %v928_v7 = vld [vmem:[#allocation8 + $0xe38] sm:$0xff]  ;;  %v671_v8 = vld [vmem:[#allocation8 + $0x630] sm:$0xff] }
 0x280   :  { %2414 = vmatpush1.msra.mxu0 %v511_v10  ;;  %2485 = vmatpush1.msra.mxu1 %v767_v38  ;;  %v927_v9 = vld [vmem:[#allocation8 + $0xe30] sm:$0xff]  ;;  %v664_v10 = vld [vmem:[#allocation8 + $0x5f8] sm:$0xff] }
 0x281   :  { %2415 = vmatprep.subr.mxu0 %v504_v11  ;;  %2486 = vmatprep.subr.mxu1 %v760_v12  ;;  %v920_v38 = vld [vmem:[#allocation8 + $0xdf8] sm:$0xff]  ;;  %v663_v11 = vld [vmem:[#allocation8 + $0x5f0] sm:$0xff] }
 0x282   :  { %2416 = vmatpush1.msra.mxu0 %v503_v13  ;;  %2487 = vmatpush1.msra.mxu1 %v759_v14  ;;  %v919_v12 = vld [vmem:[#allocation8 + $0xdf0] sm:$0xff]  ;;  %v656_v13 = vld [vmem:[#allocation8 + $0x5b8] sm:$0xff] }
 0x283   :  { %2417 = vmatprep.subr.mxu0 %v496_v15  ;;  %2488 = vmatprep.subr.mxu1 %v752_v16  ;;  %v912_v14 = vld [vmem:[#allocation8 + $0xdb8] sm:$0xff]  ;;  %v655_v15 = vld [vmem:[#allocation8 + $0x5b0] sm:$0xff] }
 0x284   :  { %2418 = vmatpush1.msra.mxu0 %v495_v17  ;;  %2489 = vmatpush1.msra.mxu1 %v751_v18  ;;  %v911_v16 = vld [vmem:[#allocation8 + $0xdb0] sm:$0xff]  ;;  %v648_v17 = vld [vmem:[#allocation8 + $0x578] sm:$0xff] }
 0x285   :  { %2419 = vmatprep.subr.mxu0 %v488_v19  ;;  %2490 = vmatprep.subr.mxu1 %v744_v20  ;;  %v904_v18 = vld [vmem:[#allocation8 + $0xd78] sm:$0xff]  ;;  %v647_v19 = vld [vmem:[#allocation8 + $0x570] sm:$0xff] }
 0x286   :  { %2420 = vmatpush1.msra.mxu0 %v487_v21  ;;  %2491 = vmatpush1.msra.mxu1 %v743_v23  ;;  %v903_v20 = vld [vmem:[#allocation8 + $0xd70] sm:$0xff]  ;;  %v640_v21 = vld [vmem:[#allocation8 + $0x538] sm:$0xff] }
 0x287   :  { %2421 = vmatprep.subr.mxu0 %v480_v41  ;;  %2492 = vmatprep.subr.mxu1 %v736_v24  ;;  %v896_v23 = vld [vmem:[#allocation8 + $0xd38] sm:$0xff]  ;;  %v639_v41 = vld [vmem:[#allocation8 + $0x530] sm:$0xff] }
 0x288   :  { %2422 = vmatpush1.msra.mxu0 %v479_v25  ;;  %2493 = vmatpush1.msra.mxu1 %v735_v27  ;;  %v895_v24 = vld [vmem:[#allocation8 + $0xd30] sm:$0xff]  ;;  %v632_v25 = vld [vmem:[#allocation8 + $0x4f8] sm:$0xff] }
 0x289   :  { %2423 = vmatprep.subr.mxu0 %v728_v28  ;;  %2494 = vmatprep.subr.mxu1 %v984_v30  ;;  %v888_v27 = vld [vmem:[#allocation8 + $0xcf8] sm:$0xff]  ;;  %v631_v28 = vld [vmem:[#allocation8 + $0x4f0] sm:$0xff] }
 0x28a   :  { %2424 = vmatpush2.msra.mxu0 %v727_v57  ;;  %2495 = vmatpush2.msra.mxu1 %v983_v32  ;;  %v887_v30 = vld [vmem:[#allocation8 + $0xcf0] sm:$0xff]  ;;  %v624_v57 = vld [vmem:[#allocation8 + $0x4b8] sm:$0xff] }
 0x28b   :  { %2425 = vmatprep.subr.mxu0 %v720_v58  ;;  %2496 = vmatprep.subr.mxu1 %v976_v33  ;;  %v880_v32 = vld [vmem:[#allocation8 + $0xcb8] sm:$0xff]  ;;  %v623_v58 = vld [vmem:[#allocation8 + $0x4b0] sm:$0xff] }
 0x28c   :  { %2426 = vmatpush2.msra.mxu0 %v719_v34  ;;  %2497 = vmatpush2.msra.mxu1 %v975_v35  ;;  %v879_v33 = vld [vmem:[#allocation8 + $0xcb0] sm:$0xff]  ;;  %v616_v34 = vld [vmem:[#allocation8 + $0x478] sm:$0xff] }
 0x28d   :  { %2427 = vmatprep.subr.mxu0 %v712_v36  ;;  %2498 = vmatprep.subr.mxu1 %v968_v37  ;;  %v872_v35 = vld [vmem:[#allocation8 + $0xc78] sm:$0xff]  ;;  %v615_v36 = vld [vmem:[#allocation8 + $0x470] sm:$0xff] }
 0x28e   :  { %2428 = vmatpush2.msra.mxu0 %v711_v44  ;;  %2499 = vmatpush2.msra.mxu1 %v967_v45  ;;  %v871_v37 = vld [vmem:[#allocation8 + $0xc70] sm:$0xff]  ;;  %v608_v44 = vld [vmem:[#allocation8 + $0x438] sm:$0xff] }
 0x28f   :  { %2429 = vmatprep.subr.mxu0 %v704_v47  ;;  %2500 = vmatprep.subr.mxu1 %v960_v48  ;;  %v864_v45 = vld [vmem:[#allocation8 + $0xc38] sm:$0xff]  ;;  %v607_v47 = vld [vmem:[#allocation8 + $0x430] sm:$0xff] }
 0x290   :  { %2430 = vmatpush2.msra.mxu0 %v703_v49  ;;  %2501 = vmatpush2.msra.mxu1 %v959_v50  ;;  %v863_v48 = vld [vmem:[#allocation8 + $0xc30] sm:$0xff]  ;;  %v1112_v49 = vld [vmem:[#allocation8 + $0x13f8] sm:$0xff] }
 0x291   :  { %2431 = vmatprep.subr.mxu0 %v696_v51  ;;  %2502 = vmatprep.subr.mxu1 %v952_v53  ;;  %v1368_v50 = vld [vmem:[#allocation8 + $0x1bf8] sm:$0xff]  ;;  %v1111_v51 = vld [vmem:[#allocation8 + $0x13f0] sm:$0xff] }
 0x292   :  { %2432 = vmatpush2.msra.mxu0 %v695_v54  ;;  %2503 = vmatpush2.msra.mxu1 %v951_v60  ;;  %v1367_v53 = vld [vmem:[#allocation8 + $0x1bf0] sm:$0xff]  ;;  %v1104_v54 = vld [vmem:[#allocation8 + $0x13b8] sm:$0xff] }
 0x293   :  { %2433 = vmatprep.subr.mxu0 %v688_v61  ;;  %2504 = vmatprep.subr.mxu1 %v944_v62  ;;  %v1360_v60 = vld [vmem:[#allocation8 + $0x1bb8] sm:$0xff]  ;;  %v1103_v61 = vld [vmem:[#allocation8 + $0x13b0] sm:$0xff] }
 0x294   :  { %2434 = vmatpush2.msra.mxu0 %v687_v63  ;;  %2505 = vmatpush2.msra.mxu1 %v943_v0  ;;  %v1359_v62 = vld [vmem:[#allocation8 + $0x1bb0] sm:$0xff]  ;;  %v1096_v63 = vld [vmem:[#allocation8 + $0x1378] sm:$0xff] }
 0x295   :  { %2435 = vmatprep.subr.mxu0 %v680_v1  ;;  %2506 = vmatprep.subr.mxu1 %v936_v3  ;;  %v1352_v0 = vld [vmem:[#allocation8 + $0x1b78] sm:$0xff]  ;;  %v1351_v1 = vld [vmem:[#allocation8 + $0x1b70] sm:$0xff] }
 0x296   :  { %2436 = vmatpush2.msra.mxu0 %v679_v4  ;;  %2507 = vmatpush2.msra.mxu1 %v935_v5  ;;  %v1344_v3 = vld [vmem:[#allocation8 + $0x1b38] sm:$0xff]  ;;  %v1087_v4 = vld [vmem:[#allocation8 + $0x1330] sm:$0xff] }
 0x297   :  { %2437 = vmatprep.subr.mxu0 %v672_v6  ;;  %2508 = vmatprep.subr.mxu1 %v928_v7  ;;  %v1343_v5 = vld [vmem:[#allocation8 + $0x1b30] sm:$0xff]  ;;  %v1336_v6 = vld [vmem:[#allocation8 + $0x1af8] sm:$0xff] }
 0x298   :  { %2438 = vmatpush2.msra.mxu0 %v671_v8  ;;  %2509 = vmatpush2.msra.mxu1 %v927_v9  ;;  %v1335_v7 = vld [vmem:[#allocation8 + $0x1af0] sm:$0xff]  ;;  %v1072_v8 = vld [vmem:[#allocation8 + $0x12b8] sm:$0xff] }
 0x299   :  { %2439 = vmatprep.subr.mxu0 %v664_v10  ;;  %2510 = vmatprep.subr.mxu1 %v920_v38  ;;  %v1328_v9 = vld [vmem:[#allocation8 + $0x1ab8] sm:$0xff]  ;;  %v1071_v10 = vld [vmem:[#allocation8 + $0x12b0] sm:$0xff] }
 0x29a   :  { %2440 = vmatpush2.msra.mxu0 %v663_v11  ;;  %2511 = vmatpush2.msra.mxu1 %v919_v12  ;;  %v1327_v38 = vld [vmem:[#allocation8 + $0x1ab0] sm:$0xff]  ;;  %v1064_v11 = vld [vmem:[#allocation8 + $0x1278] sm:$0xff] }
 0x29b   :  { %2441 = vmatprep.subr.mxu0 %v656_v13  ;;  %2512 = vmatprep.subr.mxu1 %v912_v14  ;;  %v1320_v12 = vld [vmem:[#allocation8 + $0x1a78] sm:$0xff]  ;;  %v1063_v13 = vld [vmem:[#allocation8 + $0x1270] sm:$0xff] }
 0x29c   :  { %2442 = vmatpush2.msra.mxu0 %v655_v15  ;;  %2513 = vmatpush2.msra.mxu1 %v911_v16  ;;  %v1319_v14 = vld [vmem:[#allocation8 + $0x1a70] sm:$0xff]  ;;  %v1056_v15 = vld [vmem:[#allocation8 + $0x1238] sm:$0xff] }
 0x29d   :  { %2443 = vmatprep.subr.mxu0 %v648_v17  ;;  %2514 = vmatprep.subr.mxu1 %v904_v18  ;;  %v1312_v16 = vld [vmem:[#allocation8 + $0x1a38] sm:$0xff]  ;;  %v1055_v17 = vld [vmem:[#allocation8 + $0x1230] sm:$0xff] }
 0x29e   :  { %2444 = vmatpush2.msra.mxu0 %v647_v19  ;;  %2515 = vmatpush2.msra.mxu1 %v903_v20  ;;  %v1311_v18 = vld [vmem:[#allocation8 + $0x1a30] sm:$0xff]  ;;  %v1048_v19 = vld [vmem:[#allocation8 + $0x11f8] sm:$0xff] }
 0x29f   :  { %2445 = vmatprep.subr.mxu0 %v640_v21  ;;  %2516 = vmatprep.subr.mxu1 %v896_v23  ;;  %v1304_v20 = vld [vmem:[#allocation8 + $0x19f8] sm:$0xff]  ;;  %v1047_v21 = vld [vmem:[#allocation8 + $0x11f0] sm:$0xff] }
 0x2a0   :  { %2446 = vmatpush2.msra.mxu0 %v639_v41  ;;  %2517 = vmatpush2.msra.mxu1 %v895_v24  ;;  %v1303_v23 = vld [vmem:[#allocation8 + $0x19f0] sm:$0xff]  ;;  %v1040_v41 = vld [vmem:[#allocation8 + $0x11b8] sm:$0xff] }
 0x2a1   :  { %2447 = vmatprep.subr.mxu0 %v632_v25  ;;  %2518 = vmatprep.subr.mxu1 %v888_v27  ;;  %v1296_v24 = vld [vmem:[#allocation8 + $0x19b8] sm:$0xff]  ;;  %v1039_v25 = vld [vmem:[#allocation8 + $0x11b0] sm:$0xff] }
 0x2a2   :  { %2448 = vmatpush2.msra.mxu0 %v631_v28  ;;  %2519 = vmatpush2.msra.mxu1 %v887_v30  ;;  %v1295_v27 = vld [vmem:[#allocation8 + $0x19b0] sm:$0xff]  ;;  %v1032_v28 = vld [vmem:[#allocation8 + $0x1178] sm:$0xff] }
 0x2a3   :  { %2449 = vmatprep.subr.mxu0 %v624_v57  ;;  %2520 = vmatprep.subr.mxu1 %v880_v32  ;;  %v1288_v30 = vld [vmem:[#allocation8 + $0x1978] sm:$0xff]  ;;  %v1031_v57 = vld [vmem:[#allocation8 + $0x1170] sm:$0xff] }
 0x2a4   :  { %2450 = vmatpush2.msra.mxu0 %v623_v58  ;;  %2521 = vmatpush2.msra.mxu1 %v879_v33  ;;  %v1287_v32 = vld [vmem:[#allocation8 + $0x1970] sm:$0xff]  ;;  %v1024_v58 = vld [vmem:[#allocation8 + $0x1138] sm:$0xff] }
 0x2a5   :  { %2451 = vmatprep.subr.mxu0 %v616_v34  ;;  %2522 = vmatprep.subr.mxu1 %v872_v35  ;;  %v1280_v33 = vld [vmem:[#allocation8 + $0x1938] sm:$0xff]  ;;  %v1023_v34 = vld [vmem:[#allocation8 + $0x1130] sm:$0xff] }
 0x2a6   :  { %2452 = vmatpush2.msra.mxu0 %v615_v36  ;;  %2523 = vmatpush2.msra.mxu1 %v871_v37  ;;  %v1279_v35 = vld [vmem:[#allocation8 + $0x1930] sm:$0xff]  ;;  %v1016_v36 = vld [vmem:[#allocation8 + $0x10f8] sm:$0xff] }
 0x2a7   :  { %2453 = vmatprep.subr.mxu0 %v608_v44  ;;  %2524 = vmatprep.subr.mxu1 %v864_v45  ;;  %v1272_v37 = vld [vmem:[#allocation8 + $0x18f8] sm:$0xff]  ;;  %v1015_v44 = vld [vmem:[#allocation8 + $0x10f0] sm:$0xff] }
 0x2a8   :  { %2454 = vmatpush2.msra.mxu0 %v607_v47  ;;  %2525 = vmatpush2.msra.mxu1 %v863_v48  ;;  %v1271_v45 = vld [vmem:[#allocation8 + $0x18f0] sm:$0xff]  ;;  %v1008_v47 = vld [vmem:[#allocation8 + $0x10b8] sm:$0xff] }
 0x2a9   :  { %2456 = vmatmul.mubr.f32.vlgmr.msra.gmra.mxu0 %v3010_v59  ;;  %2527 = vmatmul.mubr.f32.vlgmr.msra.gmra.mxu1 %v3004_v56  ;;  %v1095_v59 = vld [vmem:[#allocation8 + $0x1370] sm:$0xff]  ;;  %v1088_v56 = vld [vmem:[#allocation8 + $0x1338] sm:$0xff] }
 0x2aa   :  { %2533 = vmatprep.subr.mxu0 %v1112_v49  ;;  %2604 = vmatprep.subr.mxu1 %v1368_v50  ;;  %v1264_v48 = vld [vmem:[#allocation8 + $0x18b8] sm:$0xff]  ;;  %v1007_v49 = vld [vmem:[#allocation8 + $0x10b0] sm:$0xff] }
 0x2ab   :  { %2534 = vmatpush1.msra.mxu0 %v1111_v51  ;;  %2597 = vmatprep.mubr.f32.mxu0 %v3036_v22  ;;  %v1080_v22 = vld [vmem:[#allocation8 + $0x12f8] sm:$0xff]  ;;  %v1263_v50 = vld [vmem:[#allocation8 + $0x18b0] sm:$0xff] }
 0x2ac   :  { %2605 = vmatpush1.msra.mxu1 %v1367_v53  ;;  %2668 = vmatprep.mubr.f32.mxu1 %v3038_v26  ;;  %v1079_v26 = vld [vmem:[#allocation8 + $0x12f0] sm:$0xff]  ;;  %v1000_v51 = vld [vmem:[#allocation8 + $0x1078] sm:$0xff] }
 0x2ad   :  { %2535 = vmatprep.subr.mxu0 %v1104_v54  ;;  %2606 = vmatprep.subr.mxu1 %v1360_v60  ;;  %v1256_v53 = vld [vmem:[#allocation8 + $0x1878] sm:$0xff]  ;;  %v999_v54 = vld [vmem:[#allocation8 + $0x1070] sm:$0xff] }
 0x2ae   :  { %2536 = vmatpush1.msra.mxu0 %v1103_v61  ;;  %2607 = vmatpush1.msra.mxu1 %v1359_v62  ;;  %v1255_v60 = vld [vmem:[#allocation8 + $0x1870] sm:$0xff]  ;;  %v992_v61 = vld [vmem:[#allocation8 + $0x1038] sm:$0xff] }
 0x2af   :  { %2537 = vmatprep.subr.mxu0 %v1096_v63  ;;  %2608 = vmatprep.subr.mxu1 %v1352_v0  ;;  %v1248_v62 = vld [vmem:[#allocation8 + $0x1838] sm:$0xff]  ;;  %v991_v63 = vld [vmem:[#allocation8 + $0x1030] sm:$0xff] }
 0x2b0   :  { %2538 = vmatpush1.msra.mxu0 %v1095_v59  ;;  %2609 = vmatpush1.msra.mxu1 %v1351_v1  ;;  %v1247_v0 = vld [vmem:[#allocation8 + $0x1830] sm:$0xff]  ;;  %v1240_v59 = vld [vmem:[#allocation8 + $0x17f8] sm:$0xff] }
 0x2b1   :  { %2539 = vmatprep.subr.mxu0 %v1088_v56  ;;  %2610 = vmatprep.subr.mxu1 %v1344_v3  ;;  %v1496_v1 = vld [vmem:[#allocation8 + $0x1ff8] sm:$0xff]  ;;  %v1239_v56 = vld [vmem:[#allocation8 + $0x17f0] sm:$0xff] }
 0x2b2   :  { %2540 = vmatpush1.msra.mxu0 %v1087_v4  ;;  %2611 = vmatpush1.msra.mxu1 %v1343_v5  ;;  %v1495_v3 = vld [vmem:[#allocation8 + $0x1ff0] sm:$0xff]  ;;  %v1232_v4 = vld [vmem:[#allocation8 + $0x17b8] sm:$0xff] }
 0x2b3   :  { %2541 = vmatprep.subr.mxu0 %v1080_v22  ;;  %2612 = vmatprep.subr.mxu1 %v1336_v6  ;;  %v1488_v5 = vld [vmem:[#allocation8 + $0x1fb8] sm:$0xff]  ;;  %v1231_v22 = vld [vmem:[#allocation8 + $0x17b0] sm:$0xff] }
 0x2b4   :  { %2542 = vmatpush1.msra.mxu0 %v1079_v26  ;;  %2613 = vmatpush1.msra.mxu1 %v1335_v7  ;;  %v1487_v6 = vld [vmem:[#allocation8 + $0x1fb0] sm:$0xff]  ;;  %v1224_v26 = vld [vmem:[#allocation8 + $0x1778] sm:$0xff] }
 0x2b5   :  { %2543 = vmatprep.subr.mxu0 %v1072_v8  ;;  %2614 = vmatprep.subr.mxu1 %v1328_v9  ;;  %v1480_v7 = vld [vmem:[#allocation8 + $0x1f78] sm:$0xff]  ;;  %v1223_v8 = vld [vmem:[#allocation8 + $0x1770] sm:$0xff] }
 0x2b6   :  { %2544 = vmatpush1.msra.mxu0 %v1071_v10  ;;  %2615 = vmatpush1.msra.mxu1 %v1327_v38  ;;  %v1479_v9 = vld [vmem:[#allocation8 + $0x1f70] sm:$0xff]  ;;  %v1216_v10 = vld [vmem:[#allocation8 + $0x1738] sm:$0xff] }
 0x2b7   :  { %2545 = vmatprep.subr.mxu0 %v1064_v11  ;;  %2616 = vmatprep.subr.mxu1 %v1320_v12  ;;  %v1472_v38 = vld [vmem:[#allocation8 + $0x1f38] sm:$0xff]  ;;  %v1215_v11 = vld [vmem:[#allocation8 + $0x1730] sm:$0xff] }
 0x2b8   :  { %2546 = vmatpush1.msra.mxu0 %v1063_v13  ;;  %2617 = vmatpush1.msra.mxu1 %v1319_v14  ;;  %v1471_v12 = vld [vmem:[#allocation8 + $0x1f30] sm:$0xff]  ;;  %v1208_v13 = vld [vmem:[#allocation8 + $0x16f8] sm:$0xff] }
 0x2b9   :  { %2547 = vmatprep.subr.mxu0 %v1056_v15  ;;  %2618 = vmatprep.subr.mxu1 %v1312_v16  ;;  %v1464_v14 = vld [vmem:[#allocation8 + $0x1ef8] sm:$0xff]  ;;  %v1207_v15 = vld [vmem:[#allocation8 + $0x16f0] sm:$0xff] }
 0x2ba   :  { %2548 = vmatpush1.msra.mxu0 %v1055_v17  ;;  %2619 = vmatpush1.msra.mxu1 %v1311_v18  ;;  %v1463_v16 = vld [vmem:[#allocation8 + $0x1ef0] sm:$0xff]  ;;  %v1200_v17 = vld [vmem:[#allocation8 + $0x16b8] sm:$0xff] }
 0x2bb   :  { %2549 = vmatprep.subr.mxu0 %v1048_v19  ;;  %2620 = vmatprep.subr.mxu1 %v1304_v20  ;;  %v1456_v18 = vld [vmem:[#allocation8 + $0x1eb8] sm:$0xff]  ;;  %v1199_v19 = vld [vmem:[#allocation8 + $0x16b0] sm:$0xff] }
 0x2bc   :  { %2550 = vmatpush1.msra.mxu0 %v1047_v21  ;;  %2621 = vmatpush1.msra.mxu1 %v1303_v23  ;;  %v1455_v20 = vld [vmem:[#allocation8 + $0x1eb0] sm:$0xff]  ;;  %v1192_v21 = vld [vmem:[#allocation8 + $0x1678] sm:$0xff] }
 0x2bd   :  { %2551 = vmatprep.subr.mxu0 %v1040_v41  ;;  %2622 = vmatprep.subr.mxu1 %v1296_v24  ;;  %v1448_v23 = vld [vmem:[#allocation8 + $0x1e78] sm:$0xff]  ;;  %v1191_v41 = vld [vmem:[#allocation8 + $0x1670] sm:$0xff] }
 0x2be   :  { %2552 = vmatpush1.msra.mxu0 %v1039_v25  ;;  %2623 = vmatpush1.msra.mxu1 %v1295_v27  ;;  %v1447_v24 = vld [vmem:[#allocation8 + $0x1e70] sm:$0xff]  ;;  %v1184_v25 = vld [vmem:[#allocation8 + $0x1638] sm:$0xff] }
 0x2bf   :  { %2553 = vmatprep.subr.mxu0 %v1032_v28  ;;  %2624 = vmatprep.subr.mxu1 %v1288_v30  ;;  %v1440_v27 = vld [vmem:[#allocation8 + $0x1e38] sm:$0xff]  ;;  %v1183_v28 = vld [vmem:[#allocation8 + $0x1630] sm:$0xff] }
 0x2c0   :  { %2554 = vmatpush1.msra.mxu0 %v1031_v57  ;;  %2625 = vmatpush1.msra.mxu1 %v1287_v32  ;;  %v1439_v30 = vld [vmem:[#allocation8 + $0x1e30] sm:$0xff]  ;;  %v1176_v57 = vld [vmem:[#allocation8 + $0x15f8] sm:$0xff] }
 0x2c1   :  { %2555 = vmatprep.subr.mxu0 %v1024_v58  ;;  %2626 = vmatprep.subr.mxu1 %v1280_v33  ;;  %v1432_v32 = vld [vmem:[#allocation8 + $0x1df8] sm:$0xff]  ;;  %v1175_v58 = vld [vmem:[#allocation8 + $0x15f0] sm:$0xff] }
 0x2c2   :  { %2556 = vmatpush1.msra.mxu0 %v1023_v34  ;;  %2627 = vmatpush1.msra.mxu1 %v1279_v35  ;;  %v1431_v33 = vld [vmem:[#allocation8 + $0x1df0] sm:$0xff]  ;;  %v1168_v34 = vld [vmem:[#allocation8 + $0x15b8] sm:$0xff] }
 0x2c3   :  { %2557 = vmatprep.subr.mxu0 %v1016_v36  ;;  %2628 = vmatprep.subr.mxu1 %v1272_v37  ;;  %v1424_v35 = vld [vmem:[#allocation8 + $0x1db8] sm:$0xff]  ;;  %v1167_v36 = vld [vmem:[#allocation8 + $0x15b0] sm:$0xff] }
 0x2c4   :  { %2558 = vmatpush1.msra.mxu0 %v1015_v44  ;;  %2629 = vmatpush1.msra.mxu1 %v1271_v45  ;;  %v1423_v37 = vld [vmem:[#allocation8 + $0x1db0] sm:$0xff]  ;;  %v1160_v44 = vld [vmem:[#allocation8 + $0x1578] sm:$0xff] }
 0x2c5   :  { %2559 = vmatprep.subr.mxu0 %v1008_v47  ;;  %2630 = vmatprep.subr.mxu1 %v1264_v48  ;;  %v1416_v45 = vld [vmem:[#allocation8 + $0x1d78] sm:$0xff]  ;;  %v1159_v47 = vld [vmem:[#allocation8 + $0x1570] sm:$0xff] }
 0x2c6   :  { %2560 = vmatpush1.msra.mxu0 %v1007_v49  ;;  %2631 = vmatpush1.msra.mxu1 %v1263_v50  ;;  %v1415_v48 = vld [vmem:[#allocation8 + $0x1d70] sm:$0xff]  ;;  %v1152_v49 = vld [vmem:[#allocation8 + $0x1538] sm:$0xff] }
 0x2c7   :  { %2561 = vmatprep.subr.mxu0 %v1000_v51  ;;  %2632 = vmatprep.subr.mxu1 %v1256_v53  ;;  %v1408_v50 = vld [vmem:[#allocation8 + $0x1d38] sm:$0xff]  ;;  %v1151_v51 = vld [vmem:[#allocation8 + $0x1530] sm:$0xff] }
 0x2c8   :  { %2562 = vmatpush1.msra.mxu0 %v999_v54  ;;  %2633 = vmatpush1.msra.mxu1 %v1255_v60  ;;  %v1407_v53 = vld [vmem:[#allocation8 + $0x1d30] sm:$0xff]  ;;  %v1144_v54 = vld [vmem:[#allocation8 + $0x14f8] sm:$0xff] }
 0x2c9   :  { %2563 = vmatprep.subr.mxu0 %v992_v61  ;;  %2634 = vmatprep.subr.mxu1 %v1248_v62  ;;  %v1400_v60 = vld [vmem:[#allocation8 + $0x1cf8] sm:$0xff]  ;;  %v1143_v61 = vld [vmem:[#allocation8 + $0x14f0] sm:$0xff] }
 0x2ca   :  { %2564 = vmatpush1.msra.mxu0 %v991_v63  ;;  %2635 = vmatpush1.msra.mxu1 %v1247_v0  ;;  %v1399_v62 = vld [vmem:[#allocation8 + $0x1cf0] sm:$0xff]  ;;  %v1136_v63 = vld [vmem:[#allocation8 + $0x14b8] sm:$0xff] }
 0x2cb   :  { %2565 = vmatprep.subr.mxu0 %v1240_v59  ;;  %2636 = vmatprep.subr.mxu1 %v1496_v1  ;;  %v1392_v0 = vld [vmem:[#allocation8 + $0x1cb8] sm:$0xff]  ;;  %v1135_v59 = vld [vmem:[#allocation8 + $0x14b0] sm:$0xff] }
 0x2cc   :  { %2566 = vmatpush2.msra.mxu0 %v1239_v56  ;;  %2637 = vmatpush2.msra.mxu1 %v1495_v3  ;;  %v1391_v1 = vld [vmem:[#allocation8 + $0x1cb0] sm:$0xff]  ;;  %v1128_v56 = vld [vmem:[#allocation8 + $0x1478] sm:$0xff] }
 0x2cd   :  { %2567 = vmatprep.subr.mxu0 %v1232_v4  ;;  %2638 = vmatprep.subr.mxu1 %v1488_v5  ;;  %v1384_v3 = vld [vmem:[#allocation8 + $0x1c78] sm:$0xff]  ;;  %v1127_v4 = vld [vmem:[#allocation8 + $0x1470] sm:$0xff] }
 0x2ce   :  { %2568 = vmatpush2.msra.mxu0 %v1231_v22  ;;  %2639 = vmatpush2.msra.mxu1 %v1487_v6  ;;  %v1383_v5 = vld [vmem:[#allocation8 + $0x1c70] sm:$0xff]  ;;  %v1120_v22 = vld [vmem:[#allocation8 + $0x1438] sm:$0xff] }
 0x2cf   :  { %2569 = vmatprep.subr.mxu0 %v1224_v26  ;;  %2640 = vmatprep.subr.mxu1 %v1480_v7  ;;  %v1376_v6 = vld [vmem:[#allocation8 + $0x1c38] sm:$0xff]  ;;  %v1119_v26 = vld [vmem:[#allocation8 + $0x1430] sm:$0xff] }
 0x2d0   :  { %2570 = vmatpush2.msra.mxu0 %v1223_v8  ;;  %2641 = vmatpush2.msra.mxu1 %v1479_v9  ;;  %v1375_v7 = vld [vmem:[#allocation8 + $0x1c30] sm:$0xff]  ;;  %v1605_v8 = vpop.f32.mrf.mxu0 }
 0x2d1   :  { %2571 = vmatprep.subr.mxu0 %v1216_v10  ;;  %2642 = vmatprep.subr.mxu1 %v1472_v38  ;;  %v1676_v10 = vpop.f32.mrf.mxu1 }
 0x2d2   :  { %2572 = vmatpush2.msra.mxu0 %v1215_v11  ;;  %2643 = vmatpush2.msra.mxu1 %v1471_v12  ;;  %v1607_v9 = vpop.f32.mrf.mxu0 }
 0x2d3   :  { %2573 = vmatprep.subr.mxu0 %v1208_v13  ;;  %2644 = vmatprep.subr.mxu1 %v1464_v14  ;;  %v1678_v11 = vpop.f32.mrf.mxu1 }
 0x2d4   :  { %2574 = vmatpush2.msra.mxu0 %v1207_v15  ;;  %2645 = vmatpush2.msra.mxu1 %v1463_v16  ;;  %v1747_v38 = vpop.f32.mrf.mxu0  ;;  %v3072_v15 = vld [vmem:[#allocation10] sm:$0xff] }
 0x2d5   :  { %2575 = vmatprep.subr.mxu0 %v1200_v17  ;;  %2646 = vmatprep.subr.mxu1 %v1456_v18  ;;  %v1818_v13 = vpop.f32.mrf.mxu1  ;;  %v1506_v16 = vrot.slane %v3072_v15, %v2991_v42 }
 0x2d6   :  { %2576 = vmatpush2.msra.mxu0 %v1199_v19  ;;  %2647 = vmatpush2.msra.mxu1 %v1455_v20  ;;  %v1749_v12 = vpop.f32.mrf.mxu0 }
 0x2d7   :  { %2577 = vmatprep.subr.mxu0 %v1192_v21  ;;  %2648 = vmatprep.subr.mxu1 %v1448_v23  ;;  %v1820_v17 = vpop.f32.mrf.mxu1  ;;  %v1608_v21 = vadd.f32 %v1607_v9, %v1506_v16 }
 0x2d8   :  { %2578 = vmatpush2.msra.mxu0 %v1191_v41  ;;  %2649 = vmatpush2.msra.mxu1 %v1447_v24  ;;  %v1889_v14 = vpop.f32.mrf.mxu0  ;;  %v1514_v24 = vrot.slane %v3072_v15, %v2994_v43 }
 0x2d9   :  { %2579 = vmatprep.subr.mxu0 %v1184_v25  ;;  %2650 = vmatprep.subr.mxu1 %v1440_v27  ;;  %v1960_v19 = vpop.f32.mrf.mxu1 }
 0x2da   :  { %2580 = vmatpush2.msra.mxu0 %v1183_v28  ;;  %2651 = vmatpush2.msra.mxu1 %v1439_v30  ;;  %v1891_v18 = vpop.f32.mrf.mxu0  ;;  %v1679_v28 = vadd.f32 %v1678_v11, %v1608_v21 }
 0x2db   :  { %2581 = vmatprep.subr.mxu0 %v1176_v57  ;;  %2652 = vmatprep.subr.mxu1 %v1432_v32  ;;  %v1962_v25 = vpop.f32.mrf.mxu1  ;;  %v1518_v57 = vrot.slane %v3072_v15, %v3028_v2 }
 0x2dc   :  { %2582 = vmatpush2.msra.mxu0 %v1175_v58  ;;  %2653 = vmatpush2.msra.mxu1 %v1431_v33  ;;  %v2031_v20 = vpop.f32.mrf.mxu0  ;;  %v1750_v33 = vadd.f32 %v1749_v12, %v1679_v28 }
 0x2dd   :  { %2583 = vmatprep.subr.mxu0 %v1168_v34  ;;  %2654 = vmatprep.subr.mxu1 %v1424_v35  ;;  %v2102_v30 = vpop.f32.mrf.mxu1  ;;  %v1892_v35 = vadd.f32 %v1891_v18, %v1514_v24 }
 0x2de   :  { %2584 = vmatpush2.msra.mxu0 %v1167_v36  ;;  %2655 = vmatpush2.msra.mxu1 %v1423_v37  ;;  %v2033_v27 = vpop.f32.mrf.mxu0 }
 0x2df   :  { %2585 = vmatprep.subr.mxu0 %v1160_v44  ;;  %2656 = vmatprep.subr.mxu1 %v1416_v45  ;;  %v2104_v44 = vpop.f32.mrf.mxu1 }
 0x2e0   :  { %2586 = vmatpush2.msra.mxu0 %v1159_v47  ;;  %2657 = vmatpush2.msra.mxu1 %v1415_v48  ;;  %v1522_v47 = vrot.slane %v3072_v15, %v3017_v46 }
 0x2e1   :  { %2587 = vmatprep.subr.mxu0 %v1152_v49  ;;  %2658 = vmatprep.subr.mxu1 %v1408_v50  ;;  %v1821_v49 = vadd.f32 %v1820_v17, %v1750_v33  ;;  %v1963_v50 = vadd.f32 %v1962_v25, %v1892_v35 }
 0x2e2   :  { %2588 = vmatpush2.msra.mxu0 %v1151_v51  ;;  %2659 = vmatpush2.msra.mxu1 %v1407_v53 }
 0x2e3   :  { %2589 = vmatprep.subr.mxu0 %v1144_v54  ;;  %2660 = vmatprep.subr.mxu1 %v1400_v60  ;;  %v2683_v60 = vld [vmem:[#allocation11] sm:$0xff] }
 0x2e4   :  { %2590 = vmatpush2.msra.mxu0 %v1143_v61  ;;  %2661 = vmatpush2.msra.mxu1 %v1399_v62  ;;  %v2034_v62 = vadd.f32 %v2033_v27, %v1963_v50  ;;  %v2716_v50 = vrot.slane %v2683_v60, %v3020_v52 }
 0x2e5   :  { %2591 = vmatprep.subr.mxu0 %v1136_v63  ;;  %2662 = vmatprep.subr.mxu1 %v1392_v0  ;;  %v2173_v32 = vpop.f32.mrf.mxu0  ;;  %v2244_v51 = vpop.f32.mrf.mxu1 }
 0x2e6   :  { %2592 = vmatpush2.msra.mxu0 %v1135_v59  ;;  %2663 = vmatpush2.msra.mxu1 %v1391_v1  ;;  %v2174_v45 = vadd.f32 %v2173_v32, %v1518_v57  ;;  %v2676_v59 = vmax.f32 %v1821_v49, 0.0  ;;  %v2692_v1 = vrot.slane %v2683_v60, %v2991_v42 }
 0x2e7   :  { %2593 = vmatprep.subr.mxu0 %v1128_v56  ;;  %2664 = vmatprep.subr.mxu1 %v1384_v3  ;;  %v2175_v48 = vpop.f32.mrf.mxu0  ;;  %v2246_v56 = vpop.f32.mrf.mxu1 }
 0x2e8   :  { %2594 = vmatpush2.msra.mxu0 %v1127_v4  ;;  %2665 = vmatpush2.msra.mxu1 %v1383_v5  ;;  %v2245_v63 = vadd.f32 %v2244_v51, %v2174_v45  ;;  %v2176_v0 = vadd.f32 %v2175_v48, %v1522_v47  ;;  %v2688_v4 = vrot.slane %v2683_v60, %v2986_v40 }
 0x2e9   :  { %2595 = vmatprep.subr.mxu0 %v1120_v22  ;;  %2666 = vmatprep.subr.mxu1 %v1376_v6  ;;  %v2696_v6 = vrot.slane %v2683_v60, %v2983_v39 }
 0x2ea   :  { %2596 = vmatpush2.msra.mxu0 %v1119_v26  ;;  %2667 = vmatpush2.msra.mxu1 %v1375_v7  ;;  %v2105_v26 = vadd.f32 %v2104_v44, %v2034_v62  ;;  %v2247_v9 = vadd.f32 %v2246_v56, %v2176_v0  ;;  %v2712_v44 = vrot.slane %v2683_v60, %v3023_v55 }
 0x2eb   :  { %2598 = vmatmul.mubr.f32.vlgmr.msra.gmra.mxu0 %v3043_v31  ;;  %2669 = vmatmul.mubr.f32.vlgmr.msra.gmra.mxu1 %v3040_v29  ;;  %v1502_v31 = vrot.slane %v3072_v15, %v2986_v40  ;;  %v1510_v29 = vrot.slane %v3072_v15, %v2983_v39  ;;  %v2700_v40 = vrot.slane %v2683_v60, %v2994_v43 }
 0x2ec   :  { %v2678_v16 = vmax.f32 %v2105_v26, 0.0  ;;  %v1530_v39 = vrot.slane %v3072_v15, %v3020_v52  ;;  %v2708_v43 = vrot.slane %v2683_v60, %v3017_v46 }
 0x2ed   :  { %v1606_v23 = vadd.f32 %v1605_v8, %v1502_v31  ;;  %v1890_v41 = vadd.f32 %v1889_v14, %v1510_v29  ;;  %v2704_v29 = vrot.slane %v2683_v60, %v3028_v2 }
 0x2ee   :  { %v2728_v24 = vmul.f32 %v2700_v40, %v2678_v16 }
 0x2ef   :  { %v1677_v58 = vadd.f32 %v1676_v10, %v1606_v23  ;;  %v1961_v34 = vadd.f32 %v1960_v19, %v1890_v41  ;;  %v2726_v10 = vmul.f32 %v2692_v1, %v2676_v59 }
 0x2f1   :  { %v1748_v36 = vadd.f32 %v1747_v38, %v1677_v58  ;;  %v2032_v37 = vadd.f32 %v2031_v20, %v1961_v34 }
 0x2f3   :  { %v1819_v54 = vadd.f32 %v1818_v13, %v1748_v36  ;;  %v2103_v61 = vadd.f32 %v2102_v30, %v2032_v37  ;;  %v1526_v13 = vrot.slane %v3072_v15, %v3023_v55 }
 0x2f5   :  { %v2675_v5 = vmax.f32 %v1819_v54, 0.0  ;;  %v2677_v22 = vmax.f32 %v2103_v61, 0.0 }
 0x2f7   :  { %v2725_v42 = vmul.f32 %v2688_v4, %v2675_v5  ;;  %v2727_v14 = vmul.f32 %v2696_v6, %v2677_v22 }
 0x2f9   :  { %v2733_v18 = vadd.f32 %v2726_v10, %v2725_v42 }
 0x2fb   :  { %v2734_v41 = vadd.f32 %v2733_v18, %v2727_v14 }
 0x2fd   :  { %v2735_v32 = vadd.f32 %v2734_v41, %v2728_v24 }
 0x327   :  { %v2315_v53 = vpop.f32.mrf.mxu0  ;;  %v2386_v7 = vpop.f32.mrf.mxu1 }
 0x328   :  { %v2316_v3 = vadd.f32 %v2315_v53, %v2245_v63  ;;  %v2764_v63 = vld [vmem:[#allocation2] ss:$0 sm:$0xff] }
 0x329   :  { %v2317_v8 = vpop.f32.mrf.mxu0  ;;  %v2388_v17 = vpop.f32.mrf.mxu1 }
 0x32a   :  { %v2387_v38 = vadd.f32 %v2386_v7, %v2316_v3  ;;  %v2318_v12 = vadd.f32 %v2317_v8, %v2247_v9 }
 0x32c   :  { %v2679_v31 = vmax.f32 %v2387_v38, 0.0  ;;  %v2389_v21 = vadd.f32 %v2388_v17, %v2318_v12 }
 0x32e   :  { %v2729_v27 = vmul.f32 %v2704_v29, %v2679_v31  ;;  %v2680_v30 = vmax.f32 %v2389_v21, 0.0 }
 0x330   :  { %v2736_v35 = vadd.f32 %v2735_v32, %v2729_v27  ;;  %v2730_v36 = vmul.f32 %v2708_v43, %v2680_v30 }
 0x332   :  { %v2737_v53 = vadd.f32 %v2736_v35, %v2730_v36 }
 0x369   :  { %v2457_v11 = vpop.f32.mrf.mxu0  ;;  %v2528_v19 = vpop.f32.mrf.mxu1 }
 0x36a   :  { %v2458_v23 = vadd.f32 %v2457_v11, %v1526_v13 }
 0x36b   :  { %v2459_v20 = vpop.f32.mrf.mxu0  ;;  %v2530_v28 = vpop.f32.mrf.mxu1 }
 0x36c   :  { %v2460_v25 = vadd.f32 %v2459_v20, %v1530_v39  ;;  %v2529_v57 = vadd.f32 %v2528_v19, %v2458_v23 }
 0x36e   :  { %v2531_v33 = vadd.f32 %v2530_v28, %v2460_v25 }
 0x3ab   :  { %v2599_v58 = vpop.f32.mrf.mxu0  ;;  %v2670_v15 = vpop.f32.mrf.mxu1 }
 0x3ac   :  { %v2600_v34 = vadd.f32 %v2599_v58, %v2529_v57 }
 0x3ad   :  { %v2601_v2 = vpop.f32.mrf.mxu0  ;;  %v2672_v47 = vpop.f32.mrf.mxu1 }
 0x3ae   :  { %v2671_v37 = vadd.f32 %v2670_v15, %v2600_v34  ;;  %v2602_v45 = vadd.f32 %v2601_v2, %v2531_v33 }
 0x3b0   :  { %v2681_v48 = vmax.f32 %v2671_v37, 0.0  ;;  %v2673_v49 = vadd.f32 %v2672_v47, %v2602_v45 }
 0x3b2   :  { %v2731_v51 = vmul.f32 %v2712_v44, %v2681_v48  ;;  %v2682_v46 = vmax.f32 %v2673_v49, 0.0 }
 0x3b4   :  { %v2732_v54 = vmul.f32 %v2716_v50, %v2682_v46  ;;  %v2738_v61 = vadd.f32 %v2737_v53, %v2731_v51 }
 0x3b6   :  { %v2739_v62 = vadd.f32 %v2738_v61, %v2732_v54 }
 0x3b8   :  { %2740 = vadd.xlane.f32.xlu0 %v2739_v62 }
 0x441   :  { %v2741_v0 = vpop.xlane.xlu0 %2740 }
 0x442   :  { %v2749_v59 = vadd.f32 %v2764_v63, %v2741_v0 }
 0x444   :  { %2751 = vst.msk [vmem:[%s3108_s7] sm:$0xff] %vm2750_vm1, %v2749_v59 }
 0x445   :  { %2756 = vsyncpa [#allocation4], 1 }
 0x446   :  { %2757 = vsyncpa [#allocation6], 1 }
 0x447   :  { %2758 = vsyncpa [#allocation9], 1 }
 0x448   :  { %2759 = vsyncpa [#allocation12], 1 }

</bundles_post_ra>
